<compile_context>
chip_gen: v7x
topology: tpu7x:2x2x1
jax: 0.10.0
libtpu: 0.0.40
codegen_flags: <defaults>
</compile_context>

<pallas_src>
import jax
import jax.numpy as jnp
from jax import lax
from jax.experimental import pallas as pl
from jax.experimental.pallas import tpu as pltpu

H_IN, W_IN = 6, 6            # backbone feature map spatial (128 channels)
H_MID, W_MID = 3, 3          # after the stride-2 FaceMeshBlock
N_IN = H_IN * W_IN           # 36
N_MID = H_MID * W_MID        # 9
C_BB = 128
C_HEAD = 32
FC1_OUT, FC2_OUT = 128, 64
PATCH_K = 32                 # im2col inner dim: 27 taps zero-padded to a 32-lane chunk
B_BLK_MAX = 256              # max batch rows per grid step (f32 working set ~20 MB)


def _round_up(x, m):
    return ((x + m - 1) // m) * m


# ---------------------------------------------------------------------------
# Parameter packing: every weight/bias/PReLU slope with the same lane width is
# packed (8-row aligned) into one lane-dense slab.  The layout below is the
# single source of truth for both the packer and the kernel.
# ---------------------------------------------------------------------------
def _layout(spec):
    offs, rows = {}, 0
    for name, n in spec:
        offs[name] = (rows, n)
        rows += _round_up(n, 8)
    return offs, _round_up(rows, 8)


_SPEC128 = (
    ("bb_w", PATCH_K), ("bb_b", 1),
    ("b1_dw_w", 9), ("b1_dw_b", 1), ("b1_pw_w", 128), ("b1_pw_b", 1), ("b1_pr", 1),
    ("b2_dw_w", 9), ("b2_dw_b", 1), ("b2_pw_w", 128), ("b2_pw_b", 1), ("b2_pr", 1),
    ("b3_dw_w", 9), ("b3_dw_b", 1), ("b3_pw_w", 128), ("b3_pw_b", 1), ("b3_pr", 1),
    ("fc1_w", 288), ("fc1_b", 1),
    ("fc2_w", 128), ("fc2_b", 1),          # zero-padded 64 -> 128 lanes
)
_SPEC32 = (
    ("c4_w", 128), ("c4_b", 1), ("c4_pr", 1),
    ("b5_dw_w", 9), ("b5_dw_b", 1), ("b5_pw_w", 32), ("b5_pw_b", 1), ("b5_pr", 1),
)

_OFF128, _ROWS128 = _layout(_SPEC128)
_OFF32, _ROWS32 = _layout(_SPEC32)


def _fill_slab(vals, offs, rows, width):
    slab = jnp.zeros((rows, width), jnp.float32)
    for name, (o, n) in offs.items():
        a = jnp.asarray(vals[name], jnp.float32)
        assert a.shape == (n, width), (name, a.shape, (n, width))
        slab = slab.at[o:o + n, :].set(a)
    return slab


# ---------------------------------------------------------------------------
# Deterministic parameter initialization (PyTorch-layout shapes; no checkpoint).
# ---------------------------------------------------------------------------
def init_params(key):
    keys = iter(jax.random.split(key, 32))

    def rnd(shape, scale=0.1):
        return jax.random.normal(next(keys), shape, jnp.float32) * scale

    def block(c):
        # FaceMeshBlock: depthwise 3x3 (groups=c) + 1x1 conv + PReLU(c)
        return {"dw_w": rnd((c, 1, 3, 3)), "dw_b": rnd((c,)),
                "pw_w": rnd((c, c, 1, 1)), "pw_b": rnd((c,)),
                "prelu": jnp.full((c,), 0.25, jnp.float32)}

    return {
        # TODO(synk): the real backbone is an external pretrained module
        # (pretrained_model_face.backbone) not defined in the source; replaced by
        # a deterministic 3x3/stride-8 conv + ReLU stub producing (B,128,6,6).
        "backbone_w": rnd((C_BB, 3, 3, 3)), "backbone_b": rnd((C_BB,)),
        "block1": block(C_BB), "block2": block(C_BB), "block3": block(C_BB),
        "c4_w": rnd((C_HEAD, C_BB, 1, 1)), "c4_b": rnd((C_HEAD,)),
        "c4_prelu": jnp.full((C_HEAD,), 0.25, jnp.float32),
        "block5": block(C_HEAD),
        "fc1_w": rnd((FC1_OUT, C_HEAD * N_MID)), "fc1_b": rnd((FC1_OUT,)),
        "fc2_w": rnd((FC2_OUT, FC1_OUT)), "fc2_b": rnd((FC2_OUT,)),
    }


def pack_params(p):
    """Convert torch-layout parameters into the kernel's two lane-dense slabs."""
    def dw(blk):      # (C,1,3,3),(C,) -> (9,C),(1,C)   tap index t = ky*3+kx
        c = blk["dw_w"].shape[0]
        return blk["dw_w"].reshape(c, 9).T, blk["dw_b"].reshape(1, c)

    def pw(w, bias):  # (Co,Ci,1,1),(Co,) -> (Ci,Co),(1,Co)
        co, ci = w.shape[0], w.shape[1]
        return w.reshape(co, ci).T, bias.reshape(1, co)

    v128, v32 = {}, {}
    # backbone stub weight: rows c*9 + ky*3 + kx, zero-padded 27 -> 32 rows
    v128["bb_w"] = jnp.pad(p["backbone_w"].reshape(C_BB, 27).T,
                           ((0, PATCH_K - 27), (0, 0)))
    v128["bb_b"] = p["backbone_b"].reshape(1, C_BB)
    for i, name in ((1, "block1"), (2, "block2"), (3, "block3")):
        blk = p[name]
        v128[f"b{i}_dw_w"], v128[f"b{i}_dw_b"] = dw(blk)
        v128[f"b{i}_pw_w"], v128[f"b{i}_pw_b"] = pw(blk["pw_w"], blk["pw_b"])
        v128[f"b{i}_pr"] = blk["prelu"].reshape(1, C_BB)
    # fc1 weight rows permuted from torch flatten order (c*9 + n) to the kernel's
    # per-spatial-position order (n*32 + c) so the lane-concatenated (B,288) LHS
    # multiplies it directly.
    v128["fc1_w"] = (p["fc1_w"].reshape(FC1_OUT, C_HEAD, N_MID)
                     .transpose(2, 1, 0).reshape(C_HEAD * N_MID, FC1_OUT))
    v128["fc1_b"] = p["fc1_b"].reshape(1, FC1_OUT)
    # fc2 zero-padded 64 -> 128 output lanes (lane-dense output block)
    v128["fc2_w"] = jnp.pad(p["fc2_w"].T, ((0, 0), (0, 128 - FC2_OUT)))
    v128["fc2_b"] = jnp.pad(p["fc2_b"].reshape(1, FC2_OUT),
                            ((0, 0), (0, 128 - FC2_OUT)))

    v32["c4_w"], v32["c4_b"] = pw(p["c4_w"], p["c4_b"])
    v32["c4_pr"] = p["c4_prelu"].reshape(1, C_HEAD)
    b5 = p["block5"]
    v32["b5_dw_w"], v32["b5_dw_b"] = dw(b5)
    v32["b5_pw_w"], v32["b5_pw_b"] = pw(b5["pw_w"], b5["pw_b"])
    v32["b5_pr"] = b5["prelu"].reshape(1, C_HEAD)

    return {"s128": _fill_slab(v128, _OFF128, _ROWS128, 128),
            "s32": _fill_slab(v32, _OFF32, _ROWS32, 32)}


# ---------------------------------------------------------------------------
# The fused kernel.  Activations are position-major (9*B_BLK, C) f32 arrays:
# C on lanes, batch on sublanes; per-position tiles are aligned row slices.
# ---------------------------------------------------------------------------
def _make_kernel(b_blk):
    f32, bf16 = jnp.float32, jnp.bfloat16

    def _mxu(a, w):
        # bf16 operands -> single-pass MXU on every generation; f32 accumulate.
        return jnp.dot(a.astype(bf16), w.astype(bf16), preferred_element_type=f32)

    def _prelu(v, alpha):                       # alpha: (1, C)
        return jnp.where(v >= 0.0, v, v * alpha)

    def _tap_weights(dw_w, c):
        # Hoisted: broadcast each of the 9 depthwise tap rows to (b_blk, c) ONCE
        # per block and reuse in the unrolled FMAs (broadcast_in_dim isn't CSE'd).
        return [jnp.broadcast_to(dw_w[t:t + 1, :], (b_blk, c)) for t in range(9)]

    def _row(x, p):                             # position-p tile of (9B, C)
        return x[p * b_blk:(p + 1) * b_blk, :]

    def _block_s2(x_tiles, dw_w, dw_b, pw_w, pw_b, pr):
        """FaceMeshBlock stride 2: 6x6 -> 3x3.  x_tiles: 6x6 list of (B,C)."""
        c = x_tiles[0][0].shape[-1]
        w_b = _tap_weights(dw_w, c)
        conv_t, short_t = [], []
        for oy in range(H_MID):
            for ox in range(W_MID):
                acc = None
                for dy in range(3):
                    for dx in range(3):
                        iy, ix = 2 * oy + dy, 2 * ox + dx
                        if iy < H_IN and ix < W_IN:      # >= 6 hits the zero pad
                            v = x_tiles[iy][ix] * w_b[dy * 3 + dx]
                            acc = v if acc is None else acc + v
                conv_t.append(acc)
                m = jnp.maximum(
                    jnp.maximum(x_tiles[2 * oy][2 * ox], x_tiles[2 * oy][2 * ox + 1]),
                    jnp.maximum(x_tiles[2 * oy + 1][2 * ox], x_tiles[2 * oy + 1][2 * ox + 1]))
                short_t.append(m)
        conv = jnp.concatenate(conv_t, axis=0) + dw_b           # (9B, C)
        conv = _mxu(conv, pw_w) + pw_b
        short = jnp.concatenate(short_t, axis=0)
        return _prelu(conv + short, pr)                         # (9B, C)

    def _block_s1(x, dw_w, dw_b, pw_w, pw_b, pr):
        """FaceMeshBlock stride 1: 3x3 -> 3x3.  Input-stationary depthwise:
        each of the 9 input tiles is read once and FMA'd into its <=9 output
        accumulators (9 instead of ~49 input-tile reads)."""
        c = x.shape[-1]
        w_b = _tap_weights(dw_w, c)
        xt = [_row(x, p) for p in range(N_MID)]
        acc = [None] * N_MID
        for ip in range(N_MID):
            iy, ix = ip // W_MID, ip % W_MID
            for t in range(9):
                dy, dx = t // 3, t % 3
                oy, ox = iy - dy + 1, ix - dx + 1       # output fed by this tap
                if 0 <= oy < H_MID and 0 <= ox < W_MID:
                    v = xt[ip] * w_b[t]
                    op = oy * W_MID + ox
                    acc[op] = v if acc[op] is None else acc[op] + v
        conv = jnp.concatenate(acc, axis=0) + dw_b              # (9B, C)
        conv = _mxu(conv, pw_w) + pw_b
        return _prelu(conv + x, pr)                             # identity shortcut

    def kernel(patch_ref, s128_ref, s32_ref, out_ref):
        def p128(name):
            o, n = _OFF128[name]
            return s128_ref[pl.ds(o, n), :]

        def p32(name):
            o, n = _OFF32[name]
            return s32_ref[pl.ds(o, n), :]

        # ---- backbone stub: host-side im2col @ (32,128) + ReLU ----------------
        patches = patch_ref[...].reshape(N_IN * b_blk, PATCH_K)    # (36*B, 32)
        feat = jnp.maximum(_mxu(patches, p128("bb_w")) + p128("bb_b"), 0.0)
        x_tiles = [[feat[(iy * W_IN + ix) * b_blk:(iy * W_IN + ix + 1) * b_blk, :]
                    for ix in range(W_IN)] for iy in range(H_IN)]   # 6x6 of (B,128)

        # ---- regression_head_face ---------------------------------------------
        x = _block_s2(x_tiles, p128("b1_dw_w"), p128("b1_dw_b"),
                      p128("b1_pw_w"), p128("b1_pw_b"), p128("b1_pr"))
        x = _block_s1(x, p128("b2_dw_w"), p128("b2_dw_b"),
                      p128("b2_pw_w"), p128("b2_pw_b"), p128("b2_pr"))
        x = _block_s1(x, p128("b3_dw_w"), p128("b3_dw_b"),
                      p128("b3_pw_w"), p128("b3_pw_b"), p128("b3_pr"))
        # nn.Conv2d(128, 32, 1) + nn.PReLU(32)
        y = _prelu(_mxu(x, p32("c4_w")) + p32("c4_b"), p32("c4_pr"))   # (9B, 32)
        y = _block_s1(y, p32("b5_dw_w"), p32("b5_dw_b"),
                      p32("b5_pw_w"), p32("b5_pw_b"), p32("b5_pr"))    # (9B, 32)

        # ---- flatten (NCHW order folded into the fc1 weight permutation) + fc ---
        # Lane-concat the 9 position tiles -> (B, 288): one K=288 matmul for fc1.
        h = jnp.concatenate([_row(y, p) for p in range(N_MID)], axis=1)
        h = jnp.maximum(_mxu(h, p128("fc1_w")) + p128("fc1_b"), 0.0)
        # fc2 is zero-padded 64 -> 128 lanes: lane-dense (B,128) output block.
        out_ref[...] = jnp.maximum(_mxu(h, p128("fc2_w")) + p128("fc2_b"), 0.0)

    return kernel


# ---------------------------------------------------------------------------
# Block-size selection + full forward pass (single pallas_call).
# ---------------------------------------------------------------------------
def _choose_block(b, b_blk_max):
    b_blk_max = _round_up(b_blk_max, 8)
    b8 = _round_up(b, 8)
    if b8 <= min(128, b_blk_max):
        b_blk = b8                                   # small batch: one block
    else:
        # >= 2 blocks so the "parallel" batch axis feeds both v7x TensorCores,
        # each block capped at b_blk_max rows.
        n_blk = max(2, -(-b8 // b_blk_max))
        b_blk = min(b_blk_max, _round_up(-(-b8 // n_blk), 8))
    return b_blk, _round_up(b, b_blk)


def face_model_forward(x, slabs, *, b_blk_max=B_BLK_MAX):
    """x: (B, 3, 48, 48) NCHW in [0, 1] -> (B, 64)."""
    b = x.shape[0]
    # _preprocess: float32 * 2 - 1
    xf = x.astype(jnp.float32) * 2.0 - 1.0
    # ReflectionPad2d((1, 0, 1, 0)): pad left/top by 1
    xp = jnp.pad(xf, ((0, 0), (0, 0), (1, 0), (1, 0)), mode="reflect")  # (B,3,49,49)

    # TODO(synk): real backbone is an external pretrained module; stub = 3x3
    # conv, stride 8, + ReLU.  Single strided im2col (no Python loop over 36).
    crop = xp[:, :, : H_IN * 8, : W_IN * 8]                             # (B,3,48,48)
    xw = crop.reshape(b, 3, H_IN, 8, W_IN, 8)[:, :, :, :3, :, :3]       # (B,3,6,3,6,3)
    patches = xw.transpose(2, 4, 0, 1, 3, 5).reshape(N_IN, b, 27)       # (36, B, 27)

    b_blk, b_pad = _choose_block(b, b_blk_max)
    patches = jnp.pad(patches, ((0, 0), (0, b_pad - b), (0, PATCH_K - 27)))

    grid_spec = pltpu.PrefetchScalarGridSpec(
        num_scalar_prefetch=0,
        grid=(b_pad // b_blk,),
        in_specs=[
            pl.BlockSpec((N_IN, b_blk, PATCH_K), lambda i: (0, i, 0)),
            pl.BlockSpec((_ROWS128, 128), lambda i: (0, 0)),
            pl.BlockSpec((_ROWS32, 32), lambda i: (0, 0)),
        ],
        out_specs=pl.BlockSpec((b_blk, 128), lambda i: (i, 0)),
    )
    cp = dict(dimension_semantics=("parallel",))    # batch blocks are independent
    if b_blk > 64:
        # Large batch blocks: raise the scoped-VMEM cap (f32 working set at
        # b_blk=256 is ~20 MB; 48 MiB stays under v7x's 64 MiB physical VMEM).
        cp["vmem_limit_bytes"] = 48 * 1024 * 1024
    out = pl.pallas_call(
        _make_kernel(b_blk),
        out_shape=jax.ShapeDtypeStruct((b_pad, 128), jnp.float32),
        grid_spec=grid_spec,
        compiler_params=pltpu.CompilerParams(**cp),
    )(patches, slabs["s128"], slabs["s32"])
    return out[:b, :FC2_OUT]


# ---------------------------------------------------------------------------
# Pure-JAX/XLA reference (same semantics) for a correctness check.
# ---------------------------------------------------------------------------
_HI = lax.Precision.HIGHEST


def _ref_prelu(v, a):
    return jnp.where(v >= 0.0, v, v * a.reshape(1, -1, 1, 1))


def _ref_dw(v, w, b, stride):
    c = v.shape[1]
    if stride == 2:
        v = jnp.pad(v, ((0, 0), (0, 0), (0, 2), (0, 2)))   # F.pad(x, (0,2,0,2))
        strides, pad = (2, 2), "VALID"
    else:
        strides, pad = (1, 1), ((1, 1), (1, 1))
    out = lax.conv_general_dilated(
        v, w, strides, pad, dimension_numbers=("NCHW", "OIHW", "NCHW"),
        feature_group_count=c, precision=_HI)
    return out + b.reshape(1, c, 1, 1)


def _ref_pw(v, w, b):
    co, ci = w.shape[0], w.shape[1]
    out = jnp.einsum("bchw,oc->bohw", v, w.reshape(co, ci), precision=_HI)
    return out + b.reshape(1, co, 1, 1)


def _ref_block(v, blk, stride):
    conv = _ref_pw(_ref_dw(v, blk["dw_w"], blk["dw_b"], stride),
                   blk["pw_w"], blk["pw_b"])
    if stride == 2:
        short = jnp.maximum(jnp.maximum(v[:, :, 0::2, 0::2], v[:, :, 0::2, 1::2]),
                            jnp.maximum(v[:, :, 1::2, 0::2], v[:, :, 1::2, 1::2]))
    else:
        short = v
    return _ref_prelu(conv + short, blk["prelu"])


def face_model_reference(x, p):
    b = x.shape[0]
    xf = x.astype(jnp.float32) * 2.0 - 1.0
    xp = jnp.pad(xf, ((0, 0), (0, 0), (1, 0), (1, 0)), mode="reflect")
    feat = lax.conv_general_dilated(
        xp[:, :, : H_IN * 8, : W_IN * 8], p["backbone_w"], (8, 8), "VALID",
        dimension_numbers=("NCHW", "OIHW", "NCHW"), precision=_HI)
    feat = jnp.maximum(feat + p["backbone_b"].reshape(1, C_BB, 1, 1), 0.0)
    v = _ref_block(feat, p["block1"], 2)
    v = _ref_block(v, p["block2"], 1)
    v = _ref_block(v, p["block3"], 1)
    v = _ref_prelu(_ref_pw(v, p["c4_w"], p["c4_b"]), p["c4_prelu"])
    v = _ref_block(v, p["block5"], 1)
    flat = v.reshape(b, C_HEAD * N_MID)                    # NCHW flatten: c*9 + h*3 + w
    h = jnp.maximum(jnp.dot(flat, p["fc1_w"].T, precision=_HI) + p["fc1_b"], 0.0)
    return jnp.maximum(jnp.dot(h, p["fc2_w"].T, precision=_HI) + p["fc2_b"], 0.0)


if __name__ == "__main__":
    key = jax.random.PRNGKey(0)
    k_x, k_p = jax.random.split(key)
    x = jax.random.uniform(k_x, (2, 3, 48, 48), dtype=jnp.float32)
    params = init_params(k_p)
    slabs = pack_params(params)

    out = jax.block_until_ready(jax.jit(face_model_forward)(x, slabs))
    assert out.shape == (2, FC2_OUT) and out.dtype == jnp.float32

    ref = jax.block_until_ready(jax.jit(face_model_reference)(x, params))
    err = float(jnp.max(jnp.abs(out - ref)))
    scale = float(jnp.max(jnp.abs(ref))) + 1e-6
    # Tolerance accounts for bf16 MXU operands (f32 accumulation) vs the
    # Precision.HIGHEST f32 reference.
    assert err <= 2e-2 * scale + 1e-3, f"kernel vs reference mismatch: {err} (scale {scale})"
    print("KERNEL_OK")
</pallas_src>

<mosaic_0001>
module attributes {stable_mosaic.version = 11 : i64} {
  func.func @kernel(%arg0: i32, %arg1: memref<36x8x32xf32, #tpu.memory_space<vmem>>, %arg2: memref<976x128xf32, #tpu.memory_space<vmem>>, %arg3: memref<216x32xf32, #tpu.memory_space<vmem>>, %arg4: memref<8x128xf32, #tpu.memory_space<vmem>>) attributes {dimension_semantics = [#tpu.dimension_semantics<parallel>], iteration_bounds = array<i64: 1>, scalar_prefetch = 0 : i64, scratch_operands = 0 : i64, tpu.core_type = #tpu.core_type<tc>, window_params = [{transform_indices = @transform_0, window_bounds = array<i64: 36, 8, 32>}, {pipeline_mode = #tpu.pipeline_mode<synchronous>, transform_indices = @transform_1, window_bounds = array<i64: 976, 128>}, {pipeline_mode = #tpu.pipeline_mode<synchronous>, transform_indices = @transform_2, window_bounds = array<i64: 216, 32>}, {transform_indices = @transform_3, window_bounds = array<i64: 8, 128>}]} {
    %c0 = arith.constant 0 : index
    %c0_0 = arith.constant 0 : index
    %c0_1 = arith.constant 0 : index
    %0 = vector.load %arg1[%c0, %c0_0, %c0_1] : memref<36x8x32xf32, #tpu.memory_space<vmem>>, vector<36x8x32xf32>
    %1 = vector.shape_cast %0 : vector<36x8x32xf32> to vector<288x32xf32>
    %c0_2 = arith.constant 0 : index
    %c0_3 = arith.constant 0 : index
    %2 = vector.load %arg2[%c0_2, %c0_3] : memref<976x128xf32, #tpu.memory_space<vmem>>, vector<32x128xf32>
    %3 = arith.truncf %1 : vector<288x32xf32> to vector<288x32xbf16>
    %4 = arith.truncf %2 : vector<32x128xf32> to vector<32x128xbf16>
    %cst = arith.constant dense<0.000000e+00> : vector<288x128xf32>
    %5 = tpu.matmul %3, %4, %cst {dimension_numbers = #tpu.dot_dimension_numbers<[1], [0], [0], [1], [0, 0, 1, 1], [], []>} : vector<288x32xbf16>, vector<32x128xbf16>, vector<288x128xf32> -> vector<288x128xf32>
    %c32 = arith.constant 32 : index
    %c0_4 = arith.constant 0 : index
    %6 = vector.load %arg2[%c32, %c0_4] : memref<976x128xf32, #tpu.memory_space<vmem>>, vector<1x128xf32>
    %7 = vector.broadcast %6 : vector<1x128xf32> to vector<288x128xf32>
    %8 = arith.addf %5, %7 : vector<288x128xf32>
    %cst_5 = arith.constant 0.000000e+00 : f32
    %9 = vector.broadcast %cst_5 : f32 to vector<288x128xf32>
    %10 = arith.maximumf %8, %9 : vector<288x128xf32>
    %11 = vector.extract_strided_slice %10 {offsets = [0, 0], sizes = [8, 128], strides = [1, 1]} : vector<288x128xf32> to vector<8x128xf32>
    %12 = vector.extract_strided_slice %10 {offsets = [8, 0], sizes = [8, 128], strides = [1, 1]} : vector<288x128xf32> to vector<8x128xf32>
    %13 = vector.extract_strided_slice %10 {offsets = [16, 0], sizes = [8, 128], strides = [1, 1]} : vector<288x128xf32> to vector<8x128xf32>
    %14 = vector.extract_strided_slice %10 {offsets = [24, 0], sizes = [8, 128], strides = [1, 1]} : vector<288x128xf32> to vector<8x128xf32>
    %15 = vector.extract_strided_slice %10 {offsets = [32, 0], sizes = [8, 128], strides = [1, 1]} : vector<288x128xf32> to vector<8x128xf32>
    %16 = vector.extract_strided_slice %10 {offsets = [40, 0], sizes = [8, 128], strides = [1, 1]} : vector<288x128xf32> to vector<8x128xf32>
    %17 = vector.extract_strided_slice %10 {offsets = [48, 0], sizes = [8, 128], strides = [1, 1]} : vector<288x128xf32> to vector<8x128xf32>
    %18 = vector.extract_strided_slice %10 {offsets = [56, 0], sizes = [8, 128], strides = [1, 1]} : vector<288x128xf32> to vector<8x128xf32>
    %19 = vector.extract_strided_slice %10 {offsets = [64, 0], sizes = [8, 128], strides = [1, 1]} : vector<288x128xf32> to vector<8x128xf32>
    %20 = vector.extract_strided_slice %10 {offsets = [72, 0], sizes = [8, 128], strides = [1, 1]} : vector<288x128xf32> to vector<8x128xf32>
    %21 = vector.extract_strided_slice %10 {offsets = [80, 0], sizes = [8, 128], strides = [1, 1]} : vector<288x128xf32> to vector<8x128xf32>
    %22 = vector.extract_strided_slice %10 {offsets = [88, 0], sizes = [8, 128], strides = [1, 1]} : vector<288x128xf32> to vector<8x128xf32>
    %23 = vector.extract_strided_slice %10 {offsets = [96, 0], sizes = [8, 128], strides = [1, 1]} : vector<288x128xf32> to vector<8x128xf32>
    %24 = vector.extract_strided_slice %10 {offsets = [104, 0], sizes = [8, 128], strides = [1, 1]} : vector<288x128xf32> to vector<8x128xf32>
    %25 = vector.extract_strided_slice %10 {offsets = [112, 0], sizes = [8, 128], strides = [1, 1]} : vector<288x128xf32> to vector<8x128xf32>
    %26 = vector.extract_strided_slice %10 {offsets = [120, 0], sizes = [8, 128], strides = [1, 1]} : vector<288x128xf32> to vector<8x128xf32>
    %27 = vector.extract_strided_slice %10 {offsets = [128, 0], sizes = [8, 128], strides = [1, 1]} : vector<288x128xf32> to vector<8x128xf32>
    %28 = vector.extract_strided_slice %10 {offsets = [136, 0], sizes = [8, 128], strides = [1, 1]} : vector<288x128xf32> to vector<8x128xf32>
    %29 = vector.extract_strided_slice %10 {offsets = [144, 0], sizes = [8, 128], strides = [1, 1]} : vector<288x128xf32> to vector<8x128xf32>
    %30 = vector.extract_strided_slice %10 {offsets = [152, 0], sizes = [8, 128], strides = [1, 1]} : vector<288x128xf32> to vector<8x128xf32>
    %31 = vector.extract_strided_slice %10 {offsets = [160, 0], sizes = [8, 128], strides = [1, 1]} : vector<288x128xf32> to vector<8x128xf32>
    %32 = vector.extract_strided_slice %10 {offsets = [168, 0], sizes = [8, 128], strides = [1, 1]} : vector<288x128xf32> to vector<8x128xf32>
    %33 = vector.extract_strided_slice %10 {offsets = [176, 0], sizes = [8, 128], strides = [1, 1]} : vector<288x128xf32> to vector<8x128xf32>
    %34 = vector.extract_strided_slice %10 {offsets = [184, 0], sizes = [8, 128], strides = [1, 1]} : vector<288x128xf32> to vector<8x128xf32>
    %35 = vector.extract_strided_slice %10 {offsets = [192, 0], sizes = [8, 128], strides = [1, 1]} : vector<288x128xf32> to vector<8x128xf32>
    %36 = vector.extract_strided_slice %10 {offsets = [200, 0], sizes = [8, 128], strides = [1, 1]} : vector<288x128xf32> to vector<8x128xf32>
    %37 = vector.extract_strided_slice %10 {offsets = [208, 0], sizes = [8, 128], strides = [1, 1]} : vector<288x128xf32> to vector<8x128xf32>
    %38 = vector.extract_strided_slice %10 {offsets = [216, 0], sizes = [8, 128], strides = [1, 1]} : vector<288x128xf32> to vector<8x128xf32>
    %39 = vector.extract_strided_slice %10 {offsets = [224, 0], sizes = [8, 128], strides = [1, 1]} : vector<288x128xf32> to vector<8x128xf32>
    %40 = vector.extract_strided_slice %10 {offsets = [232, 0], sizes = [8, 128], strides = [1, 1]} : vector<288x128xf32> to vector<8x128xf32>
    %41 = vector.extract_strided_slice %10 {offsets = [240, 0], sizes = [8, 128], strides = [1, 1]} : vector<288x128xf32> to vector<8x128xf32>
    %42 = vector.extract_strided_slice %10 {offsets = [248, 0], sizes = [8, 128], strides = [1, 1]} : vector<288x128xf32> to vector<8x128xf32>
    %43 = vector.extract_strided_slice %10 {offsets = [256, 0], sizes = [8, 128], strides = [1, 1]} : vector<288x128xf32> to vector<8x128xf32>
    %44 = vector.extract_strided_slice %10 {offsets = [264, 0], sizes = [8, 128], strides = [1, 1]} : vector<288x128xf32> to vector<8x128xf32>
    %45 = vector.extract_strided_slice %10 {offsets = [272, 0], sizes = [8, 128], strides = [1, 1]} : vector<288x128xf32> to vector<8x128xf32>
    %46 = vector.extract_strided_slice %10 {offsets = [280, 0], sizes = [8, 128], strides = [1, 1]} : vector<288x128xf32> to vector<8x128xf32>
    %c40 = arith.constant 40 : index
    %c0_6 = arith.constant 0 : index
    %47 = vector.load %arg2[%c40, %c0_6] : memref<976x128xf32, #tpu.memory_space<vmem>>, vector<9x128xf32>
    %c56 = arith.constant 56 : index
    %c0_7 = arith.constant 0 : index
    %48 = vector.load %arg2[%c56, %c0_7] : memref<976x128xf32, #tpu.memory_space<vmem>>, vector<1x128xf32>
    %c64 = arith.constant 64 : index
    %c0_8 = arith.constant 0 : index
    %49 = vector.load %arg2[%c64, %c0_8] : memref<976x128xf32, #tpu.memory_space<vmem>>, vector<128x128xf32>
    %c192 = arith.constant 192 : index
    %c0_9 = arith.constant 0 : index
    %50 = vector.load %arg2[%c192, %c0_9] : memref<976x128xf32, #tpu.memory_space<vmem>>, vector<1x128xf32>
    %c200 = arith.constant 200 : index
    %c0_10 = arith.constant 0 : index
    %51 = vector.load %arg2[%c200, %c0_10] : memref<976x128xf32, #tpu.memory_space<vmem>>, vector<1x128xf32>
    %52 = vector.extract_strided_slice %47 {offsets = [0, 0], sizes = [1, 128], strides = [1, 1]} : vector<9x128xf32> to vector<1x128xf32>
    %53 = vector.shape_cast %52 : vector<1x128xf32> to vector<1x128xf32>
    %54 = vector.broadcast %53 : vector<1x128xf32> to vector<8x128xf32>
    %55 = vector.extract_strided_slice %47 {offsets = [1, 0], sizes = [1, 128], strides = [1, 1]} : vector<9x128xf32> to vector<1x128xf32>
    %56 = vector.shape_cast %55 : vector<1x128xf32> to vector<1x128xf32>
    %57 = vector.broadcast %56 : vector<1x128xf32> to vector<8x128xf32>
    %58 = vector.extract_strided_slice %47 {offsets = [2, 0], sizes = [1, 128], strides = [1, 1]} : vector<9x128xf32> to vector<1x128xf32>
    %59 = vector.shape_cast %58 : vector<1x128xf32> to vector<1x128xf32>
    %60 = vector.broadcast %59 : vector<1x128xf32> to vector<8x128xf32>
    %61 = vector.extract_strided_slice %47 {offsets = [3, 0], sizes = [1, 128], strides = [1, 1]} : vector<9x128xf32> to vector<1x128xf32>
    %62 = vector.shape_cast %61 : vector<1x128xf32> to vector<1x128xf32>
    %63 = vector.broadcast %62 : vector<1x128xf32> to vector<8x128xf32>
    %64 = vector.extract_strided_slice %47 {offsets = [4, 0], sizes = [1, 128], strides = [1, 1]} : vector<9x128xf32> to vector<1x128xf32>
    %65 = vector.shape_cast %64 : vector<1x128xf32> to vector<1x128xf32>
    %66 = vector.broadcast %65 : vector<1x128xf32> to vector<8x128xf32>
    %67 = vector.extract_strided_slice %47 {offsets = [5, 0], sizes = [1, 128], strides = [1, 1]} : vector<9x128xf32> to vector<1x128xf32>
    %68 = vector.shape_cast %67 : vector<1x128xf32> to vector<1x128xf32>
    %69 = vector.broadcast %68 : vector<1x128xf32> to vector<8x128xf32>
    %70 = vector.extract_strided_slice %47 {offsets = [6, 0], sizes = [1, 128], strides = [1, 1]} : vector<9x128xf32> to vector<1x128xf32>
    %71 = vector.shape_cast %70 : vector<1x128xf32> to vector<1x128xf32>
    %72 = vector.broadcast %71 : vector<1x128xf32> to vector<8x128xf32>
    %73 = vector.extract_strided_slice %47 {offsets = [7, 0], sizes = [1, 128], strides = [1, 1]} : vector<9x128xf32> to vector<1x128xf32>
    %74 = vector.shape_cast %73 : vector<1x128xf32> to vector<1x128xf32>
    %75 = vector.broadcast %74 : vector<1x128xf32> to vector<8x128xf32>
    %76 = vector.extract_strided_slice %47 {offsets = [8, 0], sizes = [1, 128], strides = [1, 1]} : vector<9x128xf32> to vector<1x128xf32>
    %77 = vector.shape_cast %76 : vector<1x128xf32> to vector<1x128xf32>
    %78 = vector.broadcast %77 : vector<1x128xf32> to vector<8x128xf32>
    %79 = arith.mulf %11, %54 : vector<8x128xf32>
    %80 = arith.mulf %12, %57 : vector<8x128xf32>
    %81 = arith.addf %79, %80 : vector<8x128xf32>
    %82 = arith.mulf %13, %60 : vector<8x128xf32>
    %83 = arith.addf %81, %82 : vector<8x128xf32>
    %84 = arith.mulf %17, %63 : vector<8x128xf32>
    %85 = arith.addf %83, %84 : vector<8x128xf32>
    %86 = arith.mulf %18, %66 : vector<8x128xf32>
    %87 = arith.addf %85, %86 : vector<8x128xf32>
    %88 = arith.mulf %19, %69 : vector<8x128xf32>
    %89 = arith.addf %87, %88 : vector<8x128xf32>
    %90 = arith.mulf %23, %72 : vector<8x128xf32>
    %91 = arith.addf %89, %90 : vector<8x128xf32>
    %92 = arith.mulf %24, %75 : vector<8x128xf32>
    %93 = arith.addf %91, %92 : vector<8x128xf32>
    %94 = arith.mulf %25, %78 : vector<8x128xf32>
    %95 = arith.addf %93, %94 : vector<8x128xf32>
    %96 = arith.maximumf %11, %12 : vector<8x128xf32>
    %97 = arith.maximumf %17, %18 : vector<8x128xf32>
    %98 = arith.maximumf %96, %97 : vector<8x128xf32>
    %99 = arith.mulf %13, %54 : vector<8x128xf32>
    %100 = arith.mulf %14, %57 : vector<8x128xf32>
    %101 = arith.addf %99, %100 : vector<8x128xf32>
    %102 = arith.mulf %15, %60 : vector<8x128xf32>
    %103 = arith.addf %101, %102 : vector<8x128xf32>
    %104 = arith.mulf %19, %63 : vector<8x128xf32>
    %105 = arith.addf %103, %104 : vector<8x128xf32>
    %106 = arith.mulf %20, %66 : vector<8x128xf32>
    %107 = arith.addf %105, %106 : vector<8x128xf32>
    %108 = arith.mulf %21, %69 : vector<8x128xf32>
    %109 = arith.addf %107, %108 : vector<8x128xf32>
    %110 = arith.mulf %25, %72 : vector<8x128xf32>
    %111 = arith.addf %109, %110 : vector<8x128xf32>
    %112 = arith.mulf %26, %75 : vector<8x128xf32>
    %113 = arith.addf %111, %112 : vector<8x128xf32>
    %114 = arith.mulf %27, %78 : vector<8x128xf32>
    %115 = arith.addf %113, %114 : vector<8x128xf32>
    %116 = arith.maximumf %13, %14 : vector<8x128xf32>
    %117 = arith.maximumf %19, %20 : vector<8x128xf32>
    %118 = arith.maximumf %116, %117 : vector<8x128xf32>
    %119 = arith.mulf %15, %54 : vector<8x128xf32>
    %120 = arith.mulf %16, %57 : vector<8x128xf32>
    %121 = arith.addf %119, %120 : vector<8x128xf32>
    %122 = arith.mulf %21, %63 : vector<8x128xf32>
    %123 = arith.addf %121, %122 : vector<8x128xf32>
    %124 = arith.mulf %22, %66 : vector<8x128xf32>
    %125 = arith.addf %123, %124 : vector<8x128xf32>
    %126 = arith.mulf %27, %72 : vector<8x128xf32>
    %127 = arith.addf %125, %126 : vector<8x128xf32>
    %128 = arith.mulf %28, %75 : vector<8x128xf32>
    %129 = arith.addf %127, %128 : vector<8x128xf32>
    %130 = arith.maximumf %15, %16 : vector<8x128xf32>
    %131 = arith.maximumf %21, %22 : vector<8x128xf32>
    %132 = arith.maximumf %130, %131 : vector<8x128xf32>
    %133 = arith.mulf %23, %54 : vector<8x128xf32>
    %134 = arith.mulf %24, %57 : vector<8x128xf32>
    %135 = arith.addf %133, %134 : vector<8x128xf32>
    %136 = arith.mulf %25, %60 : vector<8x128xf32>
    %137 = arith.addf %135, %136 : vector<8x128xf32>
    %138 = arith.mulf %29, %63 : vector<8x128xf32>
    %139 = arith.addf %137, %138 : vector<8x128xf32>
    %140 = arith.mulf %30, %66 : vector<8x128xf32>
    %141 = arith.addf %139, %140 : vector<8x128xf32>
    %142 = arith.mulf %31, %69 : vector<8x128xf32>
    %143 = arith.addf %141, %142 : vector<8x128xf32>
    %144 = arith.mulf %35, %72 : vector<8x128xf32>
    %145 = arith.addf %143, %144 : vector<8x128xf32>
    %146 = arith.mulf %36, %75 : vector<8x128xf32>
    %147 = arith.addf %145, %146 : vector<8x128xf32>
    %148 = arith.mulf %37, %78 : vector<8x128xf32>
    %149 = arith.addf %147, %148 : vector<8x128xf32>
    %150 = arith.maximumf %23, %24 : vector<8x128xf32>
    %151 = arith.maximumf %29, %30 : vector<8x128xf32>
    %152 = arith.maximumf %150, %151 : vector<8x128xf32>
    %153 = arith.mulf %25, %54 : vector<8x128xf32>
    %154 = arith.mulf %26, %57 : vector<8x128xf32>
    %155 = arith.addf %153, %154 : vector<8x128xf32>
    %156 = arith.mulf %27, %60 : vector<8x128xf32>
    %157 = arith.addf %155, %156 : vector<8x128xf32>
    %158 = arith.mulf %31, %63 : vector<8x128xf32>
    %159 = arith.addf %157, %158 : vector<8x128xf32>
    %160 = arith.mulf %32, %66 : vector<8x128xf32>
    %161 = arith.addf %159, %160 : vector<8x128xf32>
    %162 = arith.mulf %33, %69 : vector<8x128xf32>
    %163 = arith.addf %161, %162 : vector<8x128xf32>
    %164 = arith.mulf %37, %72 : vector<8x128xf32>
    %165 = arith.addf %163, %164 : vector<8x128xf32>
    %166 = arith.mulf %38, %75 : vector<8x128xf32>
    %167 = arith.addf %165, %166 : vector<8x128xf32>
    %168 = arith.mulf %39, %78 : vector<8x128xf32>
    %169 = arith.addf %167, %168 : vector<8x128xf32>
    %170 = arith.maximumf %25, %26 : vector<8x128xf32>
    %171 = arith.maximumf %31, %32 : vector<8x128xf32>
    %172 = arith.maximumf %170, %171 : vector<8x128xf32>
    %173 = arith.mulf %27, %54 : vector<8x128xf32>
    %174 = arith.mulf %28, %57 : vector<8x128xf32>
    %175 = arith.addf %173, %174 : vector<8x128xf32>
    %176 = arith.mulf %33, %63 : vector<8x128xf32>
    %177 = arith.addf %175, %176 : vector<8x128xf32>
    %178 = arith.mulf %34, %66 : vector<8x128xf32>
    %179 = arith.addf %177, %178 : vector<8x128xf32>
    %180 = arith.mulf %39, %72 : vector<8x128xf32>
    %181 = arith.addf %179, %180 : vector<8x128xf32>
    %182 = arith.mulf %40, %75 : vector<8x128xf32>
    %183 = arith.addf %181, %182 : vector<8x128xf32>
    %184 = arith.maximumf %27, %28 : vector<8x128xf32>
    %185 = arith.maximumf %33, %34 : vector<8x128xf32>
    %186 = arith.maximumf %184, %185 : vector<8x128xf32>
    %187 = arith.mulf %35, %54 : vector<8x128xf32>
    %188 = arith.mulf %36, %57 : vector<8x128xf32>
    %189 = arith.addf %187, %188 : vector<8x128xf32>
    %190 = arith.mulf %37, %60 : vector<8x128xf32>
    %191 = arith.addf %189, %190 : vector<8x128xf32>
    %192 = arith.mulf %41, %63 : vector<8x128xf32>
    %193 = arith.addf %191, %192 : vector<8x128xf32>
    %194 = arith.mulf %42, %66 : vector<8x128xf32>
    %195 = arith.addf %193, %194 : vector<8x128xf32>
    %196 = arith.mulf %43, %69 : vector<8x128xf32>
    %197 = arith.addf %195, %196 : vector<8x128xf32>
    %198 = arith.maximumf %35, %36 : vector<8x128xf32>
    %199 = arith.maximumf %41, %42 : vector<8x128xf32>
    %200 = arith.maximumf %198, %199 : vector<8x128xf32>
    %201 = arith.mulf %37, %54 : vector<8x128xf32>
    %202 = arith.mulf %38, %57 : vector<8x128xf32>
    %203 = arith.addf %201, %202 : vector<8x128xf32>
    %204 = arith.mulf %39, %60 : vector<8x128xf32>
    %205 = arith.addf %203, %204 : vector<8x128xf32>
    %206 = arith.mulf %43, %63 : vector<8x128xf32>
    %207 = arith.addf %205, %206 : vector<8x128xf32>
    %208 = arith.mulf %44, %66 : vector<8x128xf32>
    %209 = arith.addf %207, %208 : vector<8x128xf32>
    %210 = arith.mulf %45, %69 : vector<8x128xf32>
    %211 = arith.addf %209, %210 : vector<8x128xf32>
    %212 = arith.maximumf %37, %38 : vector<8x128xf32>
    %213 = arith.maximumf %43, %44 : vector<8x128xf32>
    %214 = arith.maximumf %212, %213 : vector<8x128xf32>
    %215 = arith.mulf %39, %54 : vector<8x128xf32>
    %216 = arith.mulf %40, %57 : vector<8x128xf32>
    %217 = arith.addf %215, %216 : vector<8x128xf32>
    %218 = arith.mulf %45, %63 : vector<8x128xf32>
    %219 = arith.addf %217, %218 : vector<8x128xf32>
    %220 = arith.mulf %46, %66 : vector<8x128xf32>
    %221 = arith.addf %219, %220 : vector<8x128xf32>
    %222 = arith.maximumf %39, %40 : vector<8x128xf32>
    %223 = arith.maximumf %45, %46 : vector<8x128xf32>
    %224 = arith.maximumf %222, %223 : vector<8x128xf32>
    %225 = tpu.concatenate %95, %115, %129, %149, %169, %183, %197, %211, %221 in 0 : vector<8x128xf32>, vector<8x128xf32>, vector<8x128xf32>, vector<8x128xf32>, vector<8x128xf32>, vector<8x128xf32>, vector<8x128xf32>, vector<8x128xf32>, vector<8x128xf32> -> vector<72x128xf32>
    %226 = vector.broadcast %48 : vector<1x128xf32> to vector<72x128xf32>
    %227 = arith.addf %225, %226 : vector<72x128xf32>
    %228 = arith.truncf %227 : vector<72x128xf32> to vector<72x128xbf16>
    %229 = arith.truncf %49 : vector<128x128xf32> to vector<128x128xbf16>
    %cst_11 = arith.constant dense<0.000000e+00> : vector<72x128xf32>
    %230 = tpu.matmul %228, %229, %cst_11 {dimension_numbers = #tpu.dot_dimension_numbers<[1], [0], [0], [1], [0, 0, 1, 1], [], []>} : vector<72x128xbf16>, vector<128x128xbf16>, vector<72x128xf32> -> vector<72x128xf32>
    %231 = vector.broadcast %50 : vector<1x128xf32> to vector<72x128xf32>
    %232 = arith.addf %230, %231 : vector<72x128xf32>
    %233 = tpu.concatenate %98, %118, %132, %152, %172, %186, %200, %214, %224 in 0 : vector<8x128xf32>, vector<8x128xf32>, vector<8x128xf32>, vector<8x128xf32>, vector<8x128xf32>, vector<8x128xf32>, vector<8x128xf32>, vector<8x128xf32>, vector<8x128xf32> -> vector<72x128xf32>
    %234 = arith.addf %232, %233 : vector<72x128xf32>
    %cst_12 = arith.constant 0.000000e+00 : f32
    %235 = vector.broadcast %cst_12 : f32 to vector<72x128xf32>
    %236 = arith.cmpf oge, %234, %235 : vector<72x128xf32>
    %237 = vector.broadcast %51 : vector<1x128xf32> to vector<72x128xf32>
    %238 = arith.mulf %234, %237 : vector<72x128xf32>
    %239 = arith.select %236, %234, %238 : vector<72x128xi1>, vector<72x128xf32>
    %c208 = arith.constant 208 : index
    %c0_13 = arith.constant 0 : index
    %240 = vector.load %arg2[%c208, %c0_13] : memref<976x128xf32, #tpu.memory_space<vmem>>, vector<9x128xf32>
    %c224 = arith.constant 224 : index
    %c0_14 = arith.constant 0 : index
    %241 = vector.load %arg2[%c224, %c0_14] : memref<976x128xf32, #tpu.memory_space<vmem>>, vector<1x128xf32>
    %c232 = arith.constant 232 : index
    %c0_15 = arith.constant 0 : index
    %242 = vector.load %arg2[%c232, %c0_15] : memref<976x128xf32, #tpu.memory_space<vmem>>, vector<128x128xf32>
    %c360 = arith.constant 360 : index
    %c0_16 = arith.constant 0 : index
    %243 = vector.load %arg2[%c360, %c0_16] : memref<976x128xf32, #tpu.memory_space<vmem>>, vector<1x128xf32>
    %c368 = arith.constant 368 : index
    %c0_17 = arith.constant 0 : index
    %244 = vector.load %arg2[%c368, %c0_17] : memref<976x128xf32, #tpu.memory_space<vmem>>, vector<1x128xf32>
    %245 = vector.extract_strided_slice %240 {offsets = [0, 0], sizes = [1, 128], strides = [1, 1]} : vector<9x128xf32> to vector<1x128xf32>
    %246 = vector.shape_cast %245 : vector<1x128xf32> to vector<1x128xf32>
    %247 = vector.broadcast %246 : vector<1x128xf32> to vector<8x128xf32>
    %248 = vector.extract_strided_slice %240 {offsets = [1, 0], sizes = [1, 128], strides = [1, 1]} : vector<9x128xf32> to vector<1x128xf32>
    %249 = vector.shape_cast %248 : vector<1x128xf32> to vector<1x128xf32>
    %250 = vector.broadcast %249 : vector<1x128xf32> to vector<8x128xf32>
    %251 = vector.extract_strided_slice %240 {offsets = [2, 0], sizes = [1, 128], strides = [1, 1]} : vector<9x128xf32> to vector<1x128xf32>
    %252 = vector.shape_cast %251 : vector<1x128xf32> to vector<1x128xf32>
    %253 = vector.broadcast %252 : vector<1x128xf32> to vector<8x128xf32>
    %254 = vector.extract_strided_slice %240 {offsets = [3, 0], sizes = [1, 128], strides = [1, 1]} : vector<9x128xf32> to vector<1x128xf32>
    %255 = vector.shape_cast %254 : vector<1x128xf32> to vector<1x128xf32>
    %256 = vector.broadcast %255 : vector<1x128xf32> to vector<8x128xf32>
    %257 = vector.extract_strided_slice %240 {offsets = [4, 0], sizes = [1, 128], strides = [1, 1]} : vector<9x128xf32> to vector<1x128xf32>
    %258 = vector.shape_cast %257 : vector<1x128xf32> to vector<1x128xf32>
    %259 = vector.broadcast %258 : vector<1x128xf32> to vector<8x128xf32>
    %260 = vector.extract_strided_slice %240 {offsets = [5, 0], sizes = [1, 128], strides = [1, 1]} : vector<9x128xf32> to vector<1x128xf32>
    %261 = vector.shape_cast %260 : vector<1x128xf32> to vector<1x128xf32>
    %262 = vector.broadcast %261 : vector<1x128xf32> to vector<8x128xf32>
    %263 = vector.extract_strided_slice %240 {offsets = [6, 0], sizes = [1, 128], strides = [1, 1]} : vector<9x128xf32> to vector<1x128xf32>
    %264 = vector.shape_cast %263 : vector<1x128xf32> to vector<1x128xf32>
    %265 = vector.broadcast %264 : vector<1x128xf32> to vector<8x128xf32>
    %266 = vector.extract_strided_slice %240 {offsets = [7, 0], sizes = [1, 128], strides = [1, 1]} : vector<9x128xf32> to vector<1x128xf32>
    %267 = vector.shape_cast %266 : vector<1x128xf32> to vector<1x128xf32>
    %268 = vector.broadcast %267 : vector<1x128xf32> to vector<8x128xf32>
    %269 = vector.extract_strided_slice %240 {offsets = [8, 0], sizes = [1, 128], strides = [1, 1]} : vector<9x128xf32> to vector<1x128xf32>
    %270 = vector.shape_cast %269 : vector<1x128xf32> to vector<1x128xf32>
    %271 = vector.broadcast %270 : vector<1x128xf32> to vector<8x128xf32>
    %272 = vector.extract_strided_slice %239 {offsets = [0, 0], sizes = [8, 128], strides = [1, 1]} : vector<72x128xf32> to vector<8x128xf32>
    %273 = vector.extract_strided_slice %239 {offsets = [8, 0], sizes = [8, 128], strides = [1, 1]} : vector<72x128xf32> to vector<8x128xf32>
    %274 = vector.extract_strided_slice %239 {offsets = [16, 0], sizes = [8, 128], strides = [1, 1]} : vector<72x128xf32> to vector<8x128xf32>
    %275 = vector.extract_strided_slice %239 {offsets = [24, 0], sizes = [8, 128], strides = [1, 1]} : vector<72x128xf32> to vector<8x128xf32>
    %276 = vector.extract_strided_slice %239 {offsets = [32, 0], sizes = [8, 128], strides = [1, 1]} : vector<72x128xf32> to vector<8x128xf32>
    %277 = vector.extract_strided_slice %239 {offsets = [40, 0], sizes = [8, 128], strides = [1, 1]} : vector<72x128xf32> to vector<8x128xf32>
    %278 = vector.extract_strided_slice %239 {offsets = [48, 0], sizes = [8, 128], strides = [1, 1]} : vector<72x128xf32> to vector<8x128xf32>
    %279 = vector.extract_strided_slice %239 {offsets = [56, 0], sizes = [8, 128], strides = [1, 1]} : vector<72x128xf32> to vector<8x128xf32>
    %280 = vector.extract_strided_slice %239 {offsets = [64, 0], sizes = [8, 128], strides = [1, 1]} : vector<72x128xf32> to vector<8x128xf32>
    %281 = arith.mulf %272, %247 : vector<8x128xf32>
    %282 = arith.mulf %272, %250 : vector<8x128xf32>
    %283 = arith.mulf %272, %256 : vector<8x128xf32>
    %284 = arith.mulf %272, %259 : vector<8x128xf32>
    %285 = arith.mulf %273, %247 : vector<8x128xf32>
    %286 = arith.mulf %273, %250 : vector<8x128xf32>
    %287 = arith.addf %281, %286 : vector<8x128xf32>
    %288 = arith.mulf %273, %253 : vector<8x128xf32>
    %289 = arith.addf %282, %288 : vector<8x128xf32>
    %290 = arith.mulf %273, %256 : vector<8x128xf32>
    %291 = arith.mulf %273, %259 : vector<8x128xf32>
    %292 = arith.addf %283, %291 : vector<8x128xf32>
    %293 = arith.mulf %273, %262 : vector<8x128xf32>
    %294 = arith.addf %284, %293 : vector<8x128xf32>
    %295 = arith.mulf %274, %250 : vector<8x128xf32>
    %296 = arith.addf %285, %295 : vector<8x128xf32>
    %297 = arith.mulf %274, %253 : vector<8x128xf32>
    %298 = arith.addf %287, %297 : vector<8x128xf32>
    %299 = arith.mulf %274, %259 : vector<8x128xf32>
    %300 = arith.addf %290, %299 : vector<8x128xf32>
    %301 = arith.mulf %274, %262 : vector<8x128xf32>
    %302 = arith.addf %292, %301 : vector<8x128xf32>
    %303 = arith.mulf %275, %247 : vector<8x128xf32>
    %304 = arith.mulf %275, %250 : vector<8x128xf32>
    %305 = arith.mulf %275, %256 : vector<8x128xf32>
    %306 = arith.addf %298, %305 : vector<8x128xf32>
    %307 = arith.mulf %275, %259 : vector<8x128xf32>
    %308 = arith.addf %289, %307 : vector<8x128xf32>
    %309 = arith.mulf %275, %265 : vector<8x128xf32>
    %310 = arith.addf %302, %309 : vector<8x128xf32>
    %311 = arith.mulf %275, %268 : vector<8x128xf32>
    %312 = arith.addf %294, %311 : vector<8x128xf32>
    %313 = arith.mulf %276, %247 : vector<8x128xf32>
    %314 = arith.mulf %276, %250 : vector<8x128xf32>
    %315 = arith.addf %303, %314 : vector<8x128xf32>
    %316 = arith.mulf %276, %253 : vector<8x128xf32>
    %317 = arith.addf %304, %316 : vector<8x128xf32>
    %318 = arith.mulf %276, %256 : vector<8x128xf32>
    %319 = arith.addf %296, %318 : vector<8x128xf32>
    %320 = arith.mulf %276, %259 : vector<8x128xf32>
    %321 = arith.addf %306, %320 : vector<8x128xf32>
    %322 = arith.mulf %276, %262 : vector<8x128xf32>
    %323 = arith.addf %308, %322 : vector<8x128xf32>
    %324 = arith.mulf %276, %265 : vector<8x128xf32>
    %325 = arith.addf %300, %324 : vector<8x128xf32>
    %326 = arith.mulf %276, %268 : vector<8x128xf32>
    %327 = arith.addf %310, %326 : vector<8x128xf32>
    %328 = arith.mulf %276, %271 : vector<8x128xf32>
    %329 = arith.addf %312, %328 : vector<8x128xf32>
    %330 = arith.mulf %277, %250 : vector<8x128xf32>
    %331 = arith.addf %313, %330 : vector<8x128xf32>
    %332 = arith.mulf %277, %253 : vector<8x128xf32>
    %333 = arith.addf %315, %332 : vector<8x128xf32>
    %334 = arith.mulf %277, %259 : vector<8x128xf32>
    %335 = arith.addf %319, %334 : vector<8x128xf32>
    %336 = arith.mulf %277, %262 : vector<8x128xf32>
    %337 = arith.addf %321, %336 : vector<8x128xf32>
    %338 = arith.mulf %277, %268 : vector<8x128xf32>
    %339 = arith.addf %325, %338 : vector<8x128xf32>
    %340 = arith.mulf %277, %271 : vector<8x128xf32>
    %341 = arith.addf %327, %340 : vector<8x128xf32>
    %342 = arith.mulf %278, %256 : vector<8x128xf32>
    %343 = arith.addf %333, %342 : vector<8x128xf32>
    %344 = arith.mulf %278, %259 : vector<8x128xf32>
    %345 = arith.addf %317, %344 : vector<8x128xf32>
    %346 = arith.mulf %278, %265 : vector<8x128xf32>
    %347 = arith.addf %337, %346 : vector<8x128xf32>
    %348 = arith.mulf %278, %268 : vector<8x128xf32>
    %349 = arith.addf %323, %348 : vector<8x128xf32>
    %350 = arith.mulf %279, %256 : vector<8x128xf32>
    %351 = arith.addf %331, %350 : vector<8x128xf32>
    %352 = arith.mulf %279, %259 : vector<8x128xf32>
    %353 = arith.addf %343, %352 : vector<8x128xf32>
    %354 = arith.mulf %279, %262 : vector<8x128xf32>
    %355 = arith.addf %345, %354 : vector<8x128xf32>
    %356 = arith.mulf %279, %265 : vector<8x128xf32>
    %357 = arith.addf %335, %356 : vector<8x128xf32>
    %358 = arith.mulf %279, %268 : vector<8x128xf32>
    %359 = arith.addf %347, %358 : vector<8x128xf32>
    %360 = arith.mulf %279, %271 : vector<8x128xf32>
    %361 = arith.addf %349, %360 : vector<8x128xf32>
    %362 = arith.mulf %280, %259 : vector<8x128xf32>
    %363 = arith.addf %351, %362 : vector<8x128xf32>
    %364 = arith.mulf %280, %262 : vector<8x128xf32>
    %365 = arith.addf %353, %364 : vector<8x128xf32>
    %366 = arith.mulf %280, %268 : vector<8x128xf32>
    %367 = arith.addf %357, %366 : vector<8x128xf32>
    %368 = arith.mulf %280, %271 : vector<8x128xf32>
    %369 = arith.addf %359, %368 : vector<8x128xf32>
    %370 = tpu.concatenate %329, %341, %339, %361, %369, %367, %355, %365, %363 in 0 : vector<8x128xf32>, vector<8x128xf32>, vector<8x128xf32>, vector<8x128xf32>, vector<8x128xf32>, vector<8x128xf32>, vector<8x128xf32>, vector<8x128xf32>, vector<8x128xf32> -> vector<72x128xf32>
    %371 = vector.broadcast %241 : vector<1x128xf32> to vector<72x128xf32>
    %372 = arith.addf %370, %371 : vector<72x128xf32>
    %373 = arith.truncf %372 : vector<72x128xf32> to vector<72x128xbf16>
    %374 = arith.truncf %242 : vector<128x128xf32> to vector<128x128xbf16>
    %cst_18 = arith.constant dense<0.000000e+00> : vector<72x128xf32>
    %375 = tpu.matmul %373, %374, %cst_18 {dimension_numbers = #tpu.dot_dimension_numbers<[1], [0], [0], [1], [0, 0, 1, 1], [], []>} : vector<72x128xbf16>, vector<128x128xbf16>, vector<72x128xf32> -> vector<72x128xf32>
    %376 = vector.broadcast %243 : vector<1x128xf32> to vector<72x128xf32>
    %377 = arith.addf %375, %376 : vector<72x128xf32>
    %378 = arith.addf %377, %239 : vector<72x128xf32>
    %cst_19 = arith.constant 0.000000e+00 : f32
    %379 = vector.broadcast %cst_19 : f32 to vector<72x128xf32>
    %380 = arith.cmpf oge, %378, %379 : vector<72x128xf32>
    %381 = vector.broadcast %244 : vector<1x128xf32> to vector<72x128xf32>
    %382 = arith.mulf %378, %381 : vector<72x128xf32>
    %383 = arith.select %380, %378, %382 : vector<72x128xi1>, vector<72x128xf32>
    %c376 = arith.constant 376 : index
    %c0_20 = arith.constant 0 : index
    %384 = vector.load %arg2[%c376, %c0_20] : memref<976x128xf32, #tpu.memory_space<vmem>>, vector<9x128xf32>
    %c392 = arith.constant 392 : index
    %c0_21 = arith.constant 0 : index
    %385 = vector.load %arg2[%c392, %c0_21] : memref<976x128xf32, #tpu.memory_space<vmem>>, vector<1x128xf32>
    %c400 = arith.constant 400 : index
    %c0_22 = arith.constant 0 : index
    %386 = vector.load %arg2[%c400, %c0_22] : memref<976x128xf32, #tpu.memory_space<vmem>>, vector<128x128xf32>
    %c528 = arith.constant 528 : index
    %c0_23 = arith.constant 0 : index
    %387 = vector.load %arg2[%c528, %c0_23] : memref<976x128xf32, #tpu.memory_space<vmem>>, vector<1x128xf32>
    %c536 = arith.constant 536 : index
    %c0_24 = arith.constant 0 : index
    %388 = vector.load %arg2[%c536, %c0_24] : memref<976x128xf32, #tpu.memory_space<vmem>>, vector<1x128xf32>
    %389 = vector.extract_strided_slice %384 {offsets = [0, 0], sizes = [1, 128], strides = [1, 1]} : vector<9x128xf32> to vector<1x128xf32>
    %390 = vector.shape_cast %389 : vector<1x128xf32> to vector<1x128xf32>
    %391 = vector.broadcast %390 : vector<1x128xf32> to vector<8x128xf32>
    %392 = vector.extract_strided_slice %384 {offsets = [1, 0], sizes = [1, 128], strides = [1, 1]} : vector<9x128xf32> to vector<1x128xf32>
    %393 = vector.shape_cast %392 : vector<1x128xf32> to vector<1x128xf32>
    %394 = vector.broadcast %393 : vector<1x128xf32> to vector<8x128xf32>
    %395 = vector.extract_strided_slice %384 {offsets = [2, 0], sizes = [1, 128], strides = [1, 1]} : vector<9x128xf32> to vector<1x128xf32>
    %396 = vector.shape_cast %395 : vector<1x128xf32> to vector<1x128xf32>
    %397 = vector.broadcast %396 : vector<1x128xf32> to vector<8x128xf32>
    %398 = vector.extract_strided_slice %384 {offsets = [3, 0], sizes = [1, 128], strides = [1, 1]} : vector<9x128xf32> to vector<1x128xf32>
    %399 = vector.shape_cast %398 : vector<1x128xf32> to vector<1x128xf32>
    %400 = vector.broadcast %399 : vector<1x128xf32> to vector<8x128xf32>
    %401 = vector.extract_strided_slice %384 {offsets = [4, 0], sizes = [1, 128], strides = [1, 1]} : vector<9x128xf32> to vector<1x128xf32>
    %402 = vector.shape_cast %401 : vector<1x128xf32> to vector<1x128xf32>
    %403 = vector.broadcast %402 : vector<1x128xf32> to vector<8x128xf32>
    %404 = vector.extract_strided_slice %384 {offsets = [5, 0], sizes = [1, 128], strides = [1, 1]} : vector<9x128xf32> to vector<1x128xf32>
    %405 = vector.shape_cast %404 : vector<1x128xf32> to vector<1x128xf32>
    %406 = vector.broadcast %405 : vector<1x128xf32> to vector<8x128xf32>
    %407 = vector.extract_strided_slice %384 {offsets = [6, 0], sizes = [1, 128], strides = [1, 1]} : vector<9x128xf32> to vector<1x128xf32>
    %408 = vector.shape_cast %407 : vector<1x128xf32> to vector<1x128xf32>
    %409 = vector.broadcast %408 : vector<1x128xf32> to vector<8x128xf32>
    %410 = vector.extract_strided_slice %384 {offsets = [7, 0], sizes = [1, 128], strides = [1, 1]} : vector<9x128xf32> to vector<1x128xf32>
    %411 = vector.shape_cast %410 : vector<1x128xf32> to vector<1x128xf32>
    %412 = vector.broadcast %411 : vector<1x128xf32> to vector<8x128xf32>
    %413 = vector.extract_strided_slice %384 {offsets = [8, 0], sizes = [1, 128], strides = [1, 1]} : vector<9x128xf32> to vector<1x128xf32>
    %414 = vector.shape_cast %413 : vector<1x128xf32> to vector<1x128xf32>
    %415 = vector.broadcast %414 : vector<1x128xf32> to vector<8x128xf32>
    %416 = vector.extract_strided_slice %383 {offsets = [0, 0], sizes = [8, 128], strides = [1, 1]} : vector<72x128xf32> to vector<8x128xf32>
    %417 = vector.extract_strided_slice %383 {offsets = [8, 0], sizes = [8, 128], strides = [1, 1]} : vector<72x128xf32> to vector<8x128xf32>
    %418 = vector.extract_strided_slice %383 {offsets = [16, 0], sizes = [8, 128], strides = [1, 1]} : vector<72x128xf32> to vector<8x128xf32>
    %419 = vector.extract_strided_slice %383 {offsets = [24, 0], sizes = [8, 128], strides = [1, 1]} : vector<72x128xf32> to vector<8x128xf32>
    %420 = vector.extract_strided_slice %383 {offsets = [32, 0], sizes = [8, 128], strides = [1, 1]} : vector<72x128xf32> to vector<8x128xf32>
    %421 = vector.extract_strided_slice %383 {offsets = [40, 0], sizes = [8, 128], strides = [1, 1]} : vector<72x128xf32> to vector<8x128xf32>
    %422 = vector.extract_strided_slice %383 {offsets = [48, 0], sizes = [8, 128], strides = [1, 1]} : vector<72x128xf32> to vector<8x128xf32>
    %423 = vector.extract_strided_slice %383 {offsets = [56, 0], sizes = [8, 128], strides = [1, 1]} : vector<72x128xf32> to vector<8x128xf32>
    %424 = vector.extract_strided_slice %383 {offsets = [64, 0], sizes = [8, 128], strides = [1, 1]} : vector<72x128xf32> to vector<8x128xf32>
    %425 = arith.mulf %416, %391 : vector<8x128xf32>
    %426 = arith.mulf %416, %394 : vector<8x128xf32>
    %427 = arith.mulf %416, %400 : vector<8x128xf32>
    %428 = arith.mulf %416, %403 : vector<8x128xf32>
    %429 = arith.mulf %417, %391 : vector<8x128xf32>
    %430 = arith.mulf %417, %394 : vector<8x128xf32>
    %431 = arith.addf %425, %430 : vector<8x128xf32>
    %432 = arith.mulf %417, %397 : vector<8x128xf32>
    %433 = arith.addf %426, %432 : vector<8x128xf32>
    %434 = arith.mulf %417, %400 : vector<8x128xf32>
    %435 = arith.mulf %417, %403 : vector<8x128xf32>
    %436 = arith.addf %427, %435 : vector<8x128xf32>
    %437 = arith.mulf %417, %406 : vector<8x128xf32>
    %438 = arith.addf %428, %437 : vector<8x128xf32>
    %439 = arith.mulf %418, %394 : vector<8x128xf32>
    %440 = arith.addf %429, %439 : vector<8x128xf32>
    %441 = arith.mulf %418, %397 : vector<8x128xf32>
    %442 = arith.addf %431, %441 : vector<8x128xf32>
    %443 = arith.mulf %418, %403 : vector<8x128xf32>
    %444 = arith.addf %434, %443 : vector<8x128xf32>
    %445 = arith.mulf %418, %406 : vector<8x128xf32>
    %446 = arith.addf %436, %445 : vector<8x128xf32>
    %447 = arith.mulf %419, %391 : vector<8x128xf32>
    %448 = arith.mulf %419, %394 : vector<8x128xf32>
    %449 = arith.mulf %419, %400 : vector<8x128xf32>
    %450 = arith.addf %442, %449 : vector<8x128xf32>
    %451 = arith.mulf %419, %403 : vector<8x128xf32>
    %452 = arith.addf %433, %451 : vector<8x128xf32>
    %453 = arith.mulf %419, %409 : vector<8x128xf32>
    %454 = arith.addf %446, %453 : vector<8x128xf32>
    %455 = arith.mulf %419, %412 : vector<8x128xf32>
    %456 = arith.addf %438, %455 : vector<8x128xf32>
    %457 = arith.mulf %420, %391 : vector<8x128xf32>
    %458 = arith.mulf %420, %394 : vector<8x128xf32>
    %459 = arith.addf %447, %458 : vector<8x128xf32>
    %460 = arith.mulf %420, %397 : vector<8x128xf32>
    %461 = arith.addf %448, %460 : vector<8x128xf32>
    %462 = arith.mulf %420, %400 : vector<8x128xf32>
    %463 = arith.addf %440, %462 : vector<8x128xf32>
    %464 = arith.mulf %420, %403 : vector<8x128xf32>
    %465 = arith.addf %450, %464 : vector<8x128xf32>
    %466 = arith.mulf %420, %406 : vector<8x128xf32>
    %467 = arith.addf %452, %466 : vector<8x128xf32>
    %468 = arith.mulf %420, %409 : vector<8x128xf32>
    %469 = arith.addf %444, %468 : vector<8x128xf32>
    %470 = arith.mulf %420, %412 : vector<8x128xf32>
    %471 = arith.addf %454, %470 : vector<8x128xf32>
    %472 = arith.mulf %420, %415 : vector<8x128xf32>
    %473 = arith.addf %456, %472 : vector<8x128xf32>
    %474 = arith.mulf %421, %394 : vector<8x128xf32>
    %475 = arith.addf %457, %474 : vector<8x128xf32>
    %476 = arith.mulf %421, %397 : vector<8x128xf32>
    %477 = arith.addf %459, %476 : vector<8x128xf32>
    %478 = arith.mulf %421, %403 : vector<8x128xf32>
    %479 = arith.addf %463, %478 : vector<8x128xf32>
    %480 = arith.mulf %421, %406 : vector<8x128xf32>
    %481 = arith.addf %465, %480 : vector<8x128xf32>
    %482 = arith.mulf %421, %412 : vector<8x128xf32>
    %483 = arith.addf %469, %482 : vector<8x128xf32>
    %484 = arith.mulf %421, %415 : vector<8x128xf32>
    %485 = arith.addf %471, %484 : vector<8x128xf32>
    %486 = arith.mulf %422, %400 : vector<8x128xf32>
    %487 = arith.addf %477, %486 : vector<8x128xf32>
    %488 = arith.mulf %422, %403 : vector<8x128xf32>
    %489 = arith.addf %461, %488 : vector<8x128xf32>
    %490 = arith.mulf %422, %409 : vector<8x128xf32>
    %491 = arith.addf %481, %490 : vector<8x128xf32>
    %492 = arith.mulf %422, %412 : vector<8x128xf32>
    %493 = arith.addf %467, %492 : vector<8x128xf32>
    %494 = arith.mulf %423, %400 : vector<8x128xf32>
    %495 = arith.addf %475, %494 : vector<8x128xf32>
    %496 = arith.mulf %423, %403 : vector<8x128xf32>
    %497 = arith.addf %487, %496 : vector<8x128xf32>
    %498 = arith.mulf %423, %406 : vector<8x128xf32>
    %499 = arith.addf %489, %498 : vector<8x128xf32>
    %500 = arith.mulf %423, %409 : vector<8x128xf32>
    %501 = arith.addf %479, %500 : vector<8x128xf32>
    %502 = arith.mulf %423, %412 : vector<8x128xf32>
    %503 = arith.addf %491, %502 : vector<8x128xf32>
    %504 = arith.mulf %423, %415 : vector<8x128xf32>
    %505 = arith.addf %493, %504 : vector<8x128xf32>
    %506 = arith.mulf %424, %403 : vector<8x128xf32>
    %507 = arith.addf %495, %506 : vector<8x128xf32>
    %508 = arith.mulf %424, %406 : vector<8x128xf32>
    %509 = arith.addf %497, %508 : vector<8x128xf32>
    %510 = arith.mulf %424, %412 : vector<8x128xf32>
    %511 = arith.addf %501, %510 : vector<8x128xf32>
    %512 = arith.mulf %424, %415 : vector<8x128xf32>
    %513 = arith.addf %503, %512 : vector<8x128xf32>
    %514 = tpu.concatenate %473, %485, %483, %505, %513, %511, %499, %509, %507 in 0 : vector<8x128xf32>, vector<8x128xf32>, vector<8x128xf32>, vector<8x128xf32>, vector<8x128xf32>, vector<8x128xf32>, vector<8x128xf32>, vector<8x128xf32>, vector<8x128xf32> -> vector<72x128xf32>
    %515 = vector.broadcast %385 : vector<1x128xf32> to vector<72x128xf32>
    %516 = arith.addf %514, %515 : vector<72x128xf32>
    %517 = arith.truncf %516 : vector<72x128xf32> to vector<72x128xbf16>
    %518 = arith.truncf %386 : vector<128x128xf32> to vector<128x128xbf16>
    %cst_25 = arith.constant dense<0.000000e+00> : vector<72x128xf32>
    %519 = tpu.matmul %517, %518, %cst_25 {dimension_numbers = #tpu.dot_dimension_numbers<[1], [0], [0], [1], [0, 0, 1, 1], [], []>} : vector<72x128xbf16>, vector<128x128xbf16>, vector<72x128xf32> -> vector<72x128xf32>
    %520 = vector.broadcast %387 : vector<1x128xf32> to vector<72x128xf32>
    %521 = arith.addf %519, %520 : vector<72x128xf32>
    %522 = arith.addf %521, %383 : vector<72x128xf32>
    %cst_26 = arith.constant 0.000000e+00 : f32
    %523 = vector.broadcast %cst_26 : f32 to vector<72x128xf32>
    %524 = arith.cmpf oge, %522, %523 : vector<72x128xf32>
    %525 = vector.broadcast %388 : vector<1x128xf32> to vector<72x128xf32>
    %526 = arith.mulf %522, %525 : vector<72x128xf32>
    %527 = arith.select %524, %522, %526 : vector<72x128xi1>, vector<72x128xf32>
    %c0_27 = arith.constant 0 : index
    %c0_28 = arith.constant 0 : index
    %528 = vector.load %arg3[%c0_27, %c0_28] : memref<216x32xf32, #tpu.memory_space<vmem>>, vector<128x32xf32>
    %529 = arith.truncf %527 : vector<72x128xf32> to vector<72x128xbf16>
    %530 = arith.truncf %528 : vector<128x32xf32> to vector<128x32xbf16>
    %cst_29 = arith.constant dense<0.000000e+00> : vector<72x32xf32>
    %531 = tpu.matmul %529, %530, %cst_29 {dimension_numbers = #tpu.dot_dimension_numbers<[1], [0], [0], [1], [0, 0, 1, 1], [], []>} : vector<72x128xbf16>, vector<128x32xbf16>, vector<72x32xf32> -> vector<72x32xf32>
    %c128 = arith.constant 128 : index
    %c0_30 = arith.constant 0 : index
    %532 = vector.load %arg3[%c128, %c0_30] : memref<216x32xf32, #tpu.memory_space<vmem>>, vector<1x32xf32>
    %533 = vector.broadcast %532 : vector<1x32xf32> to vector<72x32xf32>
    %534 = arith.addf %531, %533 : vector<72x32xf32>
    %c136 = arith.constant 136 : index
    %c0_31 = arith.constant 0 : index
    %535 = vector.load %arg3[%c136, %c0_31] : memref<216x32xf32, #tpu.memory_space<vmem>>, vector<1x32xf32>
    %cst_32 = arith.constant 0.000000e+00 : f32
    %536 = vector.broadcast %cst_32 : f32 to vector<72x32xf32>
    %537 = arith.cmpf oge, %534, %536 : vector<72x32xf32>
    %538 = vector.broadcast %535 : vector<1x32xf32> to vector<72x32xf32>
    %539 = arith.mulf %534, %538 : vector<72x32xf32>
    %540 = arith.select %537, %534, %539 : vector<72x32xi1>, vector<72x32xf32>
    %c144 = arith.constant 144 : index
    %c0_33 = arith.constant 0 : index
    %541 = vector.load %arg3[%c144, %c0_33] : memref<216x32xf32, #tpu.memory_space<vmem>>, vector<9x32xf32>
    %c160 = arith.constant 160 : index
    %c0_34 = arith.constant 0 : index
    %542 = vector.load %arg3[%c160, %c0_34] : memref<216x32xf32, #tpu.memory_space<vmem>>, vector<1x32xf32>
    %c168 = arith.constant 168 : index
    %c0_35 = arith.constant 0 : index
    %543 = vector.load %arg3[%c168, %c0_35] : memref<216x32xf32, #tpu.memory_space<vmem>>, vector<32x32xf32>
    %c200_36 = arith.constant 200 : index
    %c0_37 = arith.constant 0 : index
    %544 = vector.load %arg3[%c200_36, %c0_37] : memref<216x32xf32, #tpu.memory_space<vmem>>, vector<1x32xf32>
    %c208_38 = arith.constant 208 : index
    %c0_39 = arith.constant 0 : index
    %545 = vector.load %arg3[%c208_38, %c0_39] : memref<216x32xf32, #tpu.memory_space<vmem>>, vector<1x32xf32>
    %546 = vector.extract_strided_slice %541 {offsets = [0, 0], sizes = [1, 32], strides = [1, 1]} : vector<9x32xf32> to vector<1x32xf32>
    %547 = vector.shape_cast %546 : vector<1x32xf32> to vector<1x32xf32>
    %548 = vector.broadcast %547 : vector<1x32xf32> to vector<8x32xf32>
    %549 = vector.extract_strided_slice %541 {offsets = [1, 0], sizes = [1, 32], strides = [1, 1]} : vector<9x32xf32> to vector<1x32xf32>
    %550 = vector.shape_cast %549 : vector<1x32xf32> to vector<1x32xf32>
    %551 = vector.broadcast %550 : vector<1x32xf32> to vector<8x32xf32>
    %552 = vector.extract_strided_slice %541 {offsets = [2, 0], sizes = [1, 32], strides = [1, 1]} : vector<9x32xf32> to vector<1x32xf32>
    %553 = vector.shape_cast %552 : vector<1x32xf32> to vector<1x32xf32>
    %554 = vector.broadcast %553 : vector<1x32xf32> to vector<8x32xf32>
    %555 = vector.extract_strided_slice %541 {offsets = [3, 0], sizes = [1, 32], strides = [1, 1]} : vector<9x32xf32> to vector<1x32xf32>
    %556 = vector.shape_cast %555 : vector<1x32xf32> to vector<1x32xf32>
    %557 = vector.broadcast %556 : vector<1x32xf32> to vector<8x32xf32>
    %558 = vector.extract_strided_slice %541 {offsets = [4, 0], sizes = [1, 32], strides = [1, 1]} : vector<9x32xf32> to vector<1x32xf32>
    %559 = vector.shape_cast %558 : vector<1x32xf32> to vector<1x32xf32>
    %560 = vector.broadcast %559 : vector<1x32xf32> to vector<8x32xf32>
    %561 = vector.extract_strided_slice %541 {offsets = [5, 0], sizes = [1, 32], strides = [1, 1]} : vector<9x32xf32> to vector<1x32xf32>
    %562 = vector.shape_cast %561 : vector<1x32xf32> to vector<1x32xf32>
    %563 = vector.broadcast %562 : vector<1x32xf32> to vector<8x32xf32>
    %564 = vector.extract_strided_slice %541 {offsets = [6, 0], sizes = [1, 32], strides = [1, 1]} : vector<9x32xf32> to vector<1x32xf32>
    %565 = vector.shape_cast %564 : vector<1x32xf32> to vector<1x32xf32>
    %566 = vector.broadcast %565 : vector<1x32xf32> to vector<8x32xf32>
    %567 = vector.extract_strided_slice %541 {offsets = [7, 0], sizes = [1, 32], strides = [1, 1]} : vector<9x32xf32> to vector<1x32xf32>
    %568 = vector.shape_cast %567 : vector<1x32xf32> to vector<1x32xf32>
    %569 = vector.broadcast %568 : vector<1x32xf32> to vector<8x32xf32>
    %570 = vector.extract_strided_slice %541 {offsets = [8, 0], sizes = [1, 32], strides = [1, 1]} : vector<9x32xf32> to vector<1x32xf32>
    %571 = vector.shape_cast %570 : vector<1x32xf32> to vector<1x32xf32>
    %572 = vector.broadcast %571 : vector<1x32xf32> to vector<8x32xf32>
    %573 = vector.extract_strided_slice %540 {offsets = [0, 0], sizes = [8, 32], strides = [1, 1]} : vector<72x32xf32> to vector<8x32xf32>
    %574 = vector.extract_strided_slice %540 {offsets = [8, 0], sizes = [8, 32], strides = [1, 1]} : vector<72x32xf32> to vector<8x32xf32>
    %575 = vector.extract_strided_slice %540 {offsets = [16, 0], sizes = [8, 32], strides = [1, 1]} : vector<72x32xf32> to vector<8x32xf32>
    %576 = vector.extract_strided_slice %540 {offsets = [24, 0], sizes = [8, 32], strides = [1, 1]} : vector<72x32xf32> to vector<8x32xf32>
    %577 = vector.extract_strided_slice %540 {offsets = [32, 0], sizes = [8, 32], strides = [1, 1]} : vector<72x32xf32> to vector<8x32xf32>
    %578 = vector.extract_strided_slice %540 {offsets = [40, 0], sizes = [8, 32], strides = [1, 1]} : vector<72x32xf32> to vector<8x32xf32>
    %579 = vector.extract_strided_slice %540 {offsets = [48, 0], sizes = [8, 32], strides = [1, 1]} : vector<72x32xf32> to vector<8x32xf32>
    %580 = vector.extract_strided_slice %540 {offsets = [56, 0], sizes = [8, 32], strides = [1, 1]} : vector<72x32xf32> to vector<8x32xf32>
    %581 = vector.extract_strided_slice %540 {offsets = [64, 0], sizes = [8, 32], strides = [1, 1]} : vector<72x32xf32> to vector<8x32xf32>
    %582 = arith.mulf %573, %548 : vector<8x32xf32>
    %583 = arith.mulf %573, %551 : vector<8x32xf32>
    %584 = arith.mulf %573, %557 : vector<8x32xf32>
    %585 = arith.mulf %573, %560 : vector<8x32xf32>
    %586 = arith.mulf %574, %548 : vector<8x32xf32>
    %587 = arith.mulf %574, %551 : vector<8x32xf32>
    %588 = arith.addf %582, %587 : vector<8x32xf32>
    %589 = arith.mulf %574, %554 : vector<8x32xf32>
    %590 = arith.addf %583, %589 : vector<8x32xf32>
    %591 = arith.mulf %574, %557 : vector<8x32xf32>
    %592 = arith.mulf %574, %560 : vector<8x32xf32>
    %593 = arith.addf %584, %592 : vector<8x32xf32>
    %594 = arith.mulf %574, %563 : vector<8x32xf32>
    %595 = arith.addf %585, %594 : vector<8x32xf32>
    %596 = arith.mulf %575, %551 : vector<8x32xf32>
    %597 = arith.addf %586, %596 : vector<8x32xf32>
    %598 = arith.mulf %575, %554 : vector<8x32xf32>
    %599 = arith.addf %588, %598 : vector<8x32xf32>
    %600 = arith.mulf %575, %560 : vector<8x32xf32>
    %601 = arith.addf %591, %600 : vector<8x32xf32>
    %602 = arith.mulf %575, %563 : vector<8x32xf32>
    %603 = arith.addf %593, %602 : vector<8x32xf32>
    %604 = arith.mulf %576, %548 : vector<8x32xf32>
    %605 = arith.mulf %576, %551 : vector<8x32xf32>
    %606 = arith.mulf %576, %557 : vector<8x32xf32>
    %607 = arith.addf %599, %606 : vector<8x32xf32>
    %608 = arith.mulf %576, %560 : vector<8x32xf32>
    %609 = arith.addf %590, %608 : vector<8x32xf32>
    %610 = arith.mulf %576, %566 : vector<8x32xf32>
    %611 = arith.addf %603, %610 : vector<8x32xf32>
    %612 = arith.mulf %576, %569 : vector<8x32xf32>
    %613 = arith.addf %595, %612 : vector<8x32xf32>
    %614 = arith.mulf %577, %548 : vector<8x32xf32>
    %615 = arith.mulf %577, %551 : vector<8x32xf32>
    %616 = arith.addf %604, %615 : vector<8x32xf32>
    %617 = arith.mulf %577, %554 : vector<8x32xf32>
    %618 = arith.addf %605, %617 : vector<8x32xf32>
    %619 = arith.mulf %577, %557 : vector<8x32xf32>
    %620 = arith.addf %597, %619 : vector<8x32xf32>
    %621 = arith.mulf %577, %560 : vector<8x32xf32>
    %622 = arith.addf %607, %621 : vector<8x32xf32>
    %623 = arith.mulf %577, %563 : vector<8x32xf32>
    %624 = arith.addf %609, %623 : vector<8x32xf32>
    %625 = arith.mulf %577, %566 : vector<8x32xf32>
    %626 = arith.addf %601, %625 : vector<8x32xf32>
    %627 = arith.mulf %577, %569 : vector<8x32xf32>
    %628 = arith.addf %611, %627 : vector<8x32xf32>
    %629 = arith.mulf %577, %572 : vector<8x32xf32>
    %630 = arith.addf %613, %629 : vector<8x32xf32>
    %631 = arith.mulf %578, %551 : vector<8x32xf32>
    %632 = arith.addf %614, %631 : vector<8x32xf32>
    %633 = arith.mulf %578, %554 : vector<8x32xf32>
    %634 = arith.addf %616, %633 : vector<8x32xf32>
    %635 = arith.mulf %578, %560 : vector<8x32xf32>
    %636 = arith.addf %620, %635 : vector<8x32xf32>
    %637 = arith.mulf %578, %563 : vector<8x32xf32>
    %638 = arith.addf %622, %637 : vector<8x32xf32>
    %639 = arith.mulf %578, %569 : vector<8x32xf32>
    %640 = arith.addf %626, %639 : vector<8x32xf32>
    %641 = arith.mulf %578, %572 : vector<8x32xf32>
    %642 = arith.addf %628, %641 : vector<8x32xf32>
    %643 = arith.mulf %579, %557 : vector<8x32xf32>
    %644 = arith.addf %634, %643 : vector<8x32xf32>
    %645 = arith.mulf %579, %560 : vector<8x32xf32>
    %646 = arith.addf %618, %645 : vector<8x32xf32>
    %647 = arith.mulf %579, %566 : vector<8x32xf32>
    %648 = arith.addf %638, %647 : vector<8x32xf32>
    %649 = arith.mulf %579, %569 : vector<8x32xf32>
    %650 = arith.addf %624, %649 : vector<8x32xf32>
    %651 = arith.mulf %580, %557 : vector<8x32xf32>
    %652 = arith.addf %632, %651 : vector<8x32xf32>
    %653 = arith.mulf %580, %560 : vector<8x32xf32>
    %654 = arith.addf %644, %653 : vector<8x32xf32>
    %655 = arith.mulf %580, %563 : vector<8x32xf32>
    %656 = arith.addf %646, %655 : vector<8x32xf32>
    %657 = arith.mulf %580, %566 : vector<8x32xf32>
    %658 = arith.addf %636, %657 : vector<8x32xf32>
    %659 = arith.mulf %580, %569 : vector<8x32xf32>
    %660 = arith.addf %648, %659 : vector<8x32xf32>
    %661 = arith.mulf %580, %572 : vector<8x32xf32>
    %662 = arith.addf %650, %661 : vector<8x32xf32>
    %663 = arith.mulf %581, %560 : vector<8x32xf32>
    %664 = arith.addf %652, %663 : vector<8x32xf32>
    %665 = arith.mulf %581, %563 : vector<8x32xf32>
    %666 = arith.addf %654, %665 : vector<8x32xf32>
    %667 = arith.mulf %581, %569 : vector<8x32xf32>
    %668 = arith.addf %658, %667 : vector<8x32xf32>
    %669 = arith.mulf %581, %572 : vector<8x32xf32>
    %670 = arith.addf %660, %669 : vector<8x32xf32>
    %671 = tpu.concatenate %630, %642, %640, %662, %670, %668, %656, %666, %664 in 0 : vector<8x32xf32>, vector<8x32xf32>, vector<8x32xf32>, vector<8x32xf32>, vector<8x32xf32>, vector<8x32xf32>, vector<8x32xf32>, vector<8x32xf32>, vector<8x32xf32> -> vector<72x32xf32>
    %672 = vector.broadcast %542 : vector<1x32xf32> to vector<72x32xf32>
    %673 = arith.addf %671, %672 : vector<72x32xf32>
    %674 = arith.truncf %673 : vector<72x32xf32> to vector<72x32xbf16>
    %675 = arith.truncf %543 : vector<32x32xf32> to vector<32x32xbf16>
    %cst_40 = arith.constant dense<0.000000e+00> : vector<72x32xf32>
    %676 = tpu.matmul %674, %675, %cst_40 {dimension_numbers = #tpu.dot_dimension_numbers<[1], [0], [0], [1], [0, 0, 1, 1], [], []>} : vector<72x32xbf16>, vector<32x32xbf16>, vector<72x32xf32> -> vector<72x32xf32>
    %677 = vector.broadcast %544 : vector<1x32xf32> to vector<72x32xf32>
    %678 = arith.addf %676, %677 : vector<72x32xf32>
    %679 = arith.addf %678, %540 : vector<72x32xf32>
    %cst_41 = arith.constant 0.000000e+00 : f32
    %680 = vector.broadcast %cst_41 : f32 to vector<72x32xf32>
    %681 = arith.cmpf oge, %679, %680 : vector<72x32xf32>
    %682 = vector.broadcast %545 : vector<1x32xf32> to vector<72x32xf32>
    %683 = arith.mulf %679, %682 : vector<72x32xf32>
    %684 = arith.select %681, %679, %683 : vector<72x32xi1>, vector<72x32xf32>
    %685 = vector.extract_strided_slice %684 {offsets = [0, 0], sizes = [8, 32], strides = [1, 1]} : vector<72x32xf32> to vector<8x32xf32>
    %686 = vector.extract_strided_slice %684 {offsets = [8, 0], sizes = [8, 32], strides = [1, 1]} : vector<72x32xf32> to vector<8x32xf32>
    %687 = vector.extract_strided_slice %684 {offsets = [16, 0], sizes = [8, 32], strides = [1, 1]} : vector<72x32xf32> to vector<8x32xf32>
    %688 = vector.extract_strided_slice %684 {offsets = [24, 0], sizes = [8, 32], strides = [1, 1]} : vector<72x32xf32> to vector<8x32xf32>
    %689 = vector.extract_strided_slice %684 {offsets = [32, 0], sizes = [8, 32], strides = [1, 1]} : vector<72x32xf32> to vector<8x32xf32>
    %690 = vector.extract_strided_slice %684 {offsets = [40, 0], sizes = [8, 32], strides = [1, 1]} : vector<72x32xf32> to vector<8x32xf32>
    %691 = vector.extract_strided_slice %684 {offsets = [48, 0], sizes = [8, 32], strides = [1, 1]} : vector<72x32xf32> to vector<8x32xf32>
    %692 = vector.extract_strided_slice %684 {offsets = [56, 0], sizes = [8, 32], strides = [1, 1]} : vector<72x32xf32> to vector<8x32xf32>
    %693 = vector.extract_strided_slice %684 {offsets = [64, 0], sizes = [8, 32], strides = [1, 1]} : vector<72x32xf32> to vector<8x32xf32>
    %694 = tpu.concatenate %685, %686, %687, %688, %689, %690, %691, %692, %693 in 1 : vector<8x32xf32>, vector<8x32xf32>, vector<8x32xf32>, vector<8x32xf32>, vector<8x32xf32>, vector<8x32xf32>, vector<8x32xf32>, vector<8x32xf32>, vector<8x32xf32> -> vector<8x288xf32>
    %c544 = arith.constant 544 : index
    %c0_42 = arith.constant 0 : index
    %695 = vector.load %arg2[%c544, %c0_42] : memref<976x128xf32, #tpu.memory_space<vmem>>, vector<288x128xf32>
    %696 = arith.truncf %694 : vector<8x288xf32> to vector<8x288xbf16>
    %697 = arith.truncf %695 : vector<288x128xf32> to vector<288x128xbf16>
    %cst_43 = arith.constant dense<0.000000e+00> : vector<8x128xf32>
    %698 = tpu.matmul %696, %697, %cst_43 {dimension_numbers = #tpu.dot_dimension_numbers<[1], [0], [0], [1], [0, 0, 1, 1], [], []>} : vector<8x288xbf16>, vector<288x128xbf16>, vector<8x128xf32> -> vector<8x128xf32>
    %c832 = arith.constant 832 : index
    %c0_44 = arith.constant 0 : index
    %699 = vector.load %arg2[%c832, %c0_44] : memref<976x128xf32, #tpu.memory_space<vmem>>, vector<1x128xf32>
    %700 = vector.broadcast %699 : vector<1x128xf32> to vector<8x128xf32>
    %701 = arith.addf %698, %700 : vector<8x128xf32>
    %cst_45 = arith.constant 0.000000e+00 : f32
    %702 = vector.broadcast %cst_45 : f32 to vector<8x128xf32>
    %703 = arith.maximumf %701, %702 : vector<8x128xf32>
    %c840 = arith.constant 840 : index
    %c0_46 = arith.constant 0 : index
    %704 = vector.load %arg2[%c840, %c0_46] : memref<976x128xf32, #tpu.memory_space<vmem>>, vector<128x128xf32>
    %705 = arith.truncf %703 : vector<8x128xf32> to vector<8x128xbf16>
    %706 = arith.truncf %704 : vector<128x128xf32> to vector<128x128xbf16>
    %cst_47 = arith.constant dense<0.000000e+00> : vector<8x128xf32>
    %707 = tpu.matmul %705, %706, %cst_47 {dimension_numbers = #tpu.dot_dimension_numbers<[1], [0], [0], [1], [0, 0, 1, 1], [], []>} : vector<8x128xbf16>, vector<128x128xbf16>, vector<8x128xf32> -> vector<8x128xf32>
    %c968 = arith.constant 968 : index
    %c0_48 = arith.constant 0 : index
    %708 = vector.load %arg2[%c968, %c0_48] : memref<976x128xf32, #tpu.memory_space<vmem>>, vector<1x128xf32>
    %709 = vector.broadcast %708 : vector<1x128xf32> to vector<8x128xf32>
    %710 = arith.addf %707, %709 : vector<8x128xf32>
    %cst_49 = arith.constant 0.000000e+00 : f32
    %711 = vector.broadcast %cst_49 : f32 to vector<8x128xf32>
    %712 = arith.maximumf %710, %711 : vector<8x128xf32>
    %c0_50 = arith.constant 0 : index
    %c0_51 = arith.constant 0 : index
    %713 = vector.load %arg4[%c0_50, %c0_51] : memref<8x128xf32, #tpu.memory_space<vmem>>, vector<8x128xf32>
    tpu.vector_store %arg4[%c0_50, %c0_51], %712 {strides = array<i32>} : memref<8x128xf32, #tpu.memory_space<vmem>>, vector<8x128xf32>,
    return
  }
  func.func @transform_0(%arg0: i32) -> (i32, i32, i32) {
    %c0_i32 = arith.constant 0 : i32
    %c0_i32_0 = arith.constant 0 : i32
    %c0_i32_1 = arith.constant 0 : i32
    return %c0_i32, %arg0, %c0_i32_0 : i32, i32, i32
  }
  func.func @transform_1(%arg0: i32) -> (i32, i32) {
    %c0_i32 = arith.constant 0 : i32
    %c0_i32_0 = arith.constant 0 : i32
    %c0_i32_1 = arith.constant 0 : i32
    return %c0_i32, %c0_i32_0 : i32, i32
  }
  func.func @transform_2(%arg0: i32) -> (i32, i32) {
    %c0_i32 = arith.constant 0 : i32
    %c0_i32_0 = arith.constant 0 : i32
    %c0_i32_1 = arith.constant 0 : i32
    return %c0_i32, %c0_i32_0 : i32, i32
  }
  func.func @transform_3(%arg0: i32) -> (i32, i32) {
    %c0_i32 = arith.constant 0 : i32
    %c0_i32_0 = arith.constant 0 : i32
    return %arg0, %c0_i32 : i32, i32
  }
}

</mosaic_0001>

<bundles_post_ra>
// kernel: face_model_forward.1
= control target key start
LH: loop header
LB: loop body
LE: loop exit
PB: predicated region body
PF: predicated region fallthrough
CT: control target
= control target key end

     0   :  { %vm80_vm0 = vcmask 261120   ;;  %v2360_v63 = vmov 0.0   ;;  %vm2361_vm1 = vmmov 0   ;;  %s2362_s4 = smov 32   ;;  %s2363_s5 = smov 64   ;;  %s3932_s1 = inlined_call_operand.vmem [shape: f32[976,128], index: 1, kind: input, shape index: {}]   ;;  %s3933_s0 = inlined_call_operand.vmem [shape: f32[36,8,32], index: 0, kind: input, shape index: {}]   ;;  %s3934_s2 = inlined_call_operand.vmem [shape: f32[216,32], index: 2, kind: input, shape index: {}]   ;;  %s3935_s3 = inlined_call_operand.vmem [shape: f32[8,128], index: 3, kind: output, shape index: {}]  }
   0x1   :  { %v51_v0 = vld [vmem:[%s3932_s1] sm:$0xff]  ;;  %v52_v1 = vld [vmem:[%s3932_s1 + $0x8] sm:$0xff]  ;;  %v53_v2 = vld [vmem:[%s3932_s1 + $0x10] sm:$0xff]  ;;  %2144 = vmatprep.subr.bf16.mxu1 %v2360_v63  ;;  %2160 = vmatprep.mubr.msk.bf16.mxu1 %vm2361_vm1, %v2360_v63  ;;  %s2364_s6 = smov 96  }
   0x2   :  { %v73_v3 = vpack.c.bf16 %v52_v1, %v51_v0  ;;  %v54_v4 = vld [vmem:[%s3932_s1 + $0x18] sm:$0xff]  ;;  %v15_v5 = vld [vmem:[%s3933_s0] sm:$0xff]  ;;  %v16_v6 = vld [vmem:[%s3933_s0 + $0x8] sm:$0xff] }
   0x3   :  { %v74_v7 = vpack.c.bf16 %v54_v4, %v53_v2  ;;  %v55_v8 = vpack.c.bf16 %v16_v6, %v15_v5  ;;  %v17_v9 = vld [vmem:[%s3933_s0 + $0x10] sm:$0xff]  ;;  %v18_v10 = vld [vmem:[%s3933_s0 + $0x18] sm:$0xff]  ;;  %v19_v11 = vld [vmem:[%s3933_s0 + $0x20] sm:$0xff] }
   0x4   :  { %2104 = vmatprep.subr.bf16.mxu0 %v73_v3  ;;  %v20_v12 = vld [vmem:[%s3933_s0 + $0x28] sm:$0xff]  ;;  %v56_v13 = vpack.c.bf16 %v18_v10, %v17_v9  ;;  %v21_v15 = vld [vmem:[%s3933_s0 + $0x30] sm:$0xff]  ;;  %v22_v16 = vld [vmem:[%s3933_s0 + $0x38] sm:$0xff] }
   0x5   :  { %2105 = vmatpush3.bf16.msra.mxu0 %v73_v3  ;;  %2108 = vmatprep.mubr.msk.bf16.mxu0 %vm80_vm0, %v55_v8  ;;  %v57_v14 = vpack.c.bf16 %v20_v12, %v19_v11  ;;  %v23_v17 = vld [vmem:[%s3933_s0 + $0x40] sm:$0xff]  ;;  %v24_v18 = vld [vmem:[%s3933_s0 + $0x48] sm:$0xff]  ;;  %v58_v19 = vpack.c.bf16 %v22_v16, %v21_v15  ;;  %v25_v21 = vld [vmem:[%s3933_s0 + $0x50] sm:$0xff] }
   0x6   :  { %2106 = vmatprep.subr.bf16.mxu0 %v74_v7  ;;  %v59_v20 = vpack.c.bf16 %v24_v18, %v23_v17  ;;  %v26_v22 = vld [vmem:[%s3933_s0 + $0x58] sm:$0xff]  ;;  %v27_v23 = vld [vmem:[%s3933_s0 + $0x60] sm:$0xff]  ;;  %v28_v24 = vld [vmem:[%s3933_s0 + $0x68] sm:$0xff] }
   0x7   :  { %v60_v25 = vpack.c.bf16 %v26_v22, %v25_v21  ;;  %v61_v26 = vpack.c.bf16 %v28_v24, %v27_v23  ;;  %v29_v27 = vld [vmem:[%s3933_s0 + $0x70] sm:$0xff]  ;;  %v30_v28 = vld [vmem:[%s3933_s0 + $0x78] sm:$0xff]  ;;  %v31_v29 = vld [vmem:[%s3933_s0 + $0x80] sm:$0xff]  ;;  %v369_v21 = vlaneseq }
   0x8   :  { %v32_v30 = vld [vmem:[%s3933_s0 + $0x88] sm:$0xff]  ;;  %v62_v31 = vpack.c.bf16 %v30_v28, %v29_v27  ;;  %v33_v33 = vld [vmem:[%s3933_s0 + $0x90] sm:$0xff]  ;;  %v34_v34 = vld [vmem:[%s3933_s0 + $0x98] sm:$0xff] }
   0x9   :  { %2107 = vmatpush3.bf16.msra.mxu0 %v74_v7  ;;  %v63_v32 = vpack.c.bf16 %v32_v30, %v31_v29  ;;  %v35_v35 = vld [vmem:[%s3933_s0 + $0xa0] sm:$0xff]  ;;  %v36_v36 = vld [vmem:[%s3933_s0 + $0xa8] sm:$0xff]  ;;  %v64_v37 = vpack.c.bf16 %v34_v34, %v33_v33  ;;  %v37_v39 = vld [vmem:[%s3933_s0 + $0xb0] sm:$0xff]  ;;  %v2585_v22 = vshrl.u32 %v369_v21, 7 }
   0xa   :  { %v65_v38 = vpack.c.bf16 %v36_v36, %v35_v35  ;;  %v38_v40 = vld [vmem:[%s3933_s0 + $0xb8] sm:$0xff]  ;;  %v39_v41 = vld [vmem:[%s3933_s0 + $0xc0] sm:$0xff]  ;;  %v40_v42 = vld [vmem:[%s3933_s0 + $0xc8] sm:$0xff]  ;;  %2216 = vmatprep.subr.bf16.mxu0 %v2360_v63 }
   0xb   :  { %v66_v43 = vpack.c.bf16 %v38_v40, %v37_v39  ;;  %v67_v44 = vpack.c.bf16 %v40_v42, %v39_v41  ;;  %v41_v45 = vld [vmem:[%s3933_s0 + $0xd0] sm:$0xff]  ;;  %v42_v46 = vld [vmem:[%s3933_s0 + $0xd8] sm:$0xff]  ;;  %v43_v47 = vld [vmem:[%s3933_s0 + $0xe0] sm:$0xff]  ;;  %v2593_v24 = vsub.s32 0, %v2585_v22  ;;  %v2605_v30 = vsub.s32 2, %v2585_v22 }
   0xc   :  { %2109 = vmatmul.mubr.msk.bf16.vlgmr.msra.gmra.mrb[0].mxu0 %vm80_vm0, %v56_v13  ;;  %v44_v48 = vld [vmem:[%s3933_s0 + $0xe8] sm:$0xff]  ;;  %v68_v49 = vpack.c.bf16 %v42_v46, %v41_v45  ;;  %v45_v51 = vld [vmem:[%s3933_s0 + $0xf0] sm:$0xff]  ;;  %v46_v52 = vld [vmem:[%s3933_s0 + $0xf8] sm:$0xff]  ;;  %v2619_v41 = vsub.s32 3, %v2585_v22 }
   0xd   :  { %2112 = vmatprep.mubr.msk.bf16.mxu0 %vm80_vm0, %v57_v14  ;;  %v69_v50 = vpack.c.bf16 %v44_v48, %v43_v47  ;;  %v47_v53 = vld [vmem:[%s3933_s0 + $0x100] sm:$0xff]  ;;  %v48_v54 = vld [vmem:[%s3933_s0 + $0x108] sm:$0xff]  ;;  %v70_v55 = vpack.c.bf16 %v46_v52, %v45_v51  ;;  %v49_v57 = vld [vmem:[%s3933_s0 + $0x110] sm:$0xff]  ;;  %v2630_v47 = vsub.s32 4, %v2585_v22 }
   0xe   :  { %v71_v56 = vpack.c.bf16 %v48_v54, %v47_v53  ;;  %v50_v58 = vld [vmem:[%s3933_s0 + $0x118] sm:$0xff]  ;;  %v351_v60 = vld [vmem:[%s3932_s1 + $0x40] sm:$0xff]  ;;  %v352_v61 = vld [vmem:[%s3932_s1 + $0x48] sm:$0xff] }
   0xf   :  { %v72_v59 = vpack.c.bf16 %v50_v58, %v49_v57  ;;  %v569_v62 = vpack.c.bf16 %v352_v61, %v351_v60  ;;  %v353_v0 = vld [vmem:[%s3932_s1 + $0x50] sm:$0xff]  ;;  %v354_v1 = vld [vmem:[%s3932_s1 + $0x58] sm:$0xff]  ;;  %v355_v3 = vld [vmem:[%s3932_s1 + $0x60] sm:$0xff] }
  0x10   :  { %v570_v2 = vpack.c.bf16 %v354_v1, %v353_v0  ;;  %v356_v4 = vld [vmem:[%s3932_s1 + $0x68] sm:$0xff]  ;;  %v357_v6 = vld [vmem:[%s3932_s1 + $0x70] sm:$0xff]  ;;  %v358_v7 = vld [vmem:[%s3932_s1 + $0x78] sm:$0xff] }
  0x11   :  { %2145 = vmatpush3.bf16.msra.mxu1 %v569_v62  ;;  %v571_v5 = vpack.c.bf16 %v356_v4, %v355_v3  ;;  %v572_v8 = vpack.c.bf16 %v358_v7, %v357_v6  ;;  %v359_v9 = vld [vmem:[%s3932_s1 + $0x80] sm:$0xff]  ;;  %v360_v10 = vld [vmem:[%s3932_s1 + $0x88] sm:$0xff]  ;;  %v361_v12 = vld [vmem:[%s3932_s1 + $0x90] sm:$0xff] }
  0x12   :  { %2146 = vmatprep.subr.bf16.mxu1 %v2360_v63  ;;  %v573_v11 = vpack.c.bf16 %v360_v10, %v359_v9  ;;  %v362_v13 = vld [vmem:[%s3932_s1 + $0x98] sm:$0xff]  ;;  %v363_v15 = vld [vmem:[%s3932_s1 + $0xa0] sm:$0xff]  ;;  %v364_v16 = vld [vmem:[%s3932_s1 + $0xa8] sm:$0xff] }
  0x13   :  { %v574_v14 = vpack.c.bf16 %v362_v13, %v361_v12  ;;  %v575_v17 = vpack.c.bf16 %v364_v16, %v363_v15  ;;  %v365_v18 = vld [vmem:[%s3932_s1 + $0xb0] sm:$0xff]  ;;  %v2590_v23 = vld [vmem:[%s3932_s1 + $0x20] ss:$0 sm:$0xff]  ;;  %v2601_v27 = vld [vmem:[%s3932_s1 + $0x28] sm:$0xff] }
  0x14   :  { %2113 = vmatmul.mubr.msk.bf16.gmra.mrb[4].mxu0 %vm80_vm0, %v58_v19  ;;  %v366_v19 = vld [vmem:[%s3932_s1 + $0xb8] sm:$0xff]  ;;  %v2610_v34 = vrot.slane %v2601_v27, %v2593_v24  ;;  %v2623_v42 = vrot.slane %v2601_v27, %v2605_v30  ;;  %v2639_v54 = vrot.slane %v2601_v27, %v2619_v41  ;;  %v2646_v62 = vrot.slane %v2601_v27, %v2630_v47 }
  0x15   :  { %2116 = vmatprep.mubr.msk.bf16.mxu0 %vm80_vm0, %v59_v20  ;;  %2147 = vmatpush3.bf16.msra.mxu1 %v570_v2  ;;  %v576_v20 = vpack.c.bf16 %v366_v19, %v365_v18 }
  0x16   :  { %2148 = vmatprep.subr.bf16.mxu1 %v2360_v63 }
  0x19   :  { %2149 = vmatpush3.bf16.msra.mxu1 %v571_v5 }
  0x1a   :  { %2150 = vmatprep.subr.bf16.mxu1 %v2360_v63 }
  0x1c   :  { %2117 = vmatmul.mubr.msk.bf16.gmra.mrb[8].mxu0 %vm80_vm0, %v60_v25  ;;  %v2596_v25 = vsub.s32 1, %v2585_v22 }
  0x1d   :  { %2120 = vmatprep.mubr.msk.bf16.mxu0 %vm80_vm0, %v61_v26  ;;  %2151 = vmatpush3.bf16.msra.mxu1 %v572_v8  ;;  %v2652_v8 = vsub.s32 5, %v2585_v22 }
  0x1e   :  { %2152 = vmatprep.subr.bf16.mxu1 %v2360_v63  ;;  %v2615_v36 = vrot.slane %v2601_v27, %v2596_v25 }
  0x21   :  { %2153 = vmatpush3.bf16.msra.mxu1 %v573_v11 }
  0x22   :  { %2154 = vmatprep.subr.bf16.mxu1 %v2360_v63 }
  0x24   :  { %2121 = vmatmul.mubr.msk.bf16.gmra.mrb[12].mxu0 %vm80_vm0, %v62_v31 }
  0x25   :  { %2124 = vmatprep.mubr.msk.bf16.mxu0 %vm80_vm0, %v63_v32  ;;  %2155 = vmatpush3.bf16.msra.mxu1 %v574_v14 }
  0x26   :  { %2156 = vmatprep.subr.bf16.mxu1 %v2360_v63 }
  0x29   :  { %2157 = vmatpush3.bf16.msra.mxu1 %v575_v17 }
  0x2a   :  { %2158 = vmatprep.subr.bf16.mxu1 %v2360_v63 }
  0x2c   :  { %2125 = vmatmul.mubr.msk.bf16.gmra.mrb[16].mxu0 %vm80_vm0, %v64_v37 }
  0x2d   :  { %2128 = vmatprep.mubr.msk.bf16.mxu0 %vm80_vm0, %v65_v38  ;;  %2159 = vmatpush3.bf16.msra.mxu1 %v576_v20 }
  0x2e   :  { %2180 = vmatprep.subr.bf16.mxu1 %v2360_v63 }
  0x34   :  { %2129 = vmatmul.mubr.msk.bf16.gmra.mrb[20].mxu0 %vm80_vm0, %v66_v43 }
  0x35   :  { %2132 = vmatprep.mubr.msk.bf16.mxu0 %vm80_vm0, %v67_v44 }
  0x3c   :  { %2133 = vmatmul.mubr.msk.bf16.gmra.mrb[24].mxu0 %vm80_vm0, %v68_v49 }
  0x3d   :  { %2136 = vmatprep.mubr.msk.bf16.mxu0 %vm80_vm0, %v69_v50 }
  0x44   :  { %2137 = vmatmul.mubr.msk.bf16.gmra.mrb[28].mxu0 %vm80_vm0, %v70_v55 }
  0x45   :  { %2140 = vmatprep.mubr.msk.bf16.mxu0 %vm80_vm0, %v71_v56 }
  0x4c   :  { %2141 = vmatmul.mubr.msk.bf16.gmra.mrb[32].mxu0 %vm80_vm0, %v72_v59 }
  0x4d   :  { %2232 = vmatprep.mubr.msk.bf16.mxu0 %vm2361_vm1, %v2360_v63 }
  0xdf   :  { %v2110_v26 = vpop.f32.mrb[0].mxu0 }
  0xe0   :  { %v178_v28 = vadd.f32 %v2110_v26, %v2590_v23  ;;  %v169_v29 = vpop.f32.mrb[1].mxu0  ;;  %v2666_v26 = vrot.slane %v2601_v27, %v2652_v8 }
  0xe1   :  { %v170_v31 = vadd.f32 %v2590_v23, %v169_v29  ;;  %v2111_v32 = vpop.f32.mrb[2].mxu0 }
  0xe2   :  { %v314_v33 = vmax.f32 %v178_v28, 0.0  ;;  %v181_v35 = vadd.f32 %v2111_v32, %v2590_v23  ;;  %v172_v37 = vpop.f32.mrb[3].mxu0 }
  0xe3   :  { %v312_v38 = vmax.f32 %v170_v31, 0.0  ;;  %v173_v39 = vadd.f32 %v2590_v23, %v172_v37 }
  0xe4   :  { %v315_v40 = vmax.f32 %v181_v35, 0.0  ;;  %v425_v44 = vmul.f32 %v2610_v34, %v314_v33  ;;  %v408_v56 = vmul.f32 %v2623_v42, %v314_v33 }
  0xe5   :  { %v313_v43 = vmax.f32 %v173_v39, 0.0  ;;  %v405_v48 = vmul.f32 %v2610_v34, %v312_v38 }
  0xe6   :  { %v426_v45 = vmul.f32 %v2615_v36, %v315_v40  ;;  %v2627_v46 = vmax.f32 %v314_v33, %v315_v40  ;;  %v2673_v40 = vsub.s32 6, %v2585_v22 }
  0xe7   :  { %v406_v49 = vmul.f32 %v2615_v36, %v313_v43  ;;  %v2634_v50 = vmax.f32 %v312_v38, %v313_v43  ;;  %v2114_v51 = vpop.f32.mrb[4].mxu0 }
  0xe8   :  { %v427_v52 = vadd.f32 %v426_v45, %v425_v44  ;;  %v194_v53 = vadd.f32 %v2114_v51, %v2590_v23  ;;  %v185_v55 = vpop.f32.mrb[5].mxu0 }
  0xe9   :  { %v407_v57 = vadd.f32 %v406_v49, %v405_v48  ;;  %v186_v58 = vadd.f32 %v2590_v23, %v185_v55  ;;  %v2115_v59 = vpop.f32.mrb[6].mxu0 }
  0xea   :  { %v318_v60 = vmax.f32 %v194_v53, 0.0  ;;  %v197_v61 = vadd.f32 %v2115_v59, %v2590_v23  ;;  %v188_v0 = vpop.f32.mrb[7].mxu0 }
  0xeb   :  { %v409_v1 = vadd.f32 %v408_v56, %v407_v57  ;;  %v316_v2 = vmax.f32 %v186_v58, 0.0  ;;  %v189_v3 = vadd.f32 %v2590_v23, %v188_v0  ;;  %v2689_v0 = vrot.slane %v2601_v27, %v2673_v40 }
  0xec   :  { %v410_v4 = vmul.f32 %v2639_v54, %v318_v60  ;;  %v319_v5 = vmax.f32 %v197_v61, 0.0 }
  0xed   :  { %v428_v6 = vmul.f32 %v2623_v42, %v316_v2  ;;  %v317_v7 = vmax.f32 %v189_v3, 0.0  ;;  %v445_v13 = vmul.f32 %v2610_v34, %v316_v2 }
  0xee   :  { %v411_v9 = vadd.f32 %v410_v4, %v409_v1  ;;  %v412_v10 = vmul.f32 %v2646_v62, %v319_v5  ;;  %v2655_v11 = vmax.f32 %v318_v60, %v319_v5 }
  0xef   :  { %v429_v12 = vadd.f32 %v428_v6, %v427_v52  ;;  %v446_v14 = vmul.f32 %v2615_v36, %v317_v7  ;;  %v2659_v15 = vmax.f32 %v316_v2, %v317_v7  ;;  %v2118_v16 = vpop.f32.mrb[8].mxu0  ;;  %v2681_v52 = vsub.s32 7, %v2585_v22 }
  0xf0   :  { %v413_v17 = vadd.f32 %v412_v10, %v411_v9  ;;  %v210_v18 = vadd.f32 %v2118_v16, %v2590_v23  ;;  %v201_v19 = vpop.f32.mrb[9].mxu0  ;;  %v424_v20 = vmax.f32 %v2634_v50, %v2655_v11  ;;  %v693_v50 = vld [vmem:[%s3932_s1 + $0xd0] sm:$0xff] }
  0xf1   :  { %v447_v21 = vadd.f32 %v446_v14, %v445_v13  ;;  %v202_v28 = vadd.f32 %v2590_v23, %v201_v19  ;;  %v2119_v29 = vpop.f32.mrb[10].mxu0  ;;  %v2702_v9 = vrot.slane %v2601_v27, %v2681_v52 }
  0xf2   :  { %v322_v31 = vmax.f32 %v210_v18, 0.0  ;;  %v213_v32 = vadd.f32 %v2119_v29, %v2590_v23  ;;  %v204_v33 = vpop.f32.mrb[11].mxu0 }
  0xf3   :  { %v320_v35 = vmax.f32 %v202_v28, 0.0  ;;  %v205_v37 = vadd.f32 %v2590_v23, %v204_v33  ;;  %v2726_v33 = vld [vmem:[%s3932_s1 + $0x30] ss:$0 sm:$0xff] }
  0xf4   :  { %v448_v38 = vmul.f32 %v2639_v54, %v322_v31  ;;  %v323_v39 = vmax.f32 %v213_v32, 0.0  ;;  %v434_v22 = vmul.f32 %v2666_v26, %v322_v31 }
  0xf5   :  { %v414_v43 = vmul.f32 %v2666_v26, %v320_v35  ;;  %v430_v44 = vmul.f32 %v2639_v54, %v320_v35  ;;  %v321_v45 = vmax.f32 %v205_v37, 0.0 }
  0xf6   :  { %v449_v48 = vadd.f32 %v448_v38, %v447_v21  ;;  %v450_v49 = vmul.f32 %v2646_v62, %v323_v39  ;;  %v2678_v51 = vmax.f32 %v322_v31, %v323_v39 }
  0xf7   :  { %v415_v53 = vadd.f32 %v414_v43, %v413_v17  ;;  %v431_v55 = vadd.f32 %v430_v44, %v429_v12  ;;  %v432_v56 = vmul.f32 %v2646_v62, %v321_v45  ;;  %v2684_v57 = vmax.f32 %v320_v35, %v321_v45  ;;  %v2122_v58 = vpop.f32.mrb[12].mxu0 }
  0xf8   :  { %v451_v59 = vadd.f32 %v450_v49, %v449_v48  ;;  %v226_v60 = vadd.f32 %v2122_v58, %v2590_v23  ;;  %v217_v61 = vpop.f32.mrb[13].mxu0  ;;  %v458_v1 = vmax.f32 %v2659_v15, %v2678_v51 }
  0xf9   :  { %v433_v2 = vadd.f32 %v432_v56, %v431_v55  ;;  %v218_v3 = vadd.f32 %v2590_v23, %v217_v61  ;;  %v2123_v4 = vpop.f32.mrb[14].mxu0  ;;  %v444_v5 = vmax.f32 %v2627_v46, %v2684_v57 }
  0xfa   :  { %v2697_v6 = vmax.f32 %v226_v60, 0.0  ;;  %v229_v7 = vadd.f32 %v2123_v4, %v2590_v23  ;;  %v220_v10 = vpop.f32.mrb[15].mxu0 }
  0xfb   :  { %v435_v12 = vadd.f32 %v434_v22, %v433_v2  ;;  %v2704_v13 = vmax.f32 %v218_v3, 0.0  ;;  %v221_v14 = vadd.f32 %v2590_v23, %v220_v10 }
  0xfc   :  { %v2707_v16 = vmax.f32 %v229_v7, 0.0  ;;  %v436_v17 = vmul.f32 %v2689_v0, %v2697_v6  ;;  %v479_v27 = vmul.f32 %v2610_v34, %v2697_v6  ;;  %v462_v49 = vmul.f32 %v2623_v42, %v2697_v6 }
  0xfd   :  { %v416_v18 = vmul.f32 %v2689_v0, %v2704_v13  ;;  %v459_v19 = vmul.f32 %v2610_v34, %v2704_v13  ;;  %v325_v21 = vmax.f32 %v221_v14, 0.0  ;;  %v420_v61 = vmul.f32 %v2726_v33, %v2697_v6 }
  0xfe   :  { %v437_v28 = vadd.f32 %v436_v17, %v435_v12  ;;  %v438_v29 = vmul.f32 %v2702_v9, %v2707_v16  ;;  %v480_v31 = vmul.f32 %v2615_v36, %v2707_v16  ;;  %v496_v32 = vmax.f32 %v2697_v6, %v2707_v16 }
  0xff   :  { %v417_v35 = vadd.f32 %v416_v18, %v415_v53  ;;  %v418_v37 = vmul.f32 %v2702_v9, %v325_v21  ;;  %v460_v38 = vmul.f32 %v2615_v36, %v325_v21  ;;  %v476_v39 = vmax.f32 %v2704_v13, %v325_v21  ;;  %v2126_v43 = vpop.f32.mrb[16].mxu0 }
 0x100   :  { %v439_v44 = vadd.f32 %v438_v29, %v437_v28  ;;  %v481_v45 = vadd.f32 %v480_v31, %v479_v27  ;;  %v242_v48 = vadd.f32 %v2126_v43, %v2590_v23  ;;  %v233_v55 = vpop.f32.mrb[17].mxu0  ;;  %v2747_v31 = vld [vmem:[%s3932_s1 + $0x38] ss:$0 sm:$0xff] }
 0x101   :  { %v419_v56 = vadd.f32 %v418_v37, %v417_v35  ;;  %v461_v58 = vadd.f32 %v460_v38, %v459_v19  ;;  %v234_v60 = vadd.f32 %v2590_v23, %v233_v55  ;;  %v2127_v53 = vpop.f32.mrb[18].mxu0 }
 0x102   :  { %v330_v22 = vmax.f32 %v242_v48, 0.0  ;;  %v245_v2 = vadd.f32 %v2127_v53, %v2590_v23  ;;  %v236_v3 = vpop.f32.mrb[19].mxu0 }
 0x103   :  { %v463_v4 = vadd.f32 %v462_v49, %v461_v58  ;;  %v328_v7 = vmax.f32 %v234_v60, 0.0  ;;  %v237_v10 = vadd.f32 %v2590_v23, %v236_v3  ;;  %v421_v12 = vadd.f32 %v420_v61, %v419_v56 }
 0x104   :  { %v464_v13 = vmul.f32 %v2639_v54, %v330_v22  ;;  %v331_v14 = vmax.f32 %v245_v2, 0.0 }
 0x105   :  { %v329_v17 = vmax.f32 %v237_v10, 0.0  ;;  %v452_v18 = vmul.f32 %v2689_v0, %v328_v7  ;;  %v499_v19 = vmul.f32 %v2610_v34, %v328_v7  ;;  %v482_v27 = vmul.f32 %v2623_v42, %v328_v7 }
 0x106   :  { %v465_v21 = vadd.f32 %v464_v13, %v463_v4  ;;  %v466_v28 = vmul.f32 %v2646_v62, %v331_v14  ;;  %v477_v29 = vmax.f32 %v330_v22, %v331_v14  ;;  %v440_v35 = vmul.f32 %v2726_v33, %v328_v7 }
 0x107   :  { %v453_v37 = vadd.f32 %v452_v18, %v451_v59  ;;  %v454_v38 = vmul.f32 %v2702_v9, %v329_v17  ;;  %v500_v43 = vmul.f32 %v2615_v36, %v329_v17  ;;  %v510_v48 = vmax.f32 %v328_v7, %v329_v17  ;;  %v2130_v49 = vpop.f32.mrb[20].mxu0 }
 0x108   :  { %v467_v55 = vadd.f32 %v466_v28, %v465_v21  ;;  %v258_v56 = vadd.f32 %v2130_v49, %v2590_v23  ;;  %v249_v58 = vpop.f32.mrb[21].mxu0  ;;  %v483_v60 = vadd.f32 %v482_v27, %v481_v45  ;;  %v441_v53 = vadd.f32 %v440_v35, %v439_v44 }
 0x109   :  { %v2753_v61 = vadd.f32 %v454_v38, %v453_v37  ;;  %v501_v22 = vadd.f32 %v500_v43, %v499_v19  ;;  %v250_v2 = vadd.f32 %v2590_v23, %v249_v58  ;;  %v2131_v3 = vpop.f32.mrb[22].mxu0  ;;  %v555_v59 = vadd.f32 %v2747_v31, %v421_v12 }
 0x10a   :  { %v334_v4 = vmax.f32 %v258_v56, 0.0  ;;  %v261_v10 = vadd.f32 %v2131_v3, %v2590_v23  ;;  %v252_v13 = vpop.f32.mrb[23].mxu0  ;;  %v556_v7 = vadd.f32 %v2747_v31, %v441_v53  ;;  %v2759_v14 = vmax.f32 %v476_v39, %v477_v29 }
 0x10b   :  { %v332_v17 = vmax.f32 %v250_v2, 0.0  ;;  %v253_v45 = vadd.f32 %v2590_v23, %v252_v13 }
 0x10c   :  { %v502_v44 = vmul.f32 %v2639_v54, %v334_v4  ;;  %v335_v18 = vmax.f32 %v261_v10, 0.0  ;;  %v564_v19 = vpack.c.bf16 %v556_v7, %v555_v59 }
 0x10d   :  { %v468_v27 = vmul.f32 %v2666_v26, %v332_v17  ;;  %v484_v21 = vmul.f32 %v2639_v54, %v332_v17  ;;  %v333_v12 = vmax.f32 %v253_v45, 0.0 }
 0x10e   :  { %v503_v28 = vadd.f32 %v502_v44, %v501_v22  ;;  %v504_v35 = vmul.f32 %v2646_v62, %v335_v18  ;;  %v511_v37 = vmax.f32 %v334_v4, %v335_v18  ;;  %2161 = vmatmul.mubr.bf16.vlgmr.msra.gmra.mrb[0].mxu1 %v564_v19  ;;  %v488_v22 = vmul.f32 %v2666_v26, %v334_v4 }
 0x10f   :  { %v469_v38 = vadd.f32 %v468_v27, %v467_v55  ;;  %v485_v39 = vadd.f32 %v484_v21, %v483_v60  ;;  %v486_v29 = vmul.f32 %v2646_v62, %v333_v12  ;;  %v497_v43 = vmax.f32 %v332_v17, %v333_v12  ;;  %v2134_v49 = vpop.f32.mrb[24].mxu0  ;;  %2164 = vmatprep.mubr.msk.bf16.mxu1 %vm2361_vm1, %v2360_v63 }
 0x110   :  { %v505_v56 = vadd.f32 %v504_v35, %v503_v28  ;;  %v274_v58 = vadd.f32 %v2134_v49, %v2590_v23  ;;  %v265_v53 = vpop.f32.mrb[25].mxu0  ;;  %v2770_v2 = vmax.f32 %v510_v48, %v511_v37 }
 0x111   :  { %v487_v3 = vadd.f32 %v486_v29, %v485_v39  ;;  %v266_v59 = vadd.f32 %v2590_v23, %v265_v53  ;;  %v2135_v55 = vpop.f32.mrb[26].mxu0  ;;  %v2777_v60 = vmax.f32 %v496_v32, %v497_v43 }
 0x112   :  { %v2779_v10 = vmax.f32 %v274_v58, 0.0  ;;  %v277_v13 = vadd.f32 %v2135_v55, %v2590_v23  ;;  %v268_v7 = vpop.f32.mrb[27].mxu0 }
 0x113   :  { %v489_v17 = vadd.f32 %v488_v22, %v487_v3  ;;  %v2782_v45 = vmax.f32 %v266_v59, 0.0  ;;  %v269_v48 = vadd.f32 %v2590_v23, %v268_v7 }
 0x114   :  { %v2785_v4 = vmax.f32 %v277_v13, 0.0  ;;  %v490_v44 = vmul.f32 %v2689_v0, %v2779_v10  ;;  %v527_v32 = vmul.f32 %v2610_v34, %v2779_v10  ;;  %v516_v53 = vmul.f32 %v2623_v42, %v2779_v10 }
 0x115   :  { %v470_v6 = vmul.f32 %v2689_v0, %v2782_v45  ;;  %v513_v16 = vmul.f32 %v2610_v34, %v2782_v45  ;;  %v337_v18 = vmax.f32 %v269_v48, 0.0  ;;  %v474_v13 = vmul.f32 %v2726_v33, %v2779_v10 }
 0x116   :  { %v491_v19 = vadd.f32 %v490_v44, %v489_v17  ;;  %v492_v27 = vmul.f32 %v2702_v9, %v2785_v4  ;;  %v528_v21 = vmul.f32 %v2615_v36, %v2785_v4  ;;  %v538_v12 = vmax.f32 %v2779_v10, %v2785_v4  ;;  %v696_v10 = vld [vmem:[%s3932_s1 + $0xe8] sm:$0xff]  ;;  %v697_v4 = vld [vmem:[%s3932_s1 + $0xf0] sm:$0xff] }
 0x117   :  { %v471_v28 = vadd.f32 %v470_v6, %v469_v38  ;;  %v472_v35 = vmul.f32 %v2702_v9, %v337_v18  ;;  %v514_v37 = vmul.f32 %v2615_v36, %v337_v18  ;;  %v524_v39 = vmax.f32 %v2782_v45, %v337_v18  ;;  %v2138_v29 = vpop.f32.mrb[28].mxu0 }
 0x118   :  { %v493_v43 = vadd.f32 %v492_v27, %v491_v19  ;;  %v529_v49 = vadd.f32 %v528_v21, %v527_v32  ;;  %v290_v58 = vadd.f32 %v2138_v29, %v2590_v23  ;;  %v281_v22 = vpop.f32.mrb[29].mxu0 }
 0x119   :  { %v473_v3 = vadd.f32 %v472_v35, %v471_v28  ;;  %v515_v59 = vadd.f32 %v514_v37, %v513_v16  ;;  %v282_v55 = vadd.f32 %v2590_v23, %v281_v22  ;;  %v2139_v38 = vpop.f32.mrb[30].mxu0  ;;  %v557_v16 = vadd.f32 %v2747_v31, %v2753_v61 }
 0x11a   :  { %v342_v7 = vmax.f32 %v290_v58, 0.0  ;;  %v293_v17 = vadd.f32 %v2139_v38, %v2590_v23  ;;  %v284_v45 = vpop.f32.mrb[31].mxu0 }
 0x11b   :  { %v517_v48 = vadd.f32 %v516_v53, %v515_v59  ;;  %v340_v44 = vmax.f32 %v282_v55, 0.0  ;;  %v285_v6 = vadd.f32 %v2590_v23, %v284_v45  ;;  %v475_v32 = vadd.f32 %v474_v13, %v473_v3 }
 0x11c   :  { %v518_v18 = vmul.f32 %v2639_v54, %v342_v7  ;;  %v343_v19 = vmax.f32 %v293_v17, 0.0 }
 0x11d   :  { %v341_v27 = vmax.f32 %v285_v6, 0.0  ;;  %v506_v21 = vmul.f32 %v2689_v0, %v340_v44  ;;  %v541_v28 = vmul.f32 %v2610_v34, %v340_v44  ;;  %v558_v35 = vadd.f32 %v2747_v31, %v475_v32 }
 0x11e   :  { %v519_v37 = vadd.f32 %v518_v18, %v517_v48  ;;  %v520_v29 = vmul.f32 %v2646_v62, %v343_v19  ;;  %v525_v58 = vmax.f32 %v342_v7, %v343_v19  ;;  %v530_v53 = vmul.f32 %v2623_v42, %v340_v44 }
 0x11f   :  { %v507_v22 = vadd.f32 %v506_v21, %v505_v56  ;;  %v508_v3 = vmul.f32 %v2702_v9, %v341_v27  ;;  %v542_v59 = vmul.f32 %v2615_v36, %v341_v27  ;;  %v548_v55 = vmax.f32 %v340_v44, %v341_v27  ;;  %v2142_v61 = vpop.f32.mrb[32].mxu0 }
 0x120   :  { %v521_v38 = vadd.f32 %v520_v29, %v519_v37  ;;  %v306_v0 = vadd.f32 %v2142_v61, %v2590_v23  ;;  %v297_v13 = vpop.f32.mrb[33].mxu0  ;;  %v565_v34 = vpack.c.bf16 %v558_v35, %v557_v16  ;;  %v531_v17 = vadd.f32 %v530_v53, %v529_v49 }
 0x121   :  { %v509_v45 = vadd.f32 %v508_v3, %v507_v22  ;;  %v543_v48 = vadd.f32 %v542_v59, %v541_v28  ;;  %v298_v6 = vadd.f32 %v2590_v23, %v297_v13  ;;  %v2143_v7 = vpop.f32.mrb[34].mxu0  ;;  %v494_v42 = vmul.f32 %v2726_v33, %v340_v44 }
 0x122   :  { %v346_v56 = vmax.f32 %v306_v0, 0.0  ;;  %v309_v9 = vadd.f32 %v2143_v7, %v2590_v23  ;;  %2165 = vmatmul.mubr.bf16.gmra.mrb[4].mxu1 %v565_v34  ;;  %v300_v36 = vpop.f32.mrb[35].mxu0  ;;  %v2826_v32 = vmax.f32 %v524_v39, %v525_v58 }
 0x123   :  { %v344_v18 = vmax.f32 %v298_v6, 0.0  ;;  %v301_v19 = vadd.f32 %v2590_v23, %v300_v36  ;;  %2168 = vmatprep.mubr.msk.bf16.mxu1 %vm2361_vm1, %v2360_v63  ;;  %v495_v49 = vadd.f32 %v494_v42, %v493_v43  ;;  %v560_v21 = vadd.f32 %v2747_v31, %v509_v45  ;;  %v701_v6 = vld [vmem:[%s3932_s1 + $0x110] sm:$0xff]  ;;  %v702_v42 = vld [vmem:[%s3932_s1 + $0x118] sm:$0xff]  ;;  %v704_v36 = vld [vmem:[%s3932_s1 + $0x128] sm:$0xff] }
 0x124   :  { %v544_v16 = vmul.f32 %v2639_v54, %v346_v56  ;;  %v347_v27 = vmax.f32 %v309_v9, 0.0  ;;  %v536_v61 = vmul.f32 %v2666_v26, %v346_v56 }
 0x125   :  { %v522_v33 = vmul.f32 %v2666_v26, %v344_v18  ;;  %v532_v44 = vmul.f32 %v2639_v54, %v344_v18  ;;  %v345_v28 = vmax.f32 %v301_v19, 0.0  ;;  %v559_v23 = vadd.f32 %v2747_v31, %v495_v49  ;;  %v706_v49 = vld [vmem:[%s3932_s1 + $0x138] sm:$0xff] }
 0x126   :  { %v545_v35 = vadd.f32 %v544_v16, %v543_v48  ;;  %v546_v39 = vmul.f32 %v2646_v62, %v347_v27  ;;  %v549_v37 = vmax.f32 %v346_v56, %v347_v27  ;;  %v700_v48 = vld [vmem:[%s3932_s1 + $0x108] sm:$0xff]  ;;  %v703_v56 = vld [vmem:[%s3932_s1 + $0x120] sm:$0xff] }
 0x127   :  { %v523_v29 = vadd.f32 %v522_v33, %v521_v38  ;;  %v533_v58 = vadd.f32 %v532_v44, %v531_v17  ;;  %v534_v43 = vmul.f32 %v2646_v62, %v345_v28  ;;  %v539_v53 = vmax.f32 %v344_v18, %v345_v28  ;;  %v705_v18 = vld [vmem:[%s3932_s1 + $0x130] sm:$0xff]  ;;  %v707_v16 = vld [vmem:[%s3932_s1 + $0x140] sm:$0xff]  ;;  %v710_v28 = vld [vmem:[%s3932_s1 + $0x158] sm:$0xff] }
 0x128   :  { %v547_v22 = vadd.f32 %v546_v39, %v545_v35  ;;  %v566_v3 = vpack.c.bf16 %v560_v21, %v559_v23  ;;  %v2838_v59 = vmax.f32 %v548_v55, %v549_v37  ;;  %v857_v17 = vpack.c.bf16 %v697_v4, %v696_v10  ;;  %v708_v21 = vld [vmem:[%s3932_s1 + $0x148] sm:$0xff]  ;;  %v709_v33 = vld [vmem:[%s3932_s1 + $0x150] sm:$0xff]  ;;  %v711_v35 = vld [vmem:[%s3932_s1 + $0x160] sm:$0xff] }
 0x129   :  { %v535_v0 = vadd.f32 %v534_v43, %v533_v58  ;;  %v2844_v54 = vmax.f32 %v538_v12, %v539_v53  ;;  %v561_v62 = vadd.f32 %v2747_v31, %v523_v29  ;;  %v698_v12 = vld [vmem:[%s3932_s1 + $0xf8] sm:$0xff]  ;;  %v859_v7 = vpack.c.bf16 %v701_v6, %v700_v48  ;;  %v984_v37 = vld [vmem:[%s3932_s1 + $0x190] sm:$0xff]  ;;  %v986_v29 = vld [vmem:[%s3932_s1 + $0x1a0] sm:$0xff] }
 0x12a   :  { %2169 = vmatmul.mubr.bf16.gmra.mrb[8].mxu1 %v566_v3  ;;  %v563_v26 = vadd.f32 %v2747_v31, %v547_v22  ;;  %v860_v9 = vpack.c.bf16 %v703_v56, %v702_v42  ;;  %v861_v19 = vpack.c.bf16 %v705_v18, %v704_v36  ;;  %v862_v27 = vpack.c.bf16 %v707_v16, %v706_v49  ;;  %v985_v23 = vld [vmem:[%s3932_s1 + $0x198] sm:$0xff]  ;;  %v987_v43 = vld [vmem:[%s3932_s1 + $0x1a8] sm:$0xff]  ;;  %v988_v22 = vld [vmem:[%s3932_s1 + $0x1b0] sm:$0xff] }
 0x12b   :  { %v537_v13 = vadd.f32 %v536_v61, %v535_v0  ;;  %2172 = vmatprep.mubr.msk.bf16.mxu1 %vm2361_vm1, %v2360_v63  ;;  %2181 = vmatpush3.bf16.msra.mxu1 %v857_v17  ;;  %v863_v44 = vpack.c.bf16 %v709_v33, %v708_v21  ;;  %v864_v39 = vpack.c.bf16 %v711_v35, %v710_v28  ;;  %v989_v3 = vld [vmem:[%s3932_s1 + $0x1b8] sm:$0xff]  ;;  %v990_v0 = vld [vmem:[%s3932_s1 + $0x1c0] sm:$0xff] }
 0x12c   :  { %v568_v55 = vpack.c.bf16 %v563_v26, %v563_v26  ;;  %2182 = vmatprep.subr.bf16.mxu1 %v2360_v63  ;;  %v1145_v58 = vpack.c.bf16 %v985_v23, %v984_v37  ;;  %v1146_v53 = vpack.c.bf16 %v987_v43, %v986_v29  ;;  %v1147_v61 = vpack.c.bf16 %v989_v3, %v988_v22 }
 0x12d   :  { %v562_v38 = vadd.f32 %v2747_v31, %v537_v13  ;;  %v699_v31 = vld [vmem:[%s3932_s1 + $0x100] sm:$0xff]  ;;  %v991_v13 = vld [vmem:[%s3932_s1 + $0x1c8] sm:$0xff]  ;;  %v2979_v36 = vrot.slane %v693_v50, %v2630_v47  ;;  %v2984_v49 = vrot.slane %v693_v50, %v2652_v8  ;;  %v2991_v33 = vrot.slane %v693_v50, %v2605_v30 }
 0x12e   :  { %v858_v45 = vpack.c.bf16 %v699_v31, %v698_v12  ;;  %2217 = vmatpush3.bf16.msra.mxu0 %v1145_v58  ;;  %v2996_v28 = vrot.slane %v693_v50, %v2596_v25  ;;  %v3008_v37 = vrot.slane %v693_v50, %v2681_v52 }
 0x12f   :  { %v567_v34 = vpack.c.bf16 %v562_v38, %v561_v62  ;;  %2218 = vmatprep.subr.bf16.mxu0 %v2360_v63  ;;  %v1148_v62 = vpack.c.bf16 %v991_v13, %v990_v0  ;;  %v992_v38 = vld [vmem:[%s3932_s1 + $0x1d0] sm:$0xff] }
 0x130   :  { %2183 = vmatpush3.bf16.msra.mxu1 %v858_v45 }
 0x131   :  { %2184 = vmatprep.subr.bf16.mxu1 %v2360_v63 }
 0x132   :  { %2173 = vmatmul.mubr.bf16.gmra.mrb[12].mxu1 %v567_v34  ;;  %2219 = vmatpush3.bf16.msra.mxu0 %v1146_v53  ;;  %v993_v34 = vld [vmem:[%s3932_s1 + $0x1d8] sm:$0xff] }
 0x133   :  { %2176 = vmatprep.mubr.msk.bf16.mxu1 %vm2361_vm1, %v2360_v63  ;;  %2220 = vmatprep.subr.bf16.mxu0 %v2360_v63  ;;  %v1149_v26 = vpack.c.bf16 %v993_v34, %v992_v38 }
 0x134   :  { %2185 = vmatpush3.bf16.msra.mxu1 %v859_v7  ;;  %v2962_v7 = vld [vmem:[%s3932_s1 + $0xc8] ss:$0 sm:$0xff] }
 0x135   :  { %2186 = vmatprep.subr.bf16.mxu1 %v2360_v63 }
 0x136   :  { %2221 = vmatpush3.bf16.msra.mxu0 %v1147_v61 }
 0x137   :  { %2222 = vmatprep.subr.bf16.mxu0 %v2360_v63 }
 0x138   :  { %2187 = vmatpush3.bf16.msra.mxu1 %v860_v9  ;;  %v2976_v9 = vrot.slane %v693_v50, %v2619_v41 }
 0x139   :  { %2188 = vmatprep.subr.bf16.mxu1 %v2360_v63 }
 0x13a   :  { %2177 = vmatmul.mubr.bf16.gmra.mrb[16].mxu1 %v568_v55  ;;  %2223 = vmatpush3.bf16.msra.mxu0 %v1148_v62  ;;  %v2949_v55 = vld [vmem:[%s3932_s1 + $0xc0] ss:$0 sm:$0xff] }
 0x13b   :  { %2196 = vmatprep.mubr.msk.bf16.mxu1 %vm2361_vm1, %v2360_v63  ;;  %2224 = vmatprep.subr.bf16.mxu0 %v2360_v63 }
 0x13c   :  { %2189 = vmatpush3.bf16.msra.mxu1 %v861_v19 }
 0x13d   :  { %2190 = vmatprep.subr.bf16.mxu1 %v2360_v63 }
 0x13e   :  { %2225 = vmatpush3.bf16.msra.mxu0 %v1149_v26 }
 0x13f   :  { %2226 = vmatprep.subr.bf16.mxu0 %v2360_v63 }
 0x140   :  { %2191 = vmatpush3.bf16.msra.mxu1 %v862_v27 }
 0x141   :  { %2192 = vmatprep.subr.bf16.mxu1 %v2360_v63 }
 0x144   :  { %2193 = vmatpush3.bf16.msra.mxu1 %v863_v44 }
 0x145   :  { %2194 = vmatprep.subr.bf16.mxu1 %v2360_v63 }
 0x148   :  { %2195 = vmatpush3.bf16.msra.mxu1 %v864_v39 }
 0x149   :  { %2252 = vmatprep.subr.bf16.mxu1 %v2360_v63 }
 0x1e1   :  { %v615_v10 = vpop.f32.mrb[0].mxu1 }
 0x1e2   :  { %v616_v4 = vadd.f32 %v2949_v55, %v615_v10  ;;  %v2162_v12 = vpop.f32.mrb[1].mxu1 }
 0x1e3   :  { %v618_v17 = vpop.f32.mrb[2].mxu1 }
 0x1e4   :  { %v653_v31 = vadd.f32 %v616_v4, %v424_v20  ;;  %v619_v45 = vadd.f32 %v2949_v55, %v618_v17  ;;  %v2163_v48 = vpop.f32.mrb[3].mxu1 }
 0x1e6   :  { %v654_v6 = vadd.f32 %v619_v45, %v444_v5  ;;  %v675_v56 = vmul.f32 %v2962_v7, %v653_v31  ;;  %vm662_vm3 = vcmp.ge.f32.partialorder %v653_v31, 0.0  ;;  %v2973_v5 = vrot.slane %v693_v50, %v2593_v24 }
 0x1e8   :  { %v676_v42 = vmul.f32 %v2962_v7, %v654_v6  ;;  %vm663_vm2 = vcmp.ge.f32.partialorder %v654_v6, 0.0  ;;  %v2981_v19 = vsel %vm662_vm3, %v653_v31, %v675_v56 }
 0x1e9   :  { %v750_v15 = vmul.f32 %v2973_v5, %v2981_v19  ;;  %v752_v51 = vmul.f32 %v2976_v9, %v2981_v19  ;;  %v751_v61 = vmul.f32 %v2996_v28, %v2981_v19  ;;  %v753_v0 = vmul.f32 %v2979_v36, %v2981_v19 }
 0x1ea   :  { %v2969_v20 = vsel %vm663_vm2, %v654_v6, %v676_v42 }
 0x1eb   :  { %v760_v44 = vmul.f32 %v2979_v36, %v2969_v20  ;;  %v762_v23 = vmul.f32 %v2984_v49, %v2969_v20  ;;  %v755_v58 = vmul.f32 %v2996_v28, %v2969_v20  ;;  %v757_v3 = vmul.f32 %v2991_v33, %v2969_v20 }
 0x1ec   :  { %v754_v34 = vmul.f32 %v2973_v5, %v2969_v20  ;;  %v759_v12 = vmul.f32 %v2976_v9, %v2969_v20 }
 0x1ed   :  { %v761_v43 = vadd.f32 %v760_v44, %v752_v51  ;;  %v756_v42 = vadd.f32 %v755_v58, %v750_v15 }
 0x1f5   :  { %v623_v11 = vpop.f32.mrb[4].mxu1 }
 0x1f6   :  { %v624_v46 = vadd.f32 %v2949_v55, %v623_v11  ;;  %v2166_v57 = vpop.f32.mrb[5].mxu1  ;;  %v758_v11 = vadd.f32 %v757_v3, %v751_v61 }
 0x1f7   :  { %v626_v18 = vpop.f32.mrb[6].mxu1 }
 0x1f8   :  { %v655_v16 = vadd.f32 %v624_v46, %v458_v1  ;;  %v627_v27 = vadd.f32 %v2949_v55, %v626_v18  ;;  %v2167_v21 = vpop.f32.mrb[7].mxu1  ;;  %v3005_v1 = vrot.slane %v693_v50, %v2673_v40  ;;  %v763_v50 = vadd.f32 %v762_v23, %v753_v0 }
 0x1fa   :  { %vm664_vm4 = vcmp.ge.f32.partialorder %v655_v16, 0.0  ;;  %v677_v35 = vmul.f32 %v2962_v7, %v655_v16  ;;  %v656_v39 = vadd.f32 %v627_v27, %v2759_v14 }
 0x1fc   :  { %v3012_v29 = vsel %vm664_vm4, %v655_v16, %v677_v35  ;;  %vm665_vm5 = vcmp.ge.f32.partialorder %v656_v39, 0.0  ;;  %v678_v14 = vmul.f32 %v2962_v7, %v656_v39 }
 0x1fd   :  { %v770_v53 = vmul.f32 %v2984_v49, %v3012_v29  ;;  %v631_v22 = vpop.f32.mrb[8].mxu1  ;;  %v766_v26 = vmul.f32 %v2991_v33, %v3012_v29  ;;  %v764_v56 = vmul.f32 %v2996_v28, %v3012_v29  ;;  %v768_v46 = vmul.f32 %v2979_v36, %v3012_v29 }
 0x1fe   :  { %v3025_v13 = vsel %vm665_vm5, %v656_v39, %v678_v14  ;;  %v632_v62 = vadd.f32 %v2949_v55, %v631_v22  ;;  %v2170_v38 = vpop.f32.mrb[9].mxu1 }
 0x1ff   :  { %v771_v10 = vadd.f32 %v770_v53, %v761_v43  ;;  %v634_v4 = vpop.f32.mrb[10].mxu1  ;;  %v778_v17 = vmul.f32 %v3005_v1, %v3025_v13  ;;  %v780_v31 = vmul.f32 %v3008_v37, %v3025_v13  ;;  %v767_v16 = vadd.f32 %v766_v26, %v756_v42 }
 0x200   :  { %v657_v45 = vadd.f32 %v632_v62, %v2777_v60  ;;  %v635_v48 = vadd.f32 %v2949_v55, %v634_v4  ;;  %v2171_v6 = vpop.f32.mrb[11].mxu1  ;;  %v3049_v60 = vld [vmem:[%s3932_s1 + $0xd8] ss:$0 sm:$0xff]  ;;  %v774_v27 = vmul.f32 %v2976_v9, %v3025_v13  ;;  %v776_v44 = vmul.f32 %v2979_v36, %v3025_v13 }
 0x201   :  { %v779_v21 = vadd.f32 %v778_v17, %v771_v10  ;;  %v781_v15 = vadd.f32 %v780_v31, %v763_v50  ;;  %v769_v3 = vadd.f32 %v768_v46, %v759_v12  ;;  %v765_v6 = vadd.f32 %v764_v56, %v754_v34 }
 0x202   :  { %vm666_vm6 = vcmp.ge.f32.partialorder %v657_v45, 0.0  ;;  %v679_v57 = vmul.f32 %v2962_v7, %v657_v45  ;;  %v658_v18 = vadd.f32 %v635_v48, %v2770_v2  ;;  %v777_v10 = vadd.f32 %v776_v44, %v758_v11 }
 0x203   :  { %v775_v12 = vadd.f32 %v774_v27, %v767_v16 }
 0x204   :  { %v3055_v35 = vsel %vm666_vm6, %v657_v45, %v679_v57  ;;  %vm667_vm7 = vcmp.ge.f32.partialorder %v658_v18, 0.0  ;;  %v680_v39 = vmul.f32 %v2962_v7, %v658_v18  ;;  %v3078_v45 = vld [vmem:[%s3932_s1 + $0xe0] ss:$0 sm:$0xff] }
 0x205   :  { %v639_v2 = vpop.f32.mrb[12].mxu1  ;;  %v795_v51 = vmul.f32 %v3008_v37, %v3055_v35  ;;  %v797_v23 = vmul.f32 %v3049_v60, %v3055_v35  ;;  %v791_v14 = vmul.f32 %v2984_v49, %v3055_v35  ;;  %v793_v58 = vmul.f32 %v3005_v1, %v3055_v35 }
 0x206   :  { %v3066_v43 = vsel %vm667_vm7, %v658_v18, %v680_v39  ;;  %v640_v53 = vadd.f32 %v2949_v55, %v639_v2  ;;  %v2174_v22 = vpop.f32.mrb[13].mxu1  ;;  %v789_v61 = vmul.f32 %v2979_v36, %v3055_v35  ;;  %v787_v48 = vmul.f32 %v2976_v9, %v3055_v35 }
 0x207   :  { %v642_v0 = vpop.f32.mrb[14].mxu1  ;;  %v796_v62 = vadd.f32 %v795_v51, %v779_v21  ;;  %v798_v38 = vadd.f32 %v797_v23, %v781_v15  ;;  %v809_v26 = vmul.f32 %v3049_v60, %v3066_v43  ;;  %v792_v50 = vadd.f32 %v791_v14, %v777_v10 }
 0x208   :  { %v659_v4 = vadd.f32 %v640_v53, %v2826_v32  ;;  %v643_v17 = vadd.f32 %v2949_v55, %v642_v0  ;;  %v2175_v31 = vpop.f32.mrb[15].mxu1  ;;  %v794_v46 = vadd.f32 %v793_v58, %v769_v3  ;;  %v790_v57 = vadd.f32 %v789_v61, %v775_v12 }
 0x209   :  { %v810_v42 = vadd.f32 %v809_v26, %v796_v62  ;;  %v843_v18 = vadd.f32 %v3078_v45, %v798_v38  ;;  %v807_v16 = vmul.f32 %v3008_v37, %v3066_v43  ;;  %v805_v27 = vmul.f32 %v2984_v49, %v3066_v43 }
 0x20a   :  { %vm668_vm8 = vcmp.ge.f32.partialorder %v659_v4, 0.0  ;;  %v681_v11 = vmul.f32 %v2962_v7, %v659_v4  ;;  %v660_v32 = vadd.f32 %v643_v17, %v2844_v54  ;;  %v788_v44 = vadd.f32 %v787_v48, %v765_v6 }
 0x20b   :  { %v844_v21 = vadd.f32 %v3078_v45, %v810_v42  ;;  %v783_v51 = vmul.f32 %v2996_v28, %v3055_v35  ;;  %v803_v53 = vmul.f32 %v2979_v36, %v3066_v43  ;;  %v806_v22 = vadd.f32 %v805_v27, %v790_v57 }
 0x20c   :  { %v3090_v34 = vsel %vm668_vm8, %v659_v4, %v681_v11  ;;  %vm669_vm9 = vcmp.ge.f32.partialorder %v660_v32, 0.0  ;;  %v682_v56 = vmul.f32 %v2962_v7, %v660_v32  ;;  %v808_v61 = vadd.f32 %v807_v16, %v794_v46 }
 0x20d   :  { %v815_v54 = vmul.f32 %v3005_v1, %v3090_v34  ;;  %v647_v39 = vpop.f32.mrb[16].mxu1  ;;  %v852_v15 = vpack.c.bf16 %v844_v21, %v843_v18  ;;  %v817_v2 = vmul.f32 %v3008_v37, %v3090_v34  ;;  %v772_v38 = vmul.f32 %v2973_v5, %v3025_v13 }
 0x20e   :  { %v3099_v23 = vsel %vm669_vm9, %v660_v32, %v682_v56  ;;  %v648_v14 = vadd.f32 %v2949_v55, %v647_v39  ;;  %v2178_v58 = vpop.f32.mrb[17].mxu1  ;;  %v801_v48 = vmul.f32 %v2991_v33, %v3066_v43  ;;  %v811_v42 = vmul.f32 %v2976_v9, %v3090_v34 }
 0x20f   :  { %v650_v3 = vpop.f32.mrb[18].mxu1  ;;  %2197 = vmatmul.mubr.bf16.vlgmr.msra.gmra.mrb[20].mxu1 %v852_v15  ;;  %v818_v0 = vadd.f32 %v817_v2, %v792_v50  ;;  %v829_v62 = vmul.f32 %v3049_v60, %v3099_v23  ;;  %v816_v55 = vadd.f32 %v815_v54, %v806_v22  ;;  %v825_v4 = vmul.f32 %v3005_v1, %v3099_v23 }
 0x210   :  { %v661_v26 = vadd.f32 %v648_v14, %v2838_v59  ;;  %v2179_v10 = vpop.f32.mrb[19].mxu1  ;;  %2200 = vmatprep.mubr.msk.bf16.mxu1 %vm2361_vm1, %v2360_v63  ;;  %v827_v17 = vmul.f32 %v3008_v37, %v3099_v23  ;;  %v784_v12 = vadd.f32 %v783_v51, %v772_v38  ;;  %v804_v59 = vadd.f32 %v803_v53, %v788_v44 }
 0x211   :  { %v830_v31 = vadd.f32 %v829_v62, %v818_v0  ;;  %v845_v50 = vadd.f32 %v3078_v45, %v808_v61  ;;  %v785_v57 = vmul.f32 %v2991_v33, %v3055_v35  ;;  %v773_v27 = vmul.f32 %v2996_v28, %v3025_v13 }
 0x212   :  { %vm670_vm10 = vcmp.ge.f32.partialorder %v661_v26, 0.0  ;;  %v683_v6 = vmul.f32 %v2962_v7, %v661_v26  ;;  %v826_v11 = vadd.f32 %v825_v4, %v804_v59  ;;  %v828_v32 = vadd.f32 %v827_v17, %v816_v55  ;;  %v995_v17 = vld [vmem:[%s3932_s1 + $0x1e8] sm:$0xff] }
 0x213   :  { %v846_v46 = vadd.f32 %v3078_v45, %v830_v31  ;;  %v802_v16 = vadd.f32 %v801_v48, %v784_v12  ;;  %v813_v56 = vmul.f32 %v2979_v36, %v3090_v34  ;;  %v821_v33 = vmul.f32 %v2979_v36, %v3099_v23  ;;  %v997_v12 = vld [vmem:[%s3932_s1 + $0x1f8] sm:$0xff]  ;;  %v999_v59 = vld [vmem:[%s3932_s1 + $0x208] sm:$0xff] }
 0x214   :  { %v3122_v1 = vsel %vm670_vm10, %v661_v26, %v683_v6  ;;  %v786_v15 = vadd.f32 %v785_v57, %v773_v27  ;;  %v823_v58 = vmul.f32 %v2984_v49, %v3099_v23  ;;  %v799_v3 = vmul.f32 %v2996_v28, %v3066_v43  ;;  %v998_v6 = vld [vmem:[%s3932_s1 + $0x200] sm:$0xff]  ;;  %v1272_v57 = vld [vmem:[%s3934_s2 + $0x18] sm:$0xff]  ;;  %v1275_v27 = vld [vmem:[%s3934_s2 + $0x30] sm:$0xff] }
 0x215   :  { %v853_v18 = vpack.c.bf16 %v846_v46, %v845_v50  ;;  %v835_v21 = vmul.f32 %v3008_v37, %v3122_v1  ;;  %v837_v7 = vmul.f32 %v3049_v60, %v3122_v1  ;;  %v812_v39 = vadd.f32 %v811_v42, %v802_v16  ;;  %v1269_v50 = vld [vmem:[%s3934_s2] sm:$0xff]  ;;  %v1270_v46 = vld [vmem:[%s3934_s2 + $0x8] sm:$0xff] }
 0x216   :  { %v833_v2 = vmul.f32 %v2984_v49, %v3122_v1  ;;  %v814_v51 = vadd.f32 %v813_v56, %v786_v15  ;;  %v782_v0 = vmul.f32 %v2973_v5, %v3055_v35  ;;  %v819_v62 = vmul.f32 %v2976_v9, %v3099_v23  ;;  %v1276_v56 = vld [vmem:[%s3934_s2 + $0x38] sm:$0xff] }
 0x217   :  { %2201 = vmatmul.mubr.bf16.gmra.mrb[24].mxu1 %v853_v18  ;;  %v836_v44 = vadd.f32 %v835_v21, %v826_v11  ;;  %v838_v54 = vadd.f32 %v837_v7, %v828_v32  ;;  %v822_v14 = vadd.f32 %v821_v33, %v812_v39  ;;  %v831_v49 = vmul.f32 %v2979_v36, %v3122_v1  ;;  %v994_v36 = vld [vmem:[%s3932_s1 + $0x1e0] sm:$0xff]  ;;  %v1271_v11 = vld [vmem:[%s3934_s2 + $0x10] sm:$0xff]  ;;  %v1274_v7 = vld [vmem:[%s3934_s2 + $0x28] sm:$0xff] }
 0x218   :  { %2204 = vmatprep.mubr.msk.bf16.mxu1 %vm2361_vm1, %v2360_v63  ;;  %v824_v61 = vadd.f32 %v823_v58, %v814_v51  ;;  %v800_v26 = vadd.f32 %v799_v3, %v782_v0  ;;  %v1150_v31 = vpack.c.bf16 %v995_v17, %v994_v36  ;;  %v1152_v42 = vpack.c.bf16 %v999_v59, %v998_v6  ;;  %v1273_v21 = vld [vmem:[%s3934_s2 + $0x20] sm:$0xff]  ;;  %v1278_v39 = vld [vmem:[%s3934_s2 + $0x48] sm:$0xff]  ;;  %v3235_v0 = vld [vmem:[%s3932_s1 + $0x170] ss:$0 sm:$0xff] }
 0x219   :  { %v847_v37 = vadd.f32 %v3078_v45, %v838_v54  ;;  %v848_v60 = vadd.f32 %v3078_v45, %v836_v44  ;;  %v834_v22 = vadd.f32 %v833_v2, %v822_v14  ;;  %v1290_v32 = vpack.c.bf16 %v1270_v46, %v1269_v50  ;;  %v1277_v54 = vld [vmem:[%s3934_s2 + $0x40] sm:$0xff]  ;;  %v3227_v2 = vld [vmem:[%s3932_s1 + $0x168] ss:$0 sm:$0xff] }
 0x21a   :  { %v849_v10 = vadd.f32 %v3078_v45, %v824_v61  ;;  %v820_v28 = vadd.f32 %v819_v62, %v800_v26  ;;  %2227 = vmatpush3.bf16.msra.mxu0 %v1150_v31  ;;  %v1291_v18 = vpack.c.bf16 %v1272_v57, %v1271_v11  ;;  %v1292_v16 = vpack.c.bf16 %v1274_v7, %v1273_v21  ;;  %v981_v26 = vld [vmem:[%s3932_s1 + $0x178] sm:$0xff] }
 0x21b   :  { %v854_v53 = vpack.c.bf16 %v848_v60, %v847_v37  ;;  %v850_v38 = vadd.f32 %v3078_v45, %v834_v22  ;;  %2228 = vmatprep.subr.bf16.mxu0 %v2360_v63  ;;  %2253 = vmatpush3.bf16.msra.mxu1 %v1290_v32  ;;  %v1293_v44 = vpack.c.bf16 %v1276_v56, %v1275_v27  ;;  %v1279_v37 = vld [vmem:[%s3934_s2 + $0x50] sm:$0xff]  ;;  %v1280_v60 = vld [vmem:[%s3934_s2 + $0x58] sm:$0xff] }
 0x21c   :  { %v832_v4 = vadd.f32 %v831_v49, %v820_v28  ;;  %2254 = vmatprep.subr.bf16.mxu1 %v2360_v63  ;;  %v1294_v33 = vpack.c.bf16 %v1278_v39, %v1277_v54  ;;  %v1295_v15 = vpack.c.bf16 %v1280_v60, %v1279_v37  ;;  %v3258_v17 = vrot.slane %v981_v26, %v2652_v8 }
 0x21d   :  { %v855_v55 = vpack.c.bf16 %v850_v38, %v849_v10  ;;  %v3268_v59 = vrot.slane %v981_v26, %v2596_v25  ;;  %v3277_v11 = vrot.slane %v981_v26, %v2673_v40  ;;  %v3280_v32 = vrot.slane %v981_v26, %v2681_v52 }
 0x21e   :  { %v851_v5 = vadd.f32 %v3078_v45, %v832_v4  ;;  %v996_v45 = vld [vmem:[%s3932_s1 + $0x1f0] sm:$0xff]  ;;  %v3247_v4 = vrot.slane %v981_v26, %v2593_v24 }
 0x21f   :  { %2205 = vmatmul.mubr.bf16.gmra.mrb[28].mxu1 %v854_v53  ;;  %v1151_v48 = vpack.c.bf16 %v997_v12, %v996_v45 }
 0x220   :  { %2208 = vmatprep.mubr.msk.bf16.mxu1 %vm2361_vm1, %v2360_v63  ;;  %v856_v9 = vpack.c.bf16 %v851_v5, %v851_v5  ;;  %2255 = vmatpush3.bf16.msra.mxu1 %v1291_v18  ;;  %v3253_v5 = vrot.slane %v981_v26, %v2630_v47 }
 0x221   :  { %2229 = vmatpush3.bf16.msra.mxu0 %v1151_v48  ;;  %2256 = vmatprep.subr.bf16.mxu1 %v2360_v63  ;;  %v3263_v48 = vrot.slane %v981_v26, %v2605_v30 }
 0x222   :  { %2230 = vmatprep.subr.bf16.mxu0 %v2360_v63 }
 0x224   :  { %2257 = vmatpush3.bf16.msra.mxu1 %v1292_v16 }
 0x225   :  { %2231 = vmatpush3.bf16.msra.mxu0 %v1152_v42  ;;  %2258 = vmatprep.subr.bf16.mxu1 %v2360_v63 }
 0x226   :  { %2288 = vmatprep.subr.bf16.mxu0 %v2360_v63 }
 0x227   :  { %2209 = vmatmul.mubr.bf16.gmra.mrb[32].mxu1 %v855_v55 }
 0x228   :  { %2212 = vmatprep.mubr.msk.bf16.mxu1 %vm2361_vm1, %v2360_v63  ;;  %2259 = vmatpush3.bf16.msra.mxu1 %v1293_v44 }
 0x229   :  { %2260 = vmatprep.subr.bf16.mxu1 %v2360_v63 }
 0x22c   :  { %2261 = vmatpush3.bf16.msra.mxu1 %v1294_v33 }
 0x22d   :  { %2262 = vmatprep.subr.bf16.mxu1 %v2360_v63 }
 0x22f   :  { %2213 = vmatmul.mubr.bf16.gmra.mrb[36].mxu1 %v856_v9 }
 0x230   :  { %2268 = vmatprep.mubr.msk.bf16.mxu1 %vm2361_vm1, %v2360_v63  ;;  %2263 = vmatpush3.bf16.msra.mxu1 %v1295_v15 }
 0x231   :  { %2264 = vmatprep.subr.bf16.mxu1 %v2360_v63 }
 0x2e2   :  { %v903_v51 = vpop.f32.mrb[20].mxu1 }
 0x2e3   :  { %v904_v14 = vadd.f32 %v3227_v2, %v903_v51  ;;  %v2198_v58 = vpop.f32.mrb[21].mxu1 }
 0x2e4   :  { %v906_v53 = vpop.f32.mrb[22].mxu1 }
 0x2e5   :  { %v941_v22 = vadd.f32 %v904_v14, %v2981_v19  ;;  %v907_v3 = vadd.f32 %v3227_v2, %v906_v53  ;;  %v2199_v61 = vpop.f32.mrb[23].mxu1 }
 0x2e7   :  { %v942_v62 = vadd.f32 %v907_v3, %v2969_v20  ;;  %v963_v38 = vmul.f32 %v3235_v0, %v941_v22  ;;  %vm950_vm12 = vcmp.ge.f32.partialorder %v941_v22, 0.0  ;;  %v3250_v20 = vrot.slane %v981_v26, %v2619_v41 }
 0x2e9   :  { %vm951_vm11 = vcmp.ge.f32.partialorder %v942_v62, 0.0  ;;  %v964_v49 = vmul.f32 %v3235_v0, %v942_v62  ;;  %v3255_v36 = vsel %vm950_vm12, %v941_v22, %v963_v38 }
 0x2ea   :  { %v911_v19 = vpop.f32.mrb[24].mxu1  ;;  %v1040_v46 = vmul.f32 %v3250_v20, %v3255_v36  ;;  %v1039_v44 = vmul.f32 %v3268_v59, %v3255_v36  ;;  %v1041_v54 = vmul.f32 %v3253_v5, %v3255_v36 }
 0x2eb   :  { %v3243_v10 = vsel %vm951_vm11, %v942_v62, %v964_v49  ;;  %v912_v28 = vadd.f32 %v3227_v2, %v911_v19  ;;  %v2202_v55 = vpop.f32.mrb[25].mxu1 }
 0x2ec   :  { %v914_v9 = vpop.f32.mrb[26].mxu1  ;;  %v1048_v6 = vmul.f32 %v3253_v5, %v3243_v10  ;;  %v1050_v57 = vmul.f32 %v3258_v17, %v3243_v10  ;;  %v1043_v21 = vmul.f32 %v3268_v59, %v3243_v10  ;;  %v1045_v56 = vmul.f32 %v3263_v48, %v3243_v10 }
 0x2ed   :  { %v943_v31 = vadd.f32 %v912_v28, %v3012_v29  ;;  %v915_v45 = vadd.f32 %v3227_v2, %v914_v9  ;;  %v2203_v12 = vpop.f32.mrb[27].mxu1  ;;  %v1038_v29 = vmul.f32 %v3247_v4, %v3255_v36  ;;  %v1042_v60 = vmul.f32 %v3247_v4, %v3243_v10 }
 0x2ee   :  { %v1049_v7 = vadd.f32 %v1048_v6, %v1040_v46  ;;  %v1047_v58 = vmul.f32 %v3250_v20, %v3243_v10  ;;  %v1051_v49 = vadd.f32 %v1050_v57, %v1041_v54  ;;  %v1046_v19 = vadd.f32 %v1045_v56, %v1039_v44 }
 0x2ef   :  { %vm952_vm13 = vcmp.ge.f32.partialorder %v943_v31, 0.0  ;;  %v965_v42 = vmul.f32 %v3235_v0, %v943_v31  ;;  %v944_v50 = vadd.f32 %v915_v45, %v3025_v13  ;;  %v1044_v38 = vadd.f32 %v1043_v21, %v1038_v29 }
 0x2f1   :  { %v3284_v18 = vsel %vm952_vm13, %v943_v31, %v965_v42  ;;  %vm953_vm14 = vcmp.ge.f32.partialorder %v944_v50, 0.0  ;;  %v966_v13 = vmul.f32 %v3235_v0, %v944_v50 }
 0x2f2   :  { %v1058_v16 = vmul.f32 %v3258_v17, %v3284_v18  ;;  %v919_v27 = vpop.f32.mrb[28].mxu1  ;;  %v1054_v15 = vmul.f32 %v3263_v48, %v3284_v18  ;;  %v1052_v26 = vmul.f32 %v3268_v59, %v3284_v18  ;;  %v1056_v28 = vmul.f32 %v3253_v5, %v3284_v18 }
 0x2f3   :  { %v3297_v39 = vsel %vm953_vm14, %v944_v50, %v966_v13  ;;  %v920_v33 = vadd.f32 %v3227_v2, %v919_v27  ;;  %v2206_v37 = vpop.f32.mrb[29].mxu1 }
 0x2f4   :  { %v1059_v51 = vadd.f32 %v1058_v16, %v1049_v7  ;;  %v922_v14 = vpop.f32.mrb[30].mxu1  ;;  %v1066_v53 = vmul.f32 %v3277_v11, %v3297_v39  ;;  %v1068_v22 = vmul.f32 %v3280_v32, %v3297_v39  ;;  %v1055_v31 = vadd.f32 %v1054_v15, %v1044_v38 }
 0x2f5   :  { %v945_v3 = vadd.f32 %v920_v33, %v3055_v35  ;;  %v923_v61 = vadd.f32 %v3227_v2, %v922_v14  ;;  %v2207_v62 = vpop.f32.mrb[31].mxu1  ;;  %v3321_v35 = vld [vmem:[%s3932_s1 + $0x180] ss:$0 sm:$0xff]  ;;  %v1062_v45 = vmul.f32 %v3250_v20, %v3297_v39  ;;  %v1064_v6 = vmul.f32 %v3253_v5, %v3297_v39 }
 0x2f6   :  { %v1067_v12 = vadd.f32 %v1066_v53, %v1059_v51  ;;  %v1069_v29 = vadd.f32 %v1068_v22, %v1051_v49  ;;  %v1057_v56 = vadd.f32 %v1056_v28, %v1047_v58  ;;  %v1053_v62 = vadd.f32 %v1052_v26, %v1042_v60 }
 0x2f7   :  { %vm954_vm15 = vcmp.ge.f32.partialorder %v945_v3, 0.0  ;;  %v967_v55 = vmul.f32 %v3235_v0, %v945_v3  ;;  %v946_v9 = vadd.f32 %v923_v61, %v3066_v43  ;;  %v1065_v51 = vadd.f32 %v1064_v6, %v1046_v19 }
 0x2f8   :  { %v1063_v58 = vadd.f32 %v1062_v45, %v1055_v31 }
 0x2f9   :  { %v3327_v42 = vsel %vm954_vm15, %v945_v3, %v967_v55  ;;  %vm955_vm2 = vcmp.ge.f32.partialorder %v946_v9, 0.0  ;;  %v968_v50 = vmul.f32 %v3235_v0, %v946_v9  ;;  %v3350_v3 = vld [vmem:[%s3932_s1 + $0x188] ss:$0 sm:$0xff] }
 0x2fa   :  { %v927_v43 = vpop.f32.mrb[32].mxu1  ;;  %v1083_v46 = vmul.f32 %v3280_v32, %v3327_v42  ;;  %v1085_v57 = vmul.f32 %v3321_v35, %v3327_v42  ;;  %v1079_v13 = vmul.f32 %v3258_v17, %v3327_v42  ;;  %v1081_v21 = vmul.f32 %v3277_v11, %v3327_v42 }
 0x2fb   :  { %v3338_v7 = vsel %vm955_vm2, %v946_v9, %v968_v50  ;;  %v928_v16 = vadd.f32 %v3227_v2, %v927_v43  ;;  %v2210_v27 = vpop.f32.mrb[33].mxu1  ;;  %v1077_v44 = vmul.f32 %v3253_v5, %v3327_v42  ;;  %v1075_v61 = vmul.f32 %v3250_v20, %v3327_v42 }
 0x2fc   :  { %v930_v54 = vpop.f32.mrb[34].mxu1  ;;  %v1084_v33 = vadd.f32 %v1083_v46, %v1067_v12  ;;  %v1086_v37 = vadd.f32 %v1085_v57, %v1069_v29  ;;  %v1097_v15 = vmul.f32 %v3321_v35, %v3338_v7  ;;  %v1080_v49 = vadd.f32 %v1079_v13, %v1065_v51 }
 0x2fd   :  { %v947_v14 = vadd.f32 %v928_v16, %v3090_v34  ;;  %v931_v53 = vadd.f32 %v3227_v2, %v930_v54  ;;  %v2211_v22 = vpop.f32.mrb[35].mxu1  ;;  %v1082_v28 = vadd.f32 %v1081_v21, %v1057_v56  ;;  %v1078_v55 = vadd.f32 %v1077_v44, %v1063_v58 }
 0x2fe   :  { %v1098_v38 = vadd.f32 %v1097_v15, %v1084_v33  ;;  %v1131_v9 = vadd.f32 %v3350_v3, %v1086_v37  ;;  %v1095_v31 = vmul.f32 %v3280_v32, %v3338_v7  ;;  %v1093_v45 = vmul.f32 %v3258_v17, %v3338_v7 }
 0x2ff   :  { %vm956_vm3 = vcmp.ge.f32.partialorder %v947_v14, 0.0  ;;  %v969_v19 = vmul.f32 %v3235_v0, %v947_v14  ;;  %v948_v34 = vadd.f32 %v931_v53, %v3099_v23  ;;  %v1076_v6 = vadd.f32 %v1075_v61, %v1053_v62 }
 0x300   :  { %v1132_v12 = vadd.f32 %v3350_v3, %v1098_v38  ;;  %v1071_v46 = vmul.f32 %v3268_v59, %v3327_v42  ;;  %v1091_v16 = vmul.f32 %v3253_v5, %v3338_v7  ;;  %v1094_v27 = vadd.f32 %v1093_v45, %v1078_v55 }
 0x301   :  { %v3362_v60 = vsel %vm956_vm3, %v947_v14, %v969_v19  ;;  %vm957_vm4 = vcmp.ge.f32.partialorder %v948_v34, 0.0  ;;  %v970_v26 = vmul.f32 %v3235_v0, %v948_v34  ;;  %v1096_v44 = vadd.f32 %v1095_v31, %v1082_v28 }
 0x302   :  { %v1103_v23 = vmul.f32 %v3277_v11, %v3362_v60  ;;  %v935_v50 = vpop.f32.mrb[36].mxu1  ;;  %v1140_v29 = vpack.c.bf16 %v1132_v12, %v1131_v9  ;;  %v1105_v43 = vmul.f32 %v3280_v32, %v3362_v60  ;;  %v1060_v37 = vmul.f32 %v3247_v4, %v3297_v39 }
 0x303   :  { %v3371_v57 = vsel %vm957_vm4, %v948_v34, %v970_v26  ;;  %v936_v13 = vadd.f32 %v3227_v2, %v935_v50  ;;  %v2214_v21 = vpop.f32.mrb[37].mxu1  ;;  %v1089_v61 = vmul.f32 %v3263_v48, %v3338_v7  ;;  %v1099_v38 = vmul.f32 %v3250_v20, %v3362_v60 }
 0x304   :  { %v938_v56 = vpop.f32.mrb[38].mxu1  ;;  %2233 = vmatmul.mubr.bf16.vlgmr.msra.gmra.mrb[36].mxu0 %v1140_v29  ;;  %v1106_v54 = vadd.f32 %v1105_v43, %v1080_v49  ;;  %v1117_v33 = vmul.f32 %v3321_v35, %v3371_v57  ;;  %v1104_v2 = vadd.f32 %v1103_v23, %v1094_v27  ;;  %v1113_v14 = vmul.f32 %v3277_v11, %v3371_v57 }
 0x305   :  { %v949_v15 = vadd.f32 %v936_v13, %v3122_v1  ;;  %v2215_v51 = vpop.f32.mrb[39].mxu1  ;;  %2236 = vmatprep.mubr.msk.bf16.mxu0 %vm2361_vm1, %v2360_v63  ;;  %v1115_v53 = vmul.f32 %v3280_v32, %v3371_v57  ;;  %v1072_v58 = vadd.f32 %v1071_v46, %v1060_v37  ;;  %v1092_v1 = vadd.f32 %v1091_v16, %v1076_v6 }
 0x306   :  { %v1118_v22 = vadd.f32 %v1117_v33, %v1106_v54  ;;  %v1133_v49 = vadd.f32 %v3350_v3, %v1096_v44  ;;  %v1073_v55 = vmul.f32 %v3263_v48, %v3327_v42  ;;  %v1061_v45 = vmul.f32 %v3268_v59, %v3297_v39 }
 0x307   :  { %vm958_vm5 = vcmp.ge.f32.partialorder %v949_v15, 0.0  ;;  %v971_v62 = vmul.f32 %v3235_v0, %v949_v15  ;;  %v1114_v19 = vadd.f32 %v1113_v14, %v1092_v1  ;;  %v1116_v34 = vadd.f32 %v1115_v53, %v1104_v2  ;;  %v1282_v53 = vld [vmem:[%s3934_s2 + $0x68] sm:$0xff]  ;;  %v1411_v1 = vld [vmem:[%s3934_s2 + $0xb0] sm:$0xff] }
 0x308   :  { %v1134_v28 = vadd.f32 %v3350_v3, %v1118_v22  ;;  %v1090_v31 = vadd.f32 %v1089_v61, %v1072_v58  ;;  %v1101_v26 = vmul.f32 %v3253_v5, %v3362_v60  ;;  %v1109_v48 = vmul.f32 %v3253_v5, %v3371_v57  ;;  %v1283_v22 = vld [vmem:[%s3934_s2 + $0x70] sm:$0xff] }
 0x309   :  { %v3394_v11 = vsel %vm958_vm5, %v949_v15, %v971_v62  ;;  %v1074_v29 = vadd.f32 %v1073_v55, %v1061_v45  ;;  %v1111_v21 = vmul.f32 %v3258_v17, %v3371_v57  ;;  %v1087_v56 = vmul.f32 %v3268_v59, %v3338_v7  ;;  %v1410_v62 = vld [vmem:[%s3934_s2 + $0xa8] sm:$0xff]  ;;  %v3463_v55 = vld [vmem:[%s3932_s1 + $0x218] ss:$0 sm:$0xff] }
 0x30a   :  { %v1141_v9 = vpack.c.bf16 %v1134_v28, %v1133_v49  ;;  %v1123_v12 = vmul.f32 %v3280_v32, %v3394_v11  ;;  %v1125_v0 = vmul.f32 %v3321_v35, %v3394_v11  ;;  %v1100_v50 = vadd.f32 %v1099_v38, %v1090_v31  ;;  %v3457_v49 = vld [vmem:[%s3932_s1 + $0x210] ss:$0 sm:$0xff] }
 0x30b   :  { %v1121_v43 = vmul.f32 %v3258_v17, %v3394_v11  ;;  %v1102_v46 = vadd.f32 %v1101_v26, %v1074_v29  ;;  %v1070_v54 = vmul.f32 %v3247_v4, %v3327_v42  ;;  %v1107_v33 = vmul.f32 %v3250_v20, %v3371_v57 }
 0x30c   :  { %2237 = vmatmul.mubr.bf16.gmra.mrb[40].mxu0 %v1141_v9  ;;  %v1124_v6 = vadd.f32 %v1123_v12, %v1114_v19  ;;  %v1126_v23 = vadd.f32 %v1125_v0, %v1116_v34  ;;  %v1110_v13 = vadd.f32 %v1109_v48, %v1100_v50  ;;  %v1119_v17 = vmul.f32 %v3253_v5, %v3394_v11  ;;  %v1281_v5 = vld [vmem:[%s3934_s2 + $0x60] sm:$0xff] }
 0x30d   :  { %2240 = vmatprep.mubr.msk.bf16.mxu0 %vm2361_vm1, %v2360_v63  ;;  %v1112_v44 = vadd.f32 %v1111_v21, %v1102_v46  ;;  %v1088_v15 = vadd.f32 %v1087_v56, %v1070_v54  ;;  %v1296_v58 = vpack.c.bf16 %v1282_v53, %v1281_v5  ;;  %v1559_v38 = vpack.c.bf16 %v1411_v1, %v1410_v62 }
 0x30e   :  { %v1135_v32 = vadd.f32 %v3350_v3, %v1126_v23  ;;  %v1136_v35 = vadd.f32 %v3350_v3, %v1124_v6  ;;  %v1122_v27 = vadd.f32 %v1121_v43, %v1110_v13 }
 0x30f   :  { %v1137_v51 = vadd.f32 %v3350_v3, %v1112_v44  ;;  %v1108_v59 = vadd.f32 %v1107_v33, %v1088_v15  ;;  %2265 = vmatpush3.bf16.msra.mxu1 %v1296_v58  ;;  %2289 = vmatpush3.bf16.msra.mxu0 %v1559_v38 }
 0x310   :  { %v1142_v16 = vpack.c.bf16 %v1136_v35, %v1135_v32  ;;  %v1138_v37 = vadd.f32 %v3350_v3, %v1122_v27  ;;  %2266 = vmatprep.subr.bf16.mxu1 %v2360_v63  ;;  %2290 = vmatprep.subr.bf16.mxu0 %v2360_v63 }
 0x311   :  { %v1120_v14 = vadd.f32 %v1119_v17, %v1108_v59 }
 0x312   :  { %v1143_v2 = vpack.c.bf16 %v1138_v37, %v1137_v51 }
 0x313   :  { %v1139_v4 = vadd.f32 %v3350_v3, %v1120_v14  ;;  %v1284_v3 = vld [vmem:[%s3934_s2 + $0x78] sm:$0xff] }
 0x314   :  { %2241 = vmatmul.mubr.bf16.gmra.mrb[44].mxu0 %v1142_v16  ;;  %v1297_v61 = vpack.c.bf16 %v1284_v3, %v1283_v22 }
 0x315   :  { %2244 = vmatprep.mubr.msk.bf16.mxu0 %vm2361_vm1, %v2360_v63  ;;  %v1144_v20 = vpack.c.bf16 %v1139_v4, %v1139_v4 }
 0x316   :  { %2267 = vmatpush3.bf16.msra.mxu1 %v1297_v61 }
 0x317   :  { %2320 = vmatprep.subr.bf16.mxu1 %v2360_v63 }
 0x31c   :  { %2245 = vmatmul.mubr.bf16.gmra.mrb[48].mxu0 %v1143_v2 }
 0x31d   :  { %2248 = vmatprep.mubr.msk.bf16.mxu0 %vm2361_vm1, %v2360_v63 }
 0x324   :  { %2249 = vmatmul.mubr.bf16.gmra.mrb[52].mxu0 %v1144_v20 }
 0x325   :  { %2292 = vmatprep.mubr.msk.bf16.mxu0 %vm2361_vm1, %v2360_v63 }
 0x3d7   :  { %v1191_v28 = vpop.f32.mrb[36].mxu0 }
 0x3d8   :  { %v1192_v19 = vadd.f32 %v3457_v49, %v1191_v28  ;;  %v2234_v34 = vpop.f32.mrb[37].mxu0 }
 0x3d9   :  { %v1194_v9 = vpop.f32.mrb[38].mxu0 }
 0x3da   :  { %v1229_v12 = vadd.f32 %v1192_v19, %v3255_v36  ;;  %v1195_v0 = vadd.f32 %v3457_v49, %v1194_v9  ;;  %v2235_v31 = vpop.f32.mrb[39].mxu0 }
 0x3dc   :  { %v1251_v45 = vmul.f32 %v3463_v55, %v1229_v12  ;;  %v1230_v26 = vadd.f32 %v1195_v0, %v3243_v10  ;;  %vm1238_vm6 = vcmp.ge.f32.partialorder %v1229_v12, 0.0 }
 0x3de   :  { %vm1239_vm7 = vcmp.ge.f32.partialorder %v1230_v26, 0.0  ;;  %v1252_v6 = vmul.f32 %v3463_v55, %v1230_v26  ;;  %v1260_v50 = vsel %vm1238_vm6, %v1229_v12, %v1251_v45 }
 0x3df   :  { %v1199_v23 = vpop.f32.mrb[40].mxu0 }
 0x3e0   :  { %v1261_v48 = vsel %vm1239_vm7, %v1230_v26, %v1252_v6  ;;  %v1200_v32 = vadd.f32 %v3457_v49, %v1199_v23  ;;  %v2238_v35 = vpop.f32.mrb[41].mxu0 }
 0x3e1   :  { %v1285_v29 = vpack.c.bf16 %v1261_v48, %v1260_v50  ;;  %v1202_v43 = vpop.f32.mrb[42].mxu0  ;;  %v3510_v50 = vld [vmem:[%s3934_s2 + $0x80] ss:$0 sm:$0xff] }
 0x3e2   :  { %v1231_v36 = vadd.f32 %v1200_v32, %v3284_v18  ;;  %v1203_v46 = vadd.f32 %v3457_v49, %v1202_v43  ;;  %v2239_v13 = vpop.f32.mrb[43].mxu0  ;;  %v3517_v43 = vld [vmem:[%s3934_s2 + $0x88] ss:$0 sm:$0xff] }
 0x3e3   :  { %2269 = vmatmul.mubr.bf16.vlgmr.msra.gmra.mrb[40].mxu1 %v1285_v29 }
 0x3e4   :  { %v1253_v10 = vmul.f32 %v3463_v55, %v1231_v36  ;;  %v1232_v21 = vadd.f32 %v1203_v46, %v3297_v39  ;;  %2272 = vmatprep.mubr.msk.bf16.mxu1 %vm2361_vm1, %v2360_v63  ;;  %vm1240_vm8 = vcmp.ge.f32.partialorder %v1231_v36, 0.0 }
 0x3e6   :  { %vm1241_vm9 = vcmp.ge.f32.partialorder %v1232_v21, 0.0  ;;  %v1254_v16 = vmul.f32 %v3463_v55, %v1232_v21  ;;  %v1262_v18 = vsel %vm1240_vm8, %v1231_v36, %v1253_v10  ;;  %v1407_v10 = vld [vmem:[%s3934_s2 + $0x90] sm:$0xff] }
 0x3e7   :  { %v1207_v27 = vpop.f32.mrb[44].mxu0 }
 0x3e8   :  { %v1208_v56 = vadd.f32 %v3457_v49, %v1207_v27  ;;  %v2242_v44 = vpop.f32.mrb[45].mxu0  ;;  %v1263_v54 = vsel %vm1241_vm9, %v1232_v21, %v1254_v16 }
 0x3e9   :  { %v1210_v33 = vpop.f32.mrb[46].mxu0  ;;  %v1286_v37 = vpack.c.bf16 %v1263_v54, %v1262_v18 }
 0x3ea   :  { %v1233_v15 = vadd.f32 %v1208_v56, %v3327_v42  ;;  %v1211_v17 = vadd.f32 %v3457_v49, %v1210_v33  ;;  %v2243_v39 = vpop.f32.mrb[47].mxu0  ;;  %v3530_v33 = vrot.slane %v1407_v10, %v2619_v41 }
 0x3eb   :  { %2273 = vmatmul.mubr.bf16.gmra.mrb[44].mxu1 %v1286_v37  ;;  %v3533_v37 = vrot.slane %v1407_v10, %v2630_v47  ;;  %v3541_v39 = vrot.slane %v1407_v10, %v2596_v25 }
 0x3ec   :  { %v1255_v51 = vmul.f32 %v3463_v55, %v1233_v15  ;;  %v1234_v59 = vadd.f32 %v1211_v17, %v3338_v7  ;;  %2276 = vmatprep.mubr.msk.bf16.mxu1 %vm2361_vm1, %v2360_v63  ;;  %vm1242_vm10 = vcmp.ge.f32.partialorder %v1233_v15, 0.0  ;;  %v3538_v17 = vrot.slane %v1407_v10, %v2593_v24 }
 0x3ee   :  { %vm1243_vm11 = vcmp.ge.f32.partialorder %v1234_v59, 0.0  ;;  %v1256_v2 = vmul.f32 %v3463_v55, %v1234_v59  ;;  %v1264_v42 = vsel %vm1242_vm10, %v1233_v15, %v1255_v51 }
 0x3ef   :  { %v1215_v14 = vpop.f32.mrb[48].mxu0 }
 0x3f0   :  { %v1216_v4 = vadd.f32 %v3457_v49, %v1215_v14  ;;  %v2246_v20 = vpop.f32.mrb[49].mxu0  ;;  %v1265_v5 = vsel %vm1243_vm11, %v1234_v59, %v1256_v2  ;;  %v3546_v59 = vrot.slane %v1407_v10, %v2605_v30  ;;  %v3549_v2 = vrot.slane %v1407_v10, %v2652_v8 }
 0x3f1   :  { %v1218_v53 = vpop.f32.mrb[50].mxu0  ;;  %v1287_v22 = vpack.c.bf16 %v1265_v5, %v1264_v42  ;;  %v3565_v20 = vrot.slane %v1407_v10, %v2673_v40  ;;  %v3568_v42 = vrot.slane %v1407_v10, %v2681_v52 }
 0x3f2   :  { %v1235_v58 = vadd.f32 %v1216_v4, %v3362_v60  ;;  %v1219_v3 = vadd.f32 %v3457_v49, %v1218_v53  ;;  %v2247_v7 = vpop.f32.mrb[51].mxu0 }
 0x3f3   :  { %2277 = vmatmul.mubr.bf16.gmra.mrb[48].mxu1 %v1287_v22 }
 0x3f4   :  { %v1257_v61 = vmul.f32 %v3463_v55, %v1235_v58  ;;  %v1236_v62 = vadd.f32 %v1219_v3, %v3371_v57  ;;  %2280 = vmatprep.mubr.msk.bf16.mxu1 %vm2361_vm1, %v2360_v63  ;;  %vm1244_vm12 = vcmp.ge.f32.partialorder %v1235_v58, 0.0 }
 0x3f6   :  { %vm1245_vm13 = vcmp.ge.f32.partialorder %v1236_v62, 0.0  ;;  %v1258_v1 = vmul.f32 %v3463_v55, %v1236_v62  ;;  %v1266_v60 = vsel %vm1244_vm12, %v1235_v58, %v1257_v61 }
 0x3f7   :  { %v1223_v38 = vpop.f32.mrb[52].mxu0 }
 0x3f8   :  { %v1224_v28 = vadd.f32 %v3457_v49, %v1223_v38  ;;  %v2250_v19 = vpop.f32.mrb[53].mxu0  ;;  %v1267_v34 = vsel %vm1245_vm13, %v1236_v62, %v1258_v1  ;;  %v1412_v49 = vld [vmem:[%s3934_s2 + $0xb8] sm:$0xff] }
 0x3f9   :  { %v1226_v9 = vpop.f32.mrb[54].mxu0  ;;  %v1288_v12 = vpack.c.bf16 %v1267_v34, %v1266_v60 }
 0x3fa   :  { %v1237_v0 = vadd.f32 %v1224_v28, %v3394_v11  ;;  %v2251_v31 = vpop.f32.mrb[55].mxu0  ;;  %v1413_v11 = vld [vmem:[%s3934_s2 + $0xc0] sm:$0xff] }
 0x3fb   :  { %2281 = vmatmul.mubr.bf16.gmra.mrb[52].mxu1 %v1288_v12  ;;  %v1560_v6 = vpack.c.bf16 %v1413_v11, %v1412_v49  ;;  %v3601_v11 = vld [vmem:[%s3934_s2 + $0x98] ss:$0 sm:$0xff] }
 0x3fc   :  { %v1259_v57 = vmul.f32 %v3463_v55, %v1237_v0  ;;  %2284 = vmatprep.mubr.msk.bf16.mxu1 %vm2361_vm1, %v2360_v63  ;;  %vm1246_vm14 = vcmp.ge.f32.partialorder %v1237_v0, 0.0 }
 0x3fd   :  { %2291 = vmatpush3.bf16.msra.mxu0 %v1560_v6 }
 0x3fe   :  { %v1268_v45 = vsel %vm1246_vm14, %v1237_v0, %v1259_v57 }
 0x3ff   :  { %v1289_v26 = vpack.c.bf16 %v1268_v45, %v1268_v45 }
 0x403   :  { %2285 = vmatmul.mubr.bf16.gmra.mrb[56].mxu1 %v1289_v26 }
 0x404   :  { %2336 = vmatprep.mubr.msk.bf16.mxu1 %vm2361_vm1, %v2360_v63 }
 0x4b6   :  { %v1337_v55 = vpop.f32.mrb[40].mxu1 }
 0x4b7   :  { %v2270_v23 = vpop.f32.mrb[41].mxu1  ;;  %v1338_v29 = vadd.f32 %v3510_v50, %v1337_v55 }
 0x4b8   :  { %v1340_v48 = vpop.f32.mrb[42].mxu1 }
 0x4b9   :  { %v1341_v32 = vadd.f32 %v3510_v50, %v1340_v48  ;;  %v2271_v35 = vpop.f32.mrb[43].mxu1  ;;  %v1389_v13 = vmul.f32 %v3517_v43, %v1338_v29  ;;  %vm1376_vm2 = vcmp.ge.f32.partialorder %v1338_v29, 0.0 }
 0x4bb   :  { %v1390_v36 = vmul.f32 %v3517_v43, %v1341_v32  ;;  %vm1377_vm15 = vcmp.ge.f32.partialorder %v1341_v32, 0.0  ;;  %v3535_v15 = vsel %vm1376_vm2, %v1338_v29, %v1389_v13 }
 0x4bc   :  { %v1454_v25 = vmul.f32 %v3530_v33, %v3535_v15  ;;  %v1452_v8 = vmul.f32 %v3538_v17, %v3535_v15  ;;  %v1455_v4 = vmul.f32 %v3533_v37, %v3535_v15  ;;  %v1453_v12 = vmul.f32 %v3541_v39, %v3535_v15 }
 0x4bd   :  { %v3525_v56 = vsel %vm1377_vm15, %v1341_v32, %v1390_v36 }
 0x4be   :  { %v1345_v46 = vpop.f32.mrb[44].mxu1  ;;  %v1462_v41 = vmul.f32 %v3533_v37, %v3525_v56  ;;  %v1457_v24 = vmul.f32 %v3541_v39, %v3525_v56  ;;  %v1459_v53 = vmul.f32 %v3546_v59, %v3525_v56  ;;  %v1464_v61 = vmul.f32 %v3549_v2, %v3525_v56 }
 0x4bf   :  { %v1346_v21 = vadd.f32 %v3510_v50, %v1345_v46  ;;  %v2274_v16 = vpop.f32.mrb[45].mxu1  ;;  %v1456_v0 = vmul.f32 %v3538_v17, %v3525_v56  ;;  %v1461_v31 = vmul.f32 %v3530_v33, %v3525_v56 }
 0x4c0   :  { %v1348_v27 = vpop.f32.mrb[46].mxu1  ;;  %v1463_v22 = vadd.f32 %v1462_v41, %v1454_v25  ;;  %v1458_v62 = vadd.f32 %v1457_v24, %v1452_v8  ;;  %v1465_v57 = vadd.f32 %v1464_v61, %v1455_v4  ;;  %v1460_v32 = vadd.f32 %v1459_v53, %v1453_v12  ;;  %v3629_v53 = vld [vmem:[%s3934_s2 + $0xa0] ss:$0 sm:$0xff] }
 0x4c1   :  { %vm1378_vm3 = vcmp.ge.f32.partialorder %v1346_v21, 0.0  ;;  %v1391_v44 = vmul.f32 %v3517_v43, %v1346_v21  ;;  %v1349_v18 = vadd.f32 %v3510_v50, %v1348_v27  ;;  %v2275_v54 = vpop.f32.mrb[47].mxu1 }
 0x4c3   :  { %v3543_v51 = vsel %vm1378_vm3, %v1346_v21, %v1391_v44  ;;  %v1392_v47 = vmul.f32 %v3517_v43, %v1349_v18  ;;  %vm1379_vm4 = vcmp.ge.f32.partialorder %v1349_v18, 0.0 }
 0x4c4   :  { %v1472_v14 = vmul.f32 %v3549_v2, %v3543_v51  ;;  %v1468_v40 = vmul.f32 %v3546_v59, %v3543_v51  ;;  %v1466_v38 = vmul.f32 %v3541_v39, %v3543_v51  ;;  %v1470_v6 = vmul.f32 %v3533_v37, %v3543_v51 }
 0x4c5   :  { %v3572_v58 = vsel %vm1379_vm4, %v1349_v18, %v1392_v47 }
 0x4c6   :  { %v1353_v30 = vpop.f32.mrb[48].mxu1  ;;  %v1473_v28 = vadd.f32 %v1472_v14, %v1463_v22  ;;  %v1480_v60 = vmul.f32 %v3565_v20, %v3572_v58  ;;  %v1482_v34 = vmul.f32 %v3568_v42, %v3572_v58  ;;  %v1469_v45 = vadd.f32 %v1468_v40, %v1458_v62 }
 0x4c7   :  { %v2278_v5 = vpop.f32.mrb[49].mxu1  ;;  %v1354_v3 = vadd.f32 %v3510_v50, %v1353_v30  ;;  %v1476_v26 = vmul.f32 %v3530_v33, %v3572_v58  ;;  %v1478_v55 = vmul.f32 %v3533_v37, %v3572_v58  ;;  %v1467_v35 = vadd.f32 %v1466_v38, %v1456_v0 }
 0x4c8   :  { %v1356_v7 = vpop.f32.mrb[50].mxu1  ;;  %v1481_v29 = vadd.f32 %v1480_v60, %v1473_v28  ;;  %v1483_v36 = vadd.f32 %v1482_v34, %v1465_v57  ;;  %v1471_v8 = vadd.f32 %v1470_v6, %v1461_v31 }
 0x4c9   :  { %v1357_v52 = vadd.f32 %v3510_v50, %v1356_v7  ;;  %v2279_v1 = vpop.f32.mrb[51].mxu1  ;;  %vm1380_vm5 = vcmp.ge.f32.partialorder %v1354_v3, 0.0  ;;  %v1393_v19 = vmul.f32 %v3517_v43, %v1354_v3  ;;  %v1477_v54 = vadd.f32 %v1476_v26, %v1469_v45 }
 0x4ca   :  { %v1479_v24 = vadd.f32 %v1478_v55, %v1460_v32 }
 0x4cb   :  { %vm1381_vm6 = vcmp.ge.f32.partialorder %v1357_v52, 0.0  ;;  %v1394_v9 = vmul.f32 %v3517_v43, %v1357_v52  ;;  %v3596_v49 = vsel %vm1380_vm5, %v1354_v3, %v1393_v19  ;;  %vm1717_vm5 = vcmask 523264  }
 0x4cc   :  { %v1491_v10 = vmul.f32 %v3533_v37, %v3596_v49  ;;  %v1493_v21 = vmul.f32 %v3549_v2, %v3596_v49  ;;  %v1497_v27 = vmul.f32 %v3568_v42, %v3596_v49  ;;  %v1499_v44 = vmul.f32 %v3601_v11, %v3596_v49 }
 0x4cd   :  { %v3607_v23 = vsel %vm1381_vm6, %v1357_v52, %v1394_v9  ;;  %v1495_v22 = vmul.f32 %v3565_v20, %v3596_v49  ;;  %v1489_v62 = vmul.f32 %v3530_v33, %v3596_v49  ;;  %v1485_v38 = vmul.f32 %v3541_v39, %v3596_v49 }
 0x4ce   :  { %v1361_v48 = vpop.f32.mrb[52].mxu1  ;;  %v1511_v47 = vmul.f32 %v3601_v11, %v3607_v23  ;;  %v1498_v14 = vadd.f32 %v1497_v27, %v1481_v29  ;;  %v1500_v30 = vadd.f32 %v1499_v44, %v1483_v36  ;;  %v1507_v5 = vmul.f32 %v3549_v2, %v3607_v23 }
 0x4cf   :  { %v1362_v46 = vadd.f32 %v3510_v50, %v1361_v48  ;;  %v2282_v13 = vpop.f32.mrb[53].mxu1  ;;  %v1492_v3 = vadd.f32 %v1491_v10, %v1477_v54  ;;  %v1494_v7 = vadd.f32 %v1493_v21, %v1479_v24  ;;  %v1509_v1 = vmul.f32 %v3568_v42, %v3607_v23 }
 0x4d0   :  { %v1364_v16 = vpop.f32.mrb[54].mxu1  ;;  %v1512_v52 = vadd.f32 %v1511_v47, %v1498_v14  ;;  %v1545_v34 = vadd.f32 %v3629_v53, %v1500_v30  ;;  %v1496_v57 = vadd.f32 %v1495_v22, %v1471_v8  ;;  %v1505_v45 = vmul.f32 %v3533_v37, %v3607_v23 }
 0x4d1   :  { %vm1382_vm7 = vcmp.ge.f32.partialorder %v1362_v46, 0.0  ;;  %v1395_v18 = vmul.f32 %v3517_v43, %v1362_v46  ;;  %v2283_v41 = vpop.f32.mrb[55].mxu1  ;;  %v1365_v25 = vadd.f32 %v3510_v50, %v1364_v16  ;;  %v1508_v26 = vadd.f32 %v1507_v5, %v1492_v3 }
 0x4d2   :  { %v1546_v0 = vadd.f32 %v3629_v53, %v1512_v52  ;;  %v1490_v48 = vadd.f32 %v1489_v62, %v1467_v35  ;;  %v1487_v30 = vmul.f32 %v3546_v59, %v3596_v49  ;;  %vm1719_vm6 = vcmask 785408  }
 0x4d3   :  { %v3622_v4 = vsel %vm1382_vm7, %v1362_v46, %v1395_v18  ;;  %vm1383_vm8 = vcmp.ge.f32.partialorder %v1365_v25, 0.0  ;;  %v1396_v40 = vmul.f32 %v3517_v43, %v1365_v25  ;;  %v1510_v46 = vadd.f32 %v1509_v1, %v1496_v57 }
 0x4d4   :  { %v1519_v61 = vmul.f32 %v3568_v42, %v3622_v4  ;;  %v1517_v28 = vmul.f32 %v3565_v20, %v3622_v4  ;;  %v1554_v29 = vpack.c.bf16 %v1546_v0, %v1545_v34  ;;  %v1506_v44 = vadd.f32 %v1505_v45, %v1490_v48  ;;  %v1724_v48 = vld [vmem:[%s3932_s1 + $0x220] sm:$0xff] }
 0x4d5   :  { %v3645_v9 = vsel %vm1383_vm8, %v1365_v25, %v1396_v40  ;;  %v1547_v41 = vadd.f32 %v3629_v53, %v1510_v46  ;;  %v1513_v47 = vmul.f32 %v3530_v33, %v3622_v4  ;;  %v1515_v3 = vmul.f32 %v3533_v37, %v3622_v4 }
 0x4d6   :  { %v1520_v19 = vadd.f32 %v1519_v61, %v1494_v7  ;;  %v1369_v60 = vpop.f32.mrb[56].mxu1  ;;  %v1531_v55 = vmul.f32 %v3601_v11, %v3645_v9  ;;  %v1518_v10 = vadd.f32 %v1517_v28, %v1508_v26  ;;  %2293 = vmatmul.mubr.msk.bf16.vlgmr.msra.gmra.mrb[56].mxu0 %vm80_vm0, %v1554_v29  ;;  %v1527_v16 = vmul.f32 %v3565_v20, %v3645_v9  ;;  %v1742_v29 = vld [vmem:[%s3932_s1 + $0x2b0] sm:$0xff] }
 0x4d7   :  { %v1370_v12 = vadd.f32 %v3510_v50, %v1369_v60  ;;  %v2286_v31 = vpop.f32.mrb[57].mxu1  ;;  %v1474_v50 = vmul.f32 %v3538_v17, %v3572_v58  ;;  %v1529_v35 = vmul.f32 %v3568_v42, %v3645_v9  ;;  %2296 = vmatprep.mubr.msk.bf16.mxu0 %vm2361_vm1, %v2360_v63  ;;  %v1523_v7 = vmul.f32 %v3533_v37, %v3645_v9 }
 0x4d8   :  { %v1372_v6 = vpop.f32.mrb[58].mxu1  ;;  %v1532_v13 = vadd.f32 %v1531_v55, %v1520_v19  ;;  %v1528_v25 = vadd.f32 %v1527_v16, %v1506_v44  ;;  %v1501_v60 = vmul.f32 %v3541_v39, %v3607_v23  ;;  %v1521_v0 = vmul.f32 %v3530_v33, %v3645_v9  ;;  %v1741_v55 = vld [vmem:[%s3932_s1 + $0x2a8] sm:$0xff]  ;;  %v1744_v16 = vld [vmem:[%s3932_s1 + $0x2c0] sm:$0xff] }
 0x4d9   :  { %vm1384_vm9 = vcmp.ge.f32.partialorder %v1370_v12, 0.0  ;;  %v1397_v32 = vmul.f32 %v3517_v43, %v1370_v12  ;;  %v2287_v36 = vpop.f32.mrb[59].mxu1  ;;  %v1486_v27 = vadd.f32 %v1485_v38, %v1474_v50  ;;  %v1503_v43 = vmul.f32 %v3546_v59, %v3607_v23  ;;  %v1728_v44 = vld [vmem:[%s3932_s1 + $0x240] sm:$0xff] }
 0x4da   :  { %v1548_v20 = vadd.f32 %v3629_v53, %v1532_v13  ;;  %v1530_v14 = vadd.f32 %v1529_v35, %v1518_v10  ;;  %v1525_v38 = vmul.f32 %v3549_v2, %v3645_v9  ;;  %v1743_v36 = vld [vmem:[%s3932_s1 + $0x2b8] sm:$0xff]  ;;  %v1726_v13 = vld [vmem:[%s3932_s1 + $0x230] sm:$0xff]  ;;  %v1745_v35 = vld [vmem:[%s3932_s1 + $0x2c8] sm:$0xff] }
 0x4db   :  { %v3656_v21 = vsel %vm1384_vm9, %v1370_v12, %v1397_v32  ;;  %v1504_v8 = vadd.f32 %v1503_v43, %v1486_v27  ;;  %v1484_v12 = vmul.f32 %v3538_v17, %v3596_v49  ;;  %v1772_v50 = vpack.c.bf16 %v1743_v36, %v1742_v29  ;;  %v1727_v10 = vld [vmem:[%s3932_s1 + $0x238] sm:$0xff] }
 0x4dc   :  { %v1537_v18 = vmul.f32 %v3568_v42, %v3656_v21  ;;  %v1539_v54 = vmul.f32 %v3601_v11, %v3656_v21  ;;  %v1555_v24 = vpack.c.bf16 %v1548_v20, %v1547_v41  ;;  %v1475_v42 = vmul.f32 %v3541_v39, %v3572_v58  ;;  %v1747_v41 = vld [vmem:[%s3932_s1 + $0x2d8] sm:$0xff] }
 0x4dd   :  { %v1514_v11 = vadd.f32 %v1513_v47, %v1504_v8  ;;  %v1535_v59 = vmul.f32 %v3549_v2, %v3656_v21  ;;  %v1533_v2 = vmul.f32 %v3533_v37, %v3656_v21  ;;  %v1502_v57 = vadd.f32 %v1501_v60, %v1484_v12  ;;  %v1740_v37 = vld [vmem:[%s3932_s1 + $0x2a0] sm:$0xff] }
 0x4de   :  { %v1538_v5 = vadd.f32 %v1537_v18, %v1528_v25  ;;  %v1540_v22 = vadd.f32 %v1539_v54, %v1530_v14  ;;  %2297 = vmatmul.mubr.msk.bf16.gmra.mrb[60].mxu0 %vm80_vm0, %v1555_v24  ;;  %v1488_v61 = vadd.f32 %v1487_v30, %v1475_v42  ;;  %v1771_v32 = vpack.c.bf16 %v1741_v55, %v1740_v37  ;;  %v1729_v18 = vld [vmem:[%s3932_s1 + $0x248] sm:$0xff]  ;;  %v1746_v54 = vld [vmem:[%s3932_s1 + $0x2d0] sm:$0xff]  ;;  %v1731_v25 = vld [vmem:[%s3932_s1 + $0x258] sm:$0xff] }
 0x4df   :  { %2300 = vmatprep.mubr.msk.bf16.mxu0 %vm2361_vm1, %v2360_v63  ;;  %v1524_v1 = vadd.f32 %v1523_v7, %v1514_v11  ;;  %v1522_v45 = vadd.f32 %v1521_v0, %v1502_v57  ;;  %v1764_v27 = vpack.c.bf16 %v1727_v10, %v1726_v13  ;;  %v1773_v43 = vpack.c.bf16 %v1745_v35, %v1744_v16  ;;  %v1730_v24 = vld [vmem:[%s3932_s1 + $0x250] sm:$0xff]  ;;  %v1748_v14 = vld [vmem:[%s3932_s1 + $0x2e0] sm:$0xff]  ;;  %v1749_v30 = vld [vmem:[%s3932_s1 + $0x2e8] sm:$0xff] }
 0x4e0   :  { %v1549_v62 = vadd.f32 %v3629_v53, %v1540_v22  ;;  %v1550_v40 = vadd.f32 %v3629_v53, %v1538_v5  ;;  %v1516_v52 = vadd.f32 %v1515_v3, %v1488_v61  ;;  %2070 = vmatprep.subr.bf16.mxu0 %v1771_v32  ;;  %v1765_v20 = vpack.c.bf16 %v1729_v18, %v1728_v44  ;;  %v1732_v22 = vld [vmem:[%s3932_s1 + $0x260] sm:$0xff]  ;;  %v1733_v42 = vld [vmem:[%s3932_s1 + $0x268] sm:$0xff]  ;;  %v1750_v11 = vld [vmem:[%s3932_s1 + $0x2f0] sm:$0xff] }
 0x4e1   :  { %v1536_v19 = vadd.f32 %v1535_v59, %v1524_v1  ;;  %v1534_v6 = vadd.f32 %v1533_v2, %v1522_v45  ;;  %v1774_v47 = vpack.c.bf16 %v1747_v41, %v1746_v54  ;;  %v1766_v8 = vpack.c.bf16 %v1731_v25, %v1730_v24  ;;  %v1751_v3 = vld [vmem:[%s3932_s1 + $0x2f8] sm:$0xff]  ;;  %v1734_v59 = vld [vmem:[%s3932_s1 + $0x270] sm:$0xff]  ;;  %v1753_v55 = vld [vmem:[%s3932_s1 + $0x308] sm:$0xff] }
 0x4e2   :  { %v1556_v28 = vpack.c.bf16 %v1550_v40, %v1549_v62  ;;  %v1526_v34 = vadd.f32 %v1525_v38, %v1516_v52  ;;  %v1775_v5 = vpack.c.bf16 %v1749_v30, %v1748_v14  ;;  %v1767_v7 = vpack.c.bf16 %v1733_v42, %v1732_v22  ;;  %v1735_v62 = vld [vmem:[%s3932_s1 + $0x278] sm:$0xff]  ;;  %v3785_v52 = vld [vmem:[%s3934_s2 + $0xc8] ss:$0 sm:$0xff]  ;;  %v1738_v30 = vld [vmem:[%s3932_s1 + $0x290] sm:$0xff] }
 0x4e3   :  { %v1552_v31 = vadd.f32 %v3629_v53, %v1536_v19  ;;  %v1553_v33 = vadd.f32 %v3629_v53, %v1534_v6  ;;  %v1776_v61 = vpack.c.bf16 %v1751_v3, %v1750_v11  ;;  %v1768_v40 = vpack.c.bf16 %v1735_v62, %v1734_v59  ;;  %v3791_v19 = vld [vmem:[%s3934_s2 + $0xd0] ss:$0 sm:$0xff]  ;;  %v1739_v11 = vld [vmem:[%s3932_s1 + $0x298] sm:$0xff] }
 0x4e4   :  { %v1551_v39 = vadd.f32 %v3629_v53, %v1526_v34  ;;  %v1725_v53 = vld [vmem:[%s3932_s1 + $0x228] sm:$0xff]  ;;  %v1770_v3 = vpack.c.bf16 %v1739_v11, %v1738_v30  ;;  %v1883_v11 = vld [vmem:[%s3932_s1 + $0x3b0] sm:$0xff] }
 0x4e5   :  { %v1558_v17 = vpack.c.bf16 %v1553_v33, %v1553_v33  ;;  %v1763_v46 = vpack.c.bf16 %v1725_v53, %v1724_v48  ;;  %v1736_v48 = vld [vmem:[%s3932_s1 + $0x280] sm:$0xff] }
 0x4e6   :  { %2301 = vmatmul.mubr.msk.bf16.gmra.mrb[64].mxu0 %vm80_vm0, %v1556_v28  ;;  %v1557_v26 = vpack.c.bf16 %v1552_v31, %v1551_v39 }
 0x4e7   :  { %2304 = vmatprep.mubr.msk.bf16.mxu0 %vm2361_vm1, %v2360_v63  ;;  %2071 = vmatpush3.bf16.msra.mxu0 %v1763_v46 }
 0x4e8   :  { %2072 = vmatprep.subr.bf16.mxu0 %v1772_v50 }
 0x4eb   :  { %2073 = vmatpush3.bf16.msra.mxu0 %v1764_v27 }
 0x4ec   :  { %2074 = vmatprep.subr.bf16.mxu0 %v1773_v43 }
 0x4ee   :  { %2305 = vmatmul.mubr.msk.bf16.gmra.mrb[68].mxu0 %vm80_vm0, %v1557_v26 }
 0x4ef   :  { %2308 = vmatprep.mubr.msk.bf16.mxu0 %vm2361_vm1, %v2360_v63  ;;  %2075 = vmatpush3.bf16.msra.mxu0 %v1765_v20 }
 0x4f0   :  { %2076 = vmatprep.subr.bf16.mxu0 %v1774_v47 }
 0x4f3   :  { %2077 = vmatpush3.bf16.msra.mxu0 %v1766_v8 }
 0x4f4   :  { %2078 = vmatprep.subr.bf16.mxu0 %v1775_v5 }
 0x4f6   :  { %2309 = vmatmul.mubr.msk.bf16.gmra.mrb[72].mxu0 %vm80_vm0, %v1558_v17 }
 0x4f7   :  { %2079 = vmatpush3.bf16.msra.mxu0 %v1767_v7 }
 0x4f8   :  { %2080 = vmatprep.subr.bf16.mxu0 %v1776_v61 }
 0x4fb   :  { %2081 = vmatpush3.bf16.msra.mxu0 %v1768_v40 }
 0x5a9   :  { %v1614_v1 = vpop.f32.mrb[56].mxu0 }
 0x5aa   :  { %v1615_v38 = vadd.f32 %v3785_v52, %v1614_v1  ;;  %v2294_v28 = vpop.f32.mrb[57].mxu0 }
 0x5ab   :  { %v1617_v60 = vpop.f32.mrb[58].mxu0 }
 0x5ac   :  { %v1652_v34 = vadd.f32 %v1615_v38, %v3535_v15  ;;  %v2295_v12 = vpop.f32.mrb[59].mxu0  ;;  %v1618_v26 = vadd.f32 %v3785_v52, %v1617_v60  ;;  %v1752_v15 = vld [vmem:[%s3932_s1 + $0x300] sm:$0xff] }
 0x5ad   :  { %v1777_v53 = vpack.c.bf16 %v1753_v55, %v1752_v15  ;;  %v1876_v55 = vld [vmem:[%s3932_s1 + $0x378] sm:$0xff] }
 0x5ae   :  { %vm1661_vm10 = vcmp.ge.f32.partialorder %v1652_v34, 0.0  ;;  %v1674_v0 = vmul.f32 %v3791_v19, %v1652_v34  ;;  %v1653_v6 = vadd.f32 %v1618_v26, %v3525_v56  ;;  %v1737_v56 = vld [vmem:[%s3932_s1 + $0x288] sm:$0xff]  ;;  %v1872_v26 = vld [vmem:[%s3932_s1 + $0x358] sm:$0xff] }
 0x5af   :  { %v1769_v13 = vpack.c.bf16 %v1737_v56, %v1736_v48  ;;  %2082 = vmatprep.subr.bf16.mxu0 %v1777_v53  ;;  %v1877_v48 = vld [vmem:[%s3932_s1 + $0x380] sm:$0xff]  ;;  %v1878_v53 = vld [vmem:[%s3932_s1 + $0x388] sm:$0xff]  ;;  %v1879_v56 = vld [vmem:[%s3932_s1 + $0x390] sm:$0xff] }
 0x5b0   :  { %v3795_v2 = vsel %vm1661_vm10, %v1652_v34, %v1674_v0  ;;  %v1675_v10 = vmul.f32 %v3791_v19, %v1653_v6  ;;  %vm1662_vm12 = vcmp.ge.f32.partialorder %v1653_v6, 0.0 }
 0x5b1   :  { %v1622_v31 = vpop.f32.mrb[60].mxu0  ;;  %2083 = vmatpush3.bf16.msra.mxu0 %v1769_v13 }
 0x5b2   :  { %v2298_v57 = vpop.f32.mrb[61].mxu0  ;;  %v1623_v29 = vadd.f32 %v3785_v52, %v1622_v31  ;;  %v1684_v47 = vsel %vm1662_vm12, %v1653_v6, %v1675_v10 }
 0x5b3   :  { %v1625_v39 = vpop.f32.mrb[62].mxu0 }
 0x5b4   :  { %v2299_v45 = vpop.f32.mrb[63].mxu0  ;;  %v1626_v16 = vadd.f32 %v3785_v52, %v1625_v39  ;;  %v1654_v43 = vadd.f32 %v1623_v29, %v3543_v51  ;;  %v1755_v51 = vld [vmem:[%s3932_s1 + $0x318] sm:$0xff]  ;;  %v1891_v29 = vpack.c.bf16 %v1879_v56, %v1878_v53 }
 0x5b5   :  { %v1870_v45 = vld [vmem:[%s3932_s1 + $0x348] sm:$0xff] }
 0x5b6   :  { %v1655_v54 = vadd.f32 %v1626_v16, %v3572_v58  ;;  %v1676_v58 = vmul.f32 %v3791_v19, %v1654_v43  ;;  %vm1663_vm14 = vcmp.ge.f32.partialorder %v1654_v43, 0.0 }
 0x5b8   :  { %v1677_v59 = vmul.f32 %v3791_v19, %v1655_v54  ;;  %vm1664_vm2 = vcmp.ge.f32.partialorder %v1655_v54, 0.0 }
 0x5b9   :  { %v1630_v33 = vpop.f32.mrb[64].mxu0 }
 0x5ba   :  { %v1631_v17 = vadd.f32 %v3785_v52, %v1630_v33  ;;  %v2302_v37 = vpop.f32.mrb[65].mxu0  ;;  %v1686_v34 = vsel %vm1664_vm2, %v1655_v54, %v1677_v59 }
 0x5bb   :  { %v1633_v32 = vpop.f32.mrb[66].mxu0  ;;  %v1875_v37 = vld [vmem:[%s3932_s1 + $0x370] sm:$0xff] }
 0x5bc   :  { %v1656_v36 = vadd.f32 %v1631_v17, %v3596_v49  ;;  %v1634_v46 = vadd.f32 %v3785_v52, %v1633_v32  ;;  %v2303_v50 = vpop.f32.mrb[67].mxu0  ;;  %v1874_v17 = vld [vmem:[%s3932_s1 + $0x368] sm:$0xff]  ;;  %v1890_v32 = vpack.c.bf16 %v1877_v48, %v1876_v55 }
 0x5bd   :  { %v1889_v15 = vpack.c.bf16 %v1875_v37, %v1874_v17 }
 0x5be   :  { %vm1665_vm11 = vcmp.ge.f32.partialorder %v1656_v36, 0.0  ;;  %v1678_v35 = vmul.f32 %v3791_v19, %v1656_v36  ;;  %v1657_v27 = vadd.f32 %v1634_v46, %v3607_v23  ;;  %v1754_v23 = vld [vmem:[%s3932_s1 + $0x310] sm:$0xff] }
 0x5bf   :  { %v1778_v42 = vpack.c.bf16 %v1755_v51, %v1754_v23  ;;  %v1759_v51 = vld [vmem:[%s3932_s1 + $0x338] sm:$0xff] }
 0x5c0   :  { %v3820_v44 = vsel %vm1665_vm11, %v1656_v36, %v1678_v35  ;;  %vm1666_vm13 = vcmp.ge.f32.partialorder %v1657_v27, 0.0  ;;  %v1679_v49 = vmul.f32 %v3791_v19, %v1657_v27 }
 0x5c1   :  { %v1638_v18 = vpop.f32.mrb[68].mxu0  ;;  %2084 = vmatprep.subr.bf16.mxu0 %v1778_v42  ;;  %v1882_v42 = vld [vmem:[%s3932_s1 + $0x3a8] sm:$0xff] }
 0x5c2   :  { %v1639_v41 = vadd.f32 %v3785_v52, %v1638_v18  ;;  %v2306_v20 = vpop.f32.mrb[69].mxu0  ;;  %v1688_v24 = vsel %vm1666_vm13, %v1657_v27, %v1679_v49  ;;  %2085 = vmatpush3.bf16.msra.mxu0 %v1770_v3  ;;  %v1893_v3 = vpack.c.bf16 %v1883_v11, %v1882_v42 }
 0x5c3   :  { %v1641_v25 = vpop.f32.mrb[70].mxu0  ;;  %v2345_v14 = vpack.i.bf16 %v1684_v47, %v1688_v24  ;;  %2312 = vmatprep.subr.bf16.mxu0 %v2360_v63  ;;  %v1756_v20 = vld [vmem:[%s3932_s1 + $0x320] sm:$0xff]  ;;  %v1757_v47 = vld [vmem:[%s3932_s1 + $0x328] sm:$0xff] }
 0x5c4   :  { %v1658_v8 = vadd.f32 %v1639_v41, %v3622_v4  ;;  %v1642_v5 = vadd.f32 %v3785_v52, %v1641_v25  ;;  %v2307_v22 = vpop.f32.mrb[71].mxu0  ;;  %v1685_v4 = vsel %vm1663_vm14, %v1654_v43, %v1676_v58  ;;  %v1779_v23 = vpack.c.bf16 %v1757_v47, %v1756_v20 }
 0x5c5   :  { %2346 = vrot.lane.b32.xlu0 %v2345_v14, %s2362_s4 }
 0x5c6   :  { %vm1667_vm15 = vcmp.ge.f32.partialorder %v1658_v8, 0.0  ;;  %v1680_v7 = vmul.f32 %v3791_v19, %v1658_v8  ;;  %v1659_v61 = vadd.f32 %v1642_v5, %v3645_v9  ;;  %v1881_v5 = vld [vmem:[%s3932_s1 + $0x3a0] sm:$0xff] }
 0x5c8   :  { %v1689_v62 = vsel %vm1667_vm15, %v1658_v8, %v1680_v7  ;;  %vm1668_vm3 = vcmp.ge.f32.partialorder %v1659_v61, 0.0  ;;  %v1681_v40 = vmul.f32 %v3791_v19, %v1659_v61  ;;  %v1880_v8 = vld [vmem:[%s3932_s1 + $0x398] sm:$0xff] }
 0x5c9   :  { %v1646_v1 = vpop.f32.mrb[72].mxu0  ;;  %v2350_v38 = vpack.i.bf16 %v1685_v4, %v1689_v62  ;;  %v1892_v22 = vpack.c.bf16 %v1881_v5, %v1880_v8  ;;  %v1884_v7 = vld [vmem:[%s3932_s1 + $0x3b8] sm:$0xff] }
 0x5ca   :  { %v1647_v28 = vadd.f32 %v3785_v52, %v1646_v1  ;;  %v2310_v60 = vpop.f32.mrb[73].mxu0  ;;  %v1690_v12 = vsel %vm1668_vm3, %v1659_v61, %v1681_v40  ;;  %v1871_v52 = vld [vmem:[%s3932_s1 + $0x350] sm:$0xff]  ;;  %v1885_v61 = vld [vmem:[%s3932_s1 + $0x3c0] sm:$0xff] }
 0x5cb   :  { %2351 = vrot.lane.b32.xlu0 %v2350_v38, %s2363_s5  ;;  %v1649_v9 = vpop.f32.mrb[74].mxu0  ;;  %v2355_v0 = vpack.i.bf16 %v1686_v34, %v1690_v12  ;;  %v1887_v6 = vpack.c.bf16 %v1871_v52, %v1870_v45  ;;  %v1894_v59 = vpack.c.bf16 %v1885_v61, %v1884_v7 }
 0x5cc   :  { %v1660_v31 = vadd.f32 %v1647_v28, %v3656_v21  ;;  %v2311_v57 = vpop.f32.mrb[75].mxu0  ;;  %v1873_v21 = vld [vmem:[%s3932_s1 + $0x360] sm:$0xff] }
 0x5cd   :  { %2356 = vrot.lane.b32.xlu1 %v2355_v0, %s2364_s6  ;;  %2321 = vmatpush3.bf16.msra.mxu1 %v1887_v6  ;;  %v1988_v28 = vld [vmem:[%s3932_s1 + $0x340] ss:$0 sm:$0xff] }
 0x5ce   :  { %vm1669_vm4 = vcmp.ge.f32.partialorder %v1660_v31, 0.0  ;;  %v1682_v39 = vmul.f32 %v3791_v19, %v1660_v31  ;;  %v1888_v19 = vpack.c.bf16 %v1873_v21, %v1872_v26  ;;  %2322 = vmatprep.subr.bf16.mxu1 %v2360_v63 }
 0x5d0   :  { %v1691_v33 = vsel %vm1669_vm4, %v1660_v31, %v1682_v39  ;;  %v1990_v39 = vld [vmem:[%s3932_s1 + $0x3c8] ss:$0 sm:$0xff] }
 0x5d1   :  { %2323 = vmatpush3.bf16.msra.mxu1 %v1888_v19  ;;  %v1762_v58 = vpack.c.bf16 %v1691_v33, %v1691_v33 }
 0x5d2   :  { %2324 = vmatprep.subr.bf16.mxu1 %v2360_v63 }
 0x5d5   :  { %2325 = vmatpush3.bf16.msra.mxu1 %v1889_v15 }
 0x5d6   :  { %2326 = vmatprep.subr.bf16.mxu1 %v2360_v63 }
 0x5d9   :  { %2327 = vmatpush3.bf16.msra.mxu1 %v1890_v32 }
 0x5da   :  { %2328 = vmatprep.subr.bf16.mxu1 %v2360_v63 }
 0x5dd   :  { %2329 = vmatpush3.bf16.msra.mxu1 %v1891_v29 }
 0x5de   :  { %2330 = vmatprep.subr.bf16.mxu1 %v2360_v63 }
 0x5e1   :  { %2331 = vmatpush3.bf16.msra.mxu1 %v1892_v22 }
 0x5e2   :  { %2332 = vmatprep.subr.bf16.mxu1 %v2360_v63 }
 0x5e5   :  { %2333 = vmatpush3.bf16.msra.mxu1 %v1893_v3 }
 0x5e6   :  { %2334 = vmatprep.subr.bf16.mxu1 %v2360_v63 }
 0x5e9   :  { %2335 = vmatpush3.bf16.msra.mxu1 %v1894_v59 }
 0x637   :  { %v2347_v36 = vpop.permute.xlu0 %2346 }
 0x638   :  { %v2349_v46 = vunpack.i.h.bf16 %v2347_v36  ;;  %v2348_v50 = vunpack.i.l.bf16 %v2347_v36 }
 0x63a   :  { %v1716_v35 = vsel %vm80_vm0, %v3795_v2, %v2349_v46  ;;  %v1721_v27 = vsel %vm80_vm0, %v3820_v44, %v2348_v50  ;;  %v1758_v44 = vld [vmem:[%s3932_s1 + $0x330] sm:$0xff] }
 0x63b   :  { %v1780_v30 = vpack.c.bf16 %v1759_v51, %v1758_v44 }
 0x63d   :  { %v2352_v13 = vpop.permute.xlu0 %2351 }
 0x63e   :  { %v2354_v10 = vunpack.i.h.bf16 %v2352_v13  ;;  %v2353_v16 = vunpack.i.l.bf16 %v2352_v13 }
 0x63f   :  { %v2357_v43 = vpop.permute.xlu1 %2356 }
 0x640   :  { %v1718_v49 = vsel %vm1717_vm5, %v1716_v35, %v2354_v10  ;;  %v1722_v18 = vsel %vm1717_vm5, %v1721_v27, %v2353_v16  ;;  %v2359_v54 = vunpack.i.h.bf16 %v2357_v43  ;;  %v2358_v41 = vunpack.i.l.bf16 %v2357_v43 }
 0x642   :  { %v1720_v24 = vsel %vm1719_vm6, %v1718_v49, %v2359_v54  ;;  %v1723_v25 = vsel %vm1719_vm6, %v1722_v18, %v2358_v41 }
 0x643   :  { %v1760_v2 = vpack.c.bf16 %v1720_v24, %v1720_v24  ;;  %v1761_v14 = vpack.c.bf16 %v1723_v25, %v1723_v25 }
 0x645   :  { %1821 = vmatprep.mubr.bf16.mxu0 %v1761_v14 }
 0x646   :  { %1822 = vmatmul.mubr.bf16.vlgmr.msra.gmra.mrb[76].mxu0 %v1760_v2 }
 0x647   :  { %2313 = vmatpush3.bf16.msra.mxu0 %v1779_v23  ;;  %2316 = vmatprep.mubr.msk.bf16.mxu0 %vm2361_vm1, %v2360_v63 }
 0x648   :  { %2314 = vmatprep.subr.bf16.mxu0 %v2360_v63 }
 0x64b   :  { %2315 = vmatpush3.bf16.msra.mxu0 %v1780_v30 }
 0x64e   :  { %2317 = vmatmul.mubr.msk.bf16.vlgmr.msra.gmra.mrb[80].mxu0 %vm80_vm0, %v1762_v58 }
 0x719   :  { %v2086_v4 = vpop.f32.mrb[76].mxu0 }
 0x71a   :  { %v2087_v62 = vpop.f32.mrb[77].mxu0 }
 0x71b   :  { %v2088_v40 = vadd.f32 %v2087_v62, %v2086_v4  ;;  %v2089_v1 = vpop.f32.mrb[78].mxu0 }
 0x71c   :  { %v2090_v38 = vpop.f32.mrb[79].mxu0 }
 0x71d   :  { %v1824_v63 = vadd.f32 %v2088_v40, %v1988_v28 }
 0x721   :  { %v1863_v60 = vpop.f32.mrb[80].mxu0 }
 0x722   :  { %v1864_v34 = vadd.f32 %v1863_v60, %v1824_v63  ;;  %v2318_v12 = vpop.f32.mrb[81].mxu0 }
 0x723   :  { %v1866_v9 = vpop.f32.mrb[82].mxu0 }
 0x724   :  { %v1869_v0 = vmax.f32 %v1864_v34, 0.0  ;;  %v2319_v31 = vpop.f32.mrb[83].mxu0 }
 0x726   :  { %v1886_v57 = vpack.c.bf16 %v1869_v0, %v1869_v0 }
 0x728   :  { %2337 = vmatmul.mubr.bf16.vlgmr.msra.gmra.mrb[60].mxu1 %v1886_v57 }
 0x7fb   :  { %v1934_v45 = vpop.f32.mrb[60].mxu1 }
 0x7fc   :  { %v1935_v52 = vadd.f32 %v1990_v39, %v1934_v45  ;;  %v2338_v26 = vpop.f32.mrb[61].mxu1 }
 0x7fd   :  { %v1937_v6 = vpop.f32.mrb[62].mxu1 }
 0x7fe   :  { %v1940_v21 = vmax.f32 %v1935_v52, 0.0  ;;  %v2339_v33 = vpop.f32.mrb[63].mxu1 }
 0x800   :  { %1941 = vst [vmem:[%s3935_s3] sm:$0xff] %v1940_v21 }

</bundles_post_ra>
